<compile_context>
chip_gen: v7x
topology: tpu7x:2x2x1
jax: 0.10.0
libtpu: 0.0.40
codegen_flags: <defaults>
</compile_context>

<pallas_src>
import functools

import jax
import jax.numpy as jnp
from jax import lax
from jax.experimental import pallas as pl
from jax.experimental.pallas import tpu as pltpu

_LANE = 128
_BIG = 1e30  # finite "infinity": keeps padded columns out of hardest-negative mining


def _quadruplet_block_kernel(ids_col_ref, ids_row_ref, sq_col_ref, sq_row_ref,
                             gram_ref, out_ref, *, b_real, block_rows,
                             margin_triple, margin_inter, squared):
    f32 = jnp.float32
    BM = block_rows
    Bp = gram_ref.shape[1]
    row0 = pl.multiple_of(pl.program_id(0) * BM, BM)       # global anchor-row offset

    gram_blk = gram_ref[pl.ds(row0, BM), :]                 # (BM, Bp)  <e_i, e_l>
    sq_blk = sq_col_ref[pl.ds(row0, BM), :]                 # (BM, 1)   |e_i|^2
    ids_blk = ids_col_ref[pl.ds(row0, BM), :]               # (BM, 1)   int32
    sq_all = sq_row_ref[...]                                # (1, Bp)
    ids_all = ids_row_ref[...]                              # (1, Bp)

    li = lax.broadcasted_iota(jnp.int32, (BM, Bp), 0)
    cj = lax.broadcasted_iota(jnp.int32, (BM, Bp), 1)
    diag = (li + row0) == cj                                           # (BM, Bp) bool
    valid_col = cj < b_real                                            # (BM, Bp) bool
    valid_row = ((lax.broadcasted_iota(jnp.int32, (BM, 1), 0) + row0)
                 < b_real).astype(f32)                                 # (BM, 1)

    def _dist(sq_r, sq_c, dots):
        d2 = jnp.maximum(sq_r + sq_c - 2.0 * dots, 0.0)
        if squared:
            return d2
        zero = d2 == 0.0
        return jnp.where(zero, 0.0, jnp.sqrt(jnp.where(zero, 1.0, d2)))

    pd = _dist(sq_blk, sq_all, gram_blk)                               # (BM, Bp)
    same_id = ids_blk == ids_all                                       # (BM, Bp) bool

    # ---- batch-hard positive (masked row max, first-occurrence argmax) ----------
    pos_mask = same_id & (~diag) & valid_col
    apd = jnp.where(pos_mask, pd, 0.0)
    hpd = jnp.max(apd, axis=1, keepdims=True)                          # (BM, 1)
    hp_idx = jnp.min(jnp.where(apd == hpd, cj, Bp), axis=1, keepdims=True)
    hp_b = cj == hp_idx                                                # one-hot (bool)

    # ---- batch-hard negative ------------------------------------------------------
    mad = jnp.max(jnp.where(valid_col, pd, 0.0), axis=1, keepdims=True)
    andist = jnp.where(valid_col, pd + jnp.where(same_id, mad, 0.0), _BIG)
    hnd = jnp.min(andist, axis=1, keepdims=True)
    hn_idx = jnp.min(jnp.where(andist == hnd, cj, Bp), axis=1, keepdims=True)
    hn_b = cj == hn_idx                                                # one-hot (bool)

    triplet = jnp.maximum(hpd - hnd + margin_triple, 0.0)              # (BM, 1)

    # ---- fused one-hot gather of Gram rows at hardest positive / negative ---------
    # HIGHEST keeps the gathered rows f32-accurate (near-exact row selection).
    sel = jnp.concatenate((hp_b.astype(f32), hn_b.astype(f32)), axis=0)   # (2BM, Bp)
    gram_sel = lax.dot_general(sel, gram_ref[...], (((1,), (0,)), ((), ())),
                               precision=lax.Precision.HIGHEST,
                               preferred_element_type=f32)                # (2BM, Bp)

    # Gathered norms / identities: exact VPU selects + row sums (no MXU passes).
    sq_hp = jnp.sum(jnp.where(hp_b, sq_all, 0.0), axis=1, keepdims=True)  # (BM, 1)
    sq_hn = jnp.sum(jnp.where(hn_b, sq_all, 0.0), axis=1, keepdims=True)
    ids_hp = jnp.sum(jnp.where(hp_b, ids_all, 0), axis=1, keepdims=True)  # int32
    ids_hn = jnp.sum(jnp.where(hn_b, ids_all, 0), axis=1, keepdims=True)

    php = _dist(sq_hp, sq_all, gram_sel[:BM, :])       # php[i, j] = d[hp_i, j]
    phn = _dist(sq_hn, sq_all, gram_sel[BM:, :])       # phn[i, l] = d[hn_i, l]

    hp_same = ids_hp == ids_all                        # eq[hp_i, l]
    hn_same = ids_hn == ids_all                        # eq[hn_i, l]
    hp_eq_hn = ids_hp == ids_hn                        # (BM, 1)

    # ---- quadruplet / inter-class term: closed form, no O(B) loop -----------------
    # Every admissible j shares ids[hp_i], so the (ids[j] != ids[l]) factor is
    # j-independent and max_j relu(d[j,hp_i] - d[hn_i,l] + m) factorises into
    # relu(max_j d[j,hp_i] + m - d[hn_i,l]) times j-invariant masks (exact).
    mj = (~hp_b) & hp_same & valid_col                                   # admissible j
    maxA = jnp.max(jnp.where(mj, php, 0.0), axis=1, keepdims=True)       # (BM, 1)
    has_j = jnp.max(jnp.where(mj, 1.0, 0.0), axis=1, keepdims=True)      # {0., 1.}
    row_gate = jnp.where(hp_eq_hn, 0.0, has_j)                           # (BM, 1)
    col_ok = (~hn_same) & (~hp_same) & valid_col                         # (BM, Bp)
    inter = jnp.where(col_ok,
                      jnp.maximum(maxA + margin_inter - phn, 0.0) * row_gate,
                      0.0)

    # ---- lane-dense per-block partial of the final mean ----------------------------
    inv_b = 1.0 / float(b_real)
    partial = (jnp.sum(triplet * valid_row) * inv_b
               + jnp.sum(inter * valid_row) * (inv_b * inv_b))
    out_ref[...] = jnp.zeros((1, 8, _LANE), f32) + partial


def _round_up(x, m):
    return ((x + m - 1) // m) * m


def _vmem_capacity_bytes():
    try:
        return int(pltpu.get_tpu_info().vmem_capacity_bytes)
    except Exception:
        return 64 << 20          # conservative fallback (v7x per-TensorCore VMEM)


def batch_hard_quadruplet_loss(embs, idtys, margin_triple=0.2, margin_inter=0.1,
                               squared=False, normalize_features=False):
    embs = jnp.asarray(embs, jnp.float32)
    ids = jnp.asarray(idtys, jnp.int32).reshape(-1)
    B, D = embs.shape
    if normalize_features:
        embs = embs / jnp.linalg.norm(embs, axis=-1, keepdims=True)

    # Pad the batch to a lane-dense multiple of 128; validity masks inside the
    # kernel (and the 1/B, 1/B^2 denominators) keep the loss identical.
    Bp = _round_up(max(B, _LANE), _LANE)
    e_pad = jnp.pad(embs, ((0, Bp - B), (0, 0)))
    ids_pad = jnp.pad(ids, (0, Bp - B))

    # Hoisted out of the kernel (review #2/#7): ONE HIGHEST-precision Gram matmul
    # and the squared row norms; the kernel never touches the raw embeddings.
    gram = jnp.matmul(e_pad, e_pad.T, precision=lax.Precision.HIGHEST)
    sq = jnp.diagonal(gram)                     # matches the reference's diag(dot)

    ids_col = ids_pad.reshape(Bp, 1)
    ids_row = ids_pad.reshape(1, Bp)
    sq_col = sq.reshape(Bp, 1)
    sq_row = sq.reshape(1, Bp)

    # Generation-aware tiling (review #4/#5/#10).
    vmem_cap = _vmem_capacity_bytes()
    BM = 256 if (vmem_cap >= (100 << 20) and Bp % 256 == 0 and Bp >= 512) else 128
    if BM >= Bp:                       # guarantee >= 2 grid steps (both v7x TCs)
        BM = max(8, Bp // 2)
    G = Bp // BM

    # Footprint-driven scoped-VMEM budget, clamped to 3/4 of physical capacity.
    est = 4 * (2 * Bp * Bp             # resident Gram matrix (double-buffered)
               + 30 * BM * Bp          # live (BM,Bp)/(2BM,Bp) temporaries (generous)
               + 16 * Bp)              # id / norm rows & columns
    vmem_limit = int(min(max(est + (8 << 20), 32 << 20), (vmem_cap * 3) // 4))

    kernel = functools.partial(
        _quadruplet_block_kernel, b_real=int(B), block_rows=int(BM),
        margin_triple=float(margin_triple), margin_inter=float(margin_inter),
        squared=bool(squared))

    resident = lambda g: (0, 0)        # grid-invariant inputs: fetched once, reused
    out = pl.pallas_call(
        kernel,
        out_shape=jax.ShapeDtypeStruct((G, 8, _LANE), jnp.float32),
        grid=(G,),
        in_specs=[
            pl.BlockSpec((Bp, 1), resident),      # anchor identities (column)
            pl.BlockSpec((1, Bp), resident),      # all identities (row)
            pl.BlockSpec((Bp, 1), resident),      # squared norms (column)
            pl.BlockSpec((1, Bp), resident),      # squared norms (row)
            pl.BlockSpec((Bp, Bp), resident),     # Gram matrix (resident in VMEM)
        ],
        out_specs=pl.BlockSpec((1, 8, _LANE), lambda g: (g, 0, 0)),
        compiler_params=pltpu.CompilerParams(
            dimension_semantics=("parallel",),
            vmem_limit_bytes=vmem_limit),
    )(ids_col, ids_row, sq_col, sq_row, gram)

    # TODO(synk): forward-only — no custom_vjp/backward kernel; use the pure-JAX
    # reference path if gradients are needed.
    # TODO(synk): for B >~ 2-4k add a column-tiled online-mining variant (and
    # single-buffered resident inputs) so the (Bp,Bp) Gram never exceeds v7x VMEM.
    return jnp.sum(out[:, 0, 0])


# ---- pure-JAX reference (direct translation of the PyTorch forward) --------------
def _reference_loss(embs, idtys, margin_triple=0.2, margin_inter=0.1, squared=False):
    B = embs.shape[0]
    dot = jnp.matmul(embs, embs.T, precision=lax.Precision.HIGHEST)
    sq = jnp.diag(dot)
    d = jnp.maximum(sq[None, :] - 2.0 * dot + sq[:, None], 0.0)
    if not squared:
        m0 = (d == 0.0).astype(jnp.float32)
        d = jnp.sqrt(d + m0 * 1e-16) * (1.0 - m0)
    eq = (idtys[None, :] == idtys[:, None])
    eye = jnp.eye(B, dtype=bool)
    apd = (eq & ~eye).astype(jnp.float32) * d
    hpd = apd.max(axis=1, keepdims=True)
    hp = jnp.argmax(apd, axis=1)
    mask_an = (~eq).astype(jnp.float32)
    mad = d.max(axis=1, keepdims=True)
    andist = d + mad * (1.0 - mask_an)
    hnd = andist.min(axis=1, keepdims=True)
    hn = jnp.argmin(andist, axis=1)
    tl = jnp.maximum(hpd - hnd + margin_triple, 0.0)
    qmask = ((~eye)[:, :, None, None] & eq[:, :, None, None]
             & ~eq[None, :, :, None] & ~eq[None, None, :, :]
             & ~eq[:, None, None, :]).astype(jnp.float32)
    ic4 = jnp.maximum(d[:, :, None, None] - d[None, None, :, :] + margin_inter, 0.0) * qmask
    R = ic4[jnp.arange(B), hp[:, None], hn[:, None]]      # (B, B, B)
    M = R.max(axis=1, keepdims=True)                      # (B, 1, B)
    return (tl + M).mean()


if __name__ == "__main__":
    B, D = 8, 32
    key = jax.random.PRNGKey(0)
    embs = jax.random.normal(key, (B, D), dtype=jnp.float32)
    idtys = jnp.array([0, 0, 1, 1, 2, 2, 3, 3], dtype=jnp.int32)

    loss = jax.block_until_ready(batch_hard_quadruplet_loss(embs, idtys))
    ref = jax.block_until_ready(_reference_loss(embs, idtys))
    assert jnp.allclose(loss, ref, rtol=1e-4, atol=1e-4), (loss, ref)
    print("KERNEL_OK")
</pallas_src>

<mosaic_0001>
module attributes {stable_mosaic.version = 11 : i64} {
  func.func @_quadruplet_block_kernel(%arg0: i32, %arg1: memref<128x1xi32, #tpu.memory_space<vmem>>, %arg2: memref<1x128xi32, #tpu.memory_space<vmem>>, %arg3: memref<128x1xf32, #tpu.memory_space<vmem>>, %arg4: memref<1x128xf32, #tpu.memory_space<vmem>>, %arg5: memref<128x128xf32, #tpu.memory_space<vmem>>, %arg6: memref<1x8x128xf32, #tpu.memory_space<vmem>>) attributes {dimension_semantics = [#tpu.dimension_semantics<parallel>], iteration_bounds = array<i64: 2>, scalar_prefetch = 0 : i64, scratch_operands = 0 : i64, tpu.core_type = #tpu.core_type<tc>, window_params = [{pipeline_mode = #tpu.pipeline_mode<synchronous>, transform_indices = @transform_0, window_bounds = array<i64: 128, 1>}, {pipeline_mode = #tpu.pipeline_mode<synchronous>, transform_indices = @transform_1, window_bounds = array<i64: 1, 128>}, {pipeline_mode = #tpu.pipeline_mode<synchronous>, transform_indices = @transform_2, window_bounds = array<i64: 128, 1>}, {pipeline_mode = #tpu.pipeline_mode<synchronous>, transform_indices = @transform_3, window_bounds = array<i64: 1, 128>}, {pipeline_mode = #tpu.pipeline_mode<synchronous>, transform_indices = @transform_4, window_bounds = array<i64: 128, 128>}, {transform_indices = @transform_5, window_bounds = array<i64: 1, 8, 128>}]} {
    %c64_i32 = arith.constant 64 : i32
    %0 = arith.muli %arg0, %c64_i32 : i32
    %1 = tpu.assume_multiple %0, 64 : i32
    %2 = arith.index_cast %1 : i32 to index
    %c0 = arith.constant 0 : index
    %3 = vector.load %arg5[%2, %c0] : memref<128x128xf32, #tpu.memory_space<vmem>>, vector<64x128xf32>
    %4 = arith.index_cast %1 : i32 to index
    %c0_0 = arith.constant 0 : index
    %5 = vector.load %arg3[%4, %c0_0] : memref<128x1xf32, #tpu.memory_space<vmem>>, vector<64x1xf32>
    %6 = arith.index_cast %1 : i32 to index
    %c0_1 = arith.constant 0 : index
    %7 = vector.load %arg1[%6, %c0_1] : memref<128x1xi32, #tpu.memory_space<vmem>>, vector<64x1xi32>
    %c0_2 = arith.constant 0 : index
    %c0_3 = arith.constant 0 : index
    %8 = vector.load %arg4[%c0_2, %c0_3] : memref<1x128xf32, #tpu.memory_space<vmem>>, vector<1x128xf32>
    %c0_4 = arith.constant 0 : index
    %c0_5 = arith.constant 0 : index
    %9 = vector.load %arg2[%c0_4, %c0_5] : memref<1x128xi32, #tpu.memory_space<vmem>>, vector<1x128xi32>
    %10 = tpu.iota {dimensions = array<i32: 0>} : vector<64x128xi32>
    %11 = tpu.iota {dimensions = array<i32: 1>} : vector<64x128xi32>
    %12 = vector.broadcast %1 : i32 to vector<64x128xi32>
    %13 = arith.addi %10, %12 : vector<64x128xi32>
    %14 = arith.cmpi eq, %13, %11 : vector<64x128xi32>
    %c8_i32 = arith.constant 8 : i32
    %15 = vector.broadcast %c8_i32 : i32 to vector<64x128xi32>
    %16 = arith.cmpi slt, %11, %15 : vector<64x128xi32>
    %17 = tpu.iota {dimensions = array<i32: 0>} : vector<64x1xi32>
    %18 = vector.broadcast %1 : i32 to vector<64x1xi32>
    %19 = arith.addi %17, %18 : vector<64x1xi32>
    %c8_i32_6 = arith.constant 8 : i32
    %20 = vector.broadcast %c8_i32_6 : i32 to vector<64x1xi32>
    %21 = arith.cmpi slt, %19, %20 : vector<64x1xi32>
    %22 = arith.extui %21 : vector<64x1xi1> to vector<64x1xi32>
    %23 = arith.sitofp %22 : vector<64x1xi32> to vector<64x1xf32>
    %24 = vector.broadcast %5 : vector<64x1xf32> to vector<64x128xf32>
    %25 = vector.broadcast %8 : vector<1x128xf32> to vector<64x128xf32>
    %26 = arith.addf %24, %25 : vector<64x128xf32>
    %cst = arith.constant 2.000000e+00 : f32
    %27 = vector.broadcast %cst : f32 to vector<64x128xf32>
    %28 = arith.mulf %27, %3 : vector<64x128xf32>
    %29 = arith.subf %26, %28 : vector<64x128xf32>
    %cst_7 = arith.constant 0.000000e+00 : f32
    %30 = vector.broadcast %cst_7 : f32 to vector<64x128xf32>
    %31 = arith.maximumf %29, %30 : vector<64x128xf32>
    %cst_8 = arith.constant 0.000000e+00 : f32
    %32 = vector.broadcast %cst_8 : f32 to vector<64x128xf32>
    %33 = arith.cmpf oeq, %31, %32 : vector<64x128xf32>
    %cst_9 = arith.constant 1.000000e+00 : f32
    %34 = vector.broadcast %cst_9 : f32 to vector<64x128xf32>
    %35 = arith.select %33, %34, %31 : vector<64x128xi1>, vector<64x128xf32>
    %36 = math.sqrt %35 : vector<64x128xf32>
    %cst_10 = arith.constant 0.000000e+00 : f32
    %37 = vector.broadcast %cst_10 : f32 to vector<64x128xf32>
    %38 = arith.select %33, %37, %36 : vector<64x128xi1>, vector<64x128xf32>
    %39 = vector.broadcast %7 : vector<64x1xi32> to vector<64x128xi32>
    %40 = vector.broadcast %9 : vector<1x128xi32> to vector<64x128xi32>
    %41 = arith.cmpi eq, %39, %40 : vector<64x128xi32>
    %cst_11 = arith.constant dense<true> : vector<64x128xi1>
    %42 = arith.xori %14, %cst_11 : vector<64x128xi1>
    %43 = arith.andi %41, %42 : vector<64x128xi1>
    %44 = arith.andi %43, %16 : vector<64x128xi1>
    %cst_12 = arith.constant 0.000000e+00 : f32
    %45 = vector.broadcast %cst_12 : f32 to vector<64x128xf32>
    %46 = arith.select %44, %38, %45 : vector<64x128xi1>, vector<64x128xf32>
    %cst_13 = arith.constant dense<0xFF800000> : vector<64xf32>
    %47 = vector.multi_reduction <maximumf>, %46, %cst_13 [1] : vector<64x128xf32> to vector<64xf32>
    %48 = vector.shape_cast %47 : vector<64xf32> to vector<64x1xf32>
    %49 = vector.broadcast %48 : vector<64x1xf32> to vector<64x128xf32>
    %50 = arith.cmpf oeq, %46, %49 : vector<64x128xf32>
    %c128_i32 = arith.constant 128 : i32
    %51 = vector.broadcast %c128_i32 : i32 to vector<64x128xi32>
    %52 = arith.select %50, %11, %51 : vector<64x128xi1>, vector<64x128xi32>
    %cst_14 = arith.constant dense<2147483647> : vector<64xi32>
    %53 = vector.multi_reduction <minsi>, %52, %cst_14 [1] : vector<64x128xi32> to vector<64xi32>
    %54 = vector.shape_cast %53 : vector<64xi32> to vector<64x1xi32>
    %55 = vector.broadcast %54 : vector<64x1xi32> to vector<64x128xi32>
    %56 = arith.cmpi eq, %11, %55 : vector<64x128xi32>
    %cst_15 = arith.constant 0.000000e+00 : f32
    %57 = vector.broadcast %cst_15 : f32 to vector<64x128xf32>
    %58 = arith.select %16, %38, %57 : vector<64x128xi1>, vector<64x128xf32>
    %cst_16 = arith.constant dense<0xFF800000> : vector<64xf32>
    %59 = vector.multi_reduction <maximumf>, %58, %cst_16 [1] : vector<64x128xf32> to vector<64xf32>
    %60 = vector.shape_cast %59 : vector<64xf32> to vector<64x1xf32>
    %cst_17 = arith.constant 0.000000e+00 : f32
    %61 = vector.shape_cast %60 : vector<64x1xf32> to vector<64x1xf32>
    %62 = vector.broadcast %61 : vector<64x1xf32> to vector<64x128xf32>
    %63 = vector.broadcast %cst_17 : f32 to vector<64x128xf32>
    %64 = arith.select %41, %62, %63 : vector<64x128xi1>, vector<64x128xf32>
    %65 = arith.addf %38, %64 : vector<64x128xf32>
    %cst_18 = arith.constant 1.000000e+30 : f32
    %66 = vector.broadcast %cst_18 : f32 to vector<64x128xf32>
    %67 = arith.select %16, %65, %66 : vector<64x128xi1>, vector<64x128xf32>
    %cst_19 = arith.constant dense<0x7F800000> : vector<64xf32>
    %68 = vector.multi_reduction <minimumf>, %67, %cst_19 [1] : vector<64x128xf32> to vector<64xf32>
    %69 = vector.shape_cast %68 : vector<64xf32> to vector<64x1xf32>
    %70 = vector.broadcast %69 : vector<64x1xf32> to vector<64x128xf32>
    %71 = arith.cmpf oeq, %67, %70 : vector<64x128xf32>
    %c128_i32_20 = arith.constant 128 : i32
    %72 = vector.broadcast %c128_i32_20 : i32 to vector<64x128xi32>
    %73 = arith.select %71, %11, %72 : vector<64x128xi1>, vector<64x128xi32>
    %cst_21 = arith.constant dense<2147483647> : vector<64xi32>
    %74 = vector.multi_reduction <minsi>, %73, %cst_21 [1] : vector<64x128xi32> to vector<64xi32>
    %75 = vector.shape_cast %74 : vector<64xi32> to vector<64x1xi32>
    %76 = vector.broadcast %75 : vector<64x1xi32> to vector<64x128xi32>
    %77 = arith.cmpi eq, %11, %76 : vector<64x128xi32>
    %78 = arith.subf %48, %69 : vector<64x1xf32>
    %cst_22 = arith.constant 2.000000e-01 : f32
    %79 = vector.broadcast %cst_22 : f32 to vector<64x1xf32>
    %80 = arith.addf %78, %79 : vector<64x1xf32>
    %cst_23 = arith.constant 0.000000e+00 : f32
    %81 = vector.broadcast %cst_23 : f32 to vector<64x1xf32>
    %82 = arith.maximumf %80, %81 : vector<64x1xf32>
    %83 = arith.extui %56 : vector<64x128xi1> to vector<64x128xi32>
    %84 = arith.sitofp %83 : vector<64x128xi32> to vector<64x128xf32>
    %85 = arith.extui %77 : vector<64x128xi1> to vector<64x128xi32>
    %86 = arith.sitofp %85 : vector<64x128xi32> to vector<64x128xf32>
    %87 = tpu.concatenate %84, %86 in 0 : vector<64x128xf32>, vector<64x128xf32> -> vector<128x128xf32>
    %c0_24 = arith.constant 0 : index
    %c0_25 = arith.constant 0 : index
    %88 = vector.load %arg5[%c0_24, %c0_25] : memref<128x128xf32, #tpu.memory_space<vmem>>, vector<128x128xf32>
    %cst_26 = arith.constant dense<0.000000e+00> : vector<128x128xf32>
    %89 = tpu.matmul %87, %88, %cst_26 {dimension_numbers = #tpu.dot_dimension_numbers<[1], [0], [0], [1], [0, 0, 1, 1], [], []>, precision = #tpu.contract_precision<fp32>} : vector<128x128xf32>, vector<128x128xf32>, vector<128x128xf32> -> vector<128x128xf32>
    %cst_27 = arith.constant 0.000000e+00 : f32
    %90 = vector.shape_cast %8 : vector<1x128xf32> to vector<1x128xf32>
    %91 = vector.broadcast %90 : vector<1x128xf32> to vector<64x128xf32>
    %92 = vector.broadcast %cst_27 : f32 to vector<64x128xf32>
    %93 = arith.select %56, %91, %92 : vector<64x128xi1>, vector<64x128xf32>
    %cst_28 = arith.constant dense<0.000000e+00> : vector<64xf32>
    %94 = vector.multi_reduction <add>, %93, %cst_28 [1] : vector<64x128xf32> to vector<64xf32>
    %95 = vector.shape_cast %94 : vector<64xf32> to vector<64x1xf32>
    %cst_29 = arith.constant 0.000000e+00 : f32
    %96 = vector.shape_cast %8 : vector<1x128xf32> to vector<1x128xf32>
    %97 = vector.broadcast %96 : vector<1x128xf32> to vector<64x128xf32>
    %98 = vector.broadcast %cst_29 : f32 to vector<64x128xf32>
    %99 = arith.select %77, %97, %98 : vector<64x128xi1>, vector<64x128xf32>
    %cst_30 = arith.constant dense<0.000000e+00> : vector<64xf32>
    %100 = vector.multi_reduction <add>, %99, %cst_30 [1] : vector<64x128xf32> to vector<64xf32>
    %101 = vector.shape_cast %100 : vector<64xf32> to vector<64x1xf32>
    %c0_i32 = arith.constant 0 : i32
    %102 = vector.shape_cast %9 : vector<1x128xi32> to vector<1x128xi32>
    %103 = vector.broadcast %102 : vector<1x128xi32> to vector<64x128xi32>
    %104 = vector.broadcast %c0_i32 : i32 to vector<64x128xi32>
    %105 = arith.select %56, %103, %104 : vector<64x128xi1>, vector<64x128xi32>
    %cst_31 = arith.constant dense<0> : vector<64xi32>
    %106 = vector.multi_reduction <add>, %105, %cst_31 [1] : vector<64x128xi32> to vector<64xi32>
    %107 = vector.shape_cast %106 : vector<64xi32> to vector<64x1xi32>
    %c0_i32_32 = arith.constant 0 : i32
    %108 = vector.shape_cast %9 : vector<1x128xi32> to vector<1x128xi32>
    %109 = vector.broadcast %108 : vector<1x128xi32> to vector<64x128xi32>
    %110 = vector.broadcast %c0_i32_32 : i32 to vector<64x128xi32>
    %111 = arith.select %77, %109, %110 : vector<64x128xi1>, vector<64x128xi32>
    %cst_33 = arith.constant dense<0> : vector<64xi32>
    %112 = vector.multi_reduction <add>, %111, %cst_33 [1] : vector<64x128xi32> to vector<64xi32>
    %113 = vector.shape_cast %112 : vector<64xi32> to vector<64x1xi32>
    %114 = vector.extract_strided_slice %89 {offsets = [0, 0], sizes = [64, 128], strides = [1, 1]} : vector<128x128xf32> to vector<64x128xf32>
    %115 = vector.broadcast %95 : vector<64x1xf32> to vector<64x128xf32>
    %116 = vector.broadcast %8 : vector<1x128xf32> to vector<64x128xf32>
    %117 = arith.addf %115, %116 : vector<64x128xf32>
    %cst_34 = arith.constant 2.000000e+00 : f32
    %118 = vector.broadcast %cst_34 : f32 to vector<64x128xf32>
    %119 = arith.mulf %118, %114 : vector<64x128xf32>
    %120 = arith.subf %117, %119 : vector<64x128xf32>
    %cst_35 = arith.constant 0.000000e+00 : f32
    %121 = vector.broadcast %cst_35 : f32 to vector<64x128xf32>
    %122 = arith.maximumf %120, %121 : vector<64x128xf32>
    %cst_36 = arith.constant 0.000000e+00 : f32
    %123 = vector.broadcast %cst_36 : f32 to vector<64x128xf32>
    %124 = arith.cmpf oeq, %122, %123 : vector<64x128xf32>
    %cst_37 = arith.constant 1.000000e+00 : f32
    %125 = vector.broadcast %cst_37 : f32 to vector<64x128xf32>
    %126 = arith.select %124, %125, %122 : vector<64x128xi1>, vector<64x128xf32>
    %127 = math.sqrt %126 : vector<64x128xf32>
    %cst_38 = arith.constant 0.000000e+00 : f32
    %128 = vector.broadcast %cst_38 : f32 to vector<64x128xf32>
    %129 = arith.select %124, %128, %127 : vector<64x128xi1>, vector<64x128xf32>
    %130 = vector.extract_strided_slice %89 {offsets = [64, 0], sizes = [64, 128], strides = [1, 1]} : vector<128x128xf32> to vector<64x128xf32>
    %131 = vector.broadcast %101 : vector<64x1xf32> to vector<64x128xf32>
    %132 = vector.broadcast %8 : vector<1x128xf32> to vector<64x128xf32>
    %133 = arith.addf %131, %132 : vector<64x128xf32>
    %cst_39 = arith.constant 2.000000e+00 : f32
    %134 = vector.broadcast %cst_39 : f32 to vector<64x128xf32>
    %135 = arith.mulf %134, %130 : vector<64x128xf32>
    %136 = arith.subf %133, %135 : vector<64x128xf32>
    %cst_40 = arith.constant 0.000000e+00 : f32
    %137 = vector.broadcast %cst_40 : f32 to vector<64x128xf32>
    %138 = arith.maximumf %136, %137 : vector<64x128xf32>
    %cst_41 = arith.constant 0.000000e+00 : f32
    %139 = vector.broadcast %cst_41 : f32 to vector<64x128xf32>
    %140 = arith.cmpf oeq, %138, %139 : vector<64x128xf32>
    %cst_42 = arith.constant 1.000000e+00 : f32
    %141 = vector.broadcast %cst_42 : f32 to vector<64x128xf32>
    %142 = arith.select %140, %141, %138 : vector<64x128xi1>, vector<64x128xf32>
    %143 = math.sqrt %142 : vector<64x128xf32>
    %cst_43 = arith.constant 0.000000e+00 : f32
    %144 = vector.broadcast %cst_43 : f32 to vector<64x128xf32>
    %145 = arith.select %140, %144, %143 : vector<64x128xi1>, vector<64x128xf32>
    %146 = vector.broadcast %107 : vector<64x1xi32> to vector<64x128xi32>
    %147 = vector.broadcast %9 : vector<1x128xi32> to vector<64x128xi32>
    %148 = arith.cmpi eq, %146, %147 : vector<64x128xi32>
    %149 = vector.broadcast %113 : vector<64x1xi32> to vector<64x128xi32>
    %150 = vector.broadcast %9 : vector<1x128xi32> to vector<64x128xi32>
    %151 = arith.cmpi eq, %149, %150 : vector<64x128xi32>
    %152 = arith.cmpi eq, %107, %113 : vector<64x1xi32>
    %cst_44 = arith.constant dense<true> : vector<64x128xi1>
    %153 = arith.xori %56, %cst_44 : vector<64x128xi1>
    %154 = arith.andi %153, %148 : vector<64x128xi1>
    %155 = arith.andi %154, %16 : vector<64x128xi1>
    %cst_45 = arith.constant 0.000000e+00 : f32
    %156 = vector.broadcast %cst_45 : f32 to vector<64x128xf32>
    %157 = arith.select %155, %129, %156 : vector<64x128xi1>, vector<64x128xf32>
    %cst_46 = arith.constant dense<0xFF800000> : vector<64xf32>
    %158 = vector.multi_reduction <maximumf>, %157, %cst_46 [1] : vector<64x128xf32> to vector<64xf32>
    %159 = vector.shape_cast %158 : vector<64xf32> to vector<64x1xf32>
    %cst_47 = arith.constant 1.000000e+00 : f32
    %cst_48 = arith.constant 0.000000e+00 : f32
    %160 = vector.broadcast %cst_47 : f32 to vector<64x128xf32>
    %161 = vector.broadcast %cst_48 : f32 to vector<64x128xf32>
    %162 = arith.select %155, %160, %161 : vector<64x128xi1>, vector<64x128xf32>
    %cst_49 = arith.constant dense<0xFF800000> : vector<64xf32>
    %163 = vector.multi_reduction <maximumf>, %162, %cst_49 [1] : vector<64x128xf32> to vector<64xf32>
    %164 = vector.shape_cast %163 : vector<64xf32> to vector<64x1xf32>
    %cst_50 = arith.constant 0.000000e+00 : f32
    %165 = vector.broadcast %cst_50 : f32 to vector<64x1xf32>
    %166 = arith.select %152, %165, %164 : vector<64x1xi1>, vector<64x1xf32>
    %cst_51 = arith.constant dense<true> : vector<64x128xi1>
    %167 = arith.xori %151, %cst_51 : vector<64x128xi1>
    %cst_52 = arith.constant dense<true> : vector<64x128xi1>
    %168 = arith.xori %148, %cst_52 : vector<64x128xi1>
    %169 = arith.andi %167, %168 : vector<64x128xi1>
    %170 = arith.andi %169, %16 : vector<64x128xi1>
    %cst_53 = arith.constant 1.000000e-01 : f32
    %171 = vector.broadcast %cst_53 : f32 to vector<64x1xf32>
    %172 = arith.addf %159, %171 : vector<64x1xf32>
    %173 = vector.broadcast %172 : vector<64x1xf32> to vector<64x128xf32>
    %174 = arith.subf %173, %145 : vector<64x128xf32>
    %cst_54 = arith.constant 0.000000e+00 : f32
    %175 = vector.broadcast %cst_54 : f32 to vector<64x128xf32>
    %176 = arith.maximumf %174, %175 : vector<64x128xf32>
    %177 = vector.broadcast %166 : vector<64x1xf32> to vector<64x128xf32>
    %178 = arith.mulf %176, %177 : vector<64x128xf32>
    %cst_55 = arith.constant 0.000000e+00 : f32
    %179 = vector.broadcast %cst_55 : f32 to vector<64x128xf32>
    %180 = arith.select %170, %178, %179 : vector<64x128xi1>, vector<64x128xf32>
    %181 = arith.mulf %82, %23 : vector<64x1xf32>
    %182 = vector.shape_cast %181 : vector<64x1xf32> to vector<1x64x1xf32>
    %cst_56 = arith.constant dense<0.000000e+00> : vector<1xf32>
    %183 = vector.multi_reduction <add>, %182, %cst_56 [1, 2] : vector<1x64x1xf32> to vector<1xf32>
    %184 = vector.shape_cast %183 : vector<1xf32> to vector<1x1x1xf32>
    %185 = vector.extract %184[0, 0, 0] : f32 from vector<1x1x1xf32>
    %cst_57 = arith.constant 1.250000e-01 : f32
    %186 = arith.mulf %185, %cst_57 : f32
    %187 = vector.broadcast %23 : vector<64x1xf32> to vector<64x128xf32>
    %188 = arith.mulf %180, %187 : vector<64x128xf32>
    %189 = vector.shape_cast %188 : vector<64x128xf32> to vector<1x64x128xf32>
    %cst_58 = arith.constant dense<0.000000e+00> : vector<1xf32>
    %190 = vector.multi_reduction <add>, %189, %cst_58 [1, 2] : vector<1x64x128xf32> to vector<1xf32>
    %191 = vector.shape_cast %190 : vector<1xf32> to vector<1x1x1xf32>
    %192 = vector.extract %191[0, 0, 0] : f32 from vector<1x1x1xf32>
    %cst_59 = arith.constant 1.562500e-02 : f32
    %193 = arith.mulf %192, %cst_59 : f32
    %194 = arith.addf %186, %193 : f32
    %cst_60 = arith.constant 0.000000e+00 : f32
    %195 = vector.broadcast %cst_60 : f32 to vector<1x8x128xf32>
    %196 = vector.broadcast %194 : f32 to vector<1x8x128xf32>
    %197 = arith.addf %195, %196 : vector<1x8x128xf32>
    %c0_61 = arith.constant 0 : index
    %c0_62 = arith.constant 0 : index
    %c0_63 = arith.constant 0 : index
    %198 = vector.load %arg6[%c0_61, %c0_62, %c0_63] : memref<1x8x128xf32, #tpu.memory_space<vmem>>, vector<1x8x128xf32>
    tpu.vector_store %arg6[%c0_61, %c0_62, %c0_63], %197 {strides = array<i32>} : memref<1x8x128xf32, #tpu.memory_space<vmem>>, vector<1x8x128xf32>,
    return
  }
  func.func @transform_0(%arg0: i32) -> (i32, i32) {
    %c0_i32 = arith.constant 0 : i32
    %c0_i32_0 = arith.constant 0 : i32
    %c0_i32_1 = arith.constant 0 : i32
    return %c0_i32, %c0_i32_0 : i32, i32
  }
  func.func @transform_1(%arg0: i32) -> (i32, i32) {
    %c0_i32 = arith.constant 0 : i32
    %c0_i32_0 = arith.constant 0 : i32
    %c0_i32_1 = arith.constant 0 : i32
    return %c0_i32, %c0_i32_0 : i32, i32
  }
  func.func @transform_2(%arg0: i32) -> (i32, i32) {
    %c0_i32 = arith.constant 0 : i32
    %c0_i32_0 = arith.constant 0 : i32
    %c0_i32_1 = arith.constant 0 : i32
    return %c0_i32, %c0_i32_0 : i32, i32
  }
  func.func @transform_3(%arg0: i32) -> (i32, i32) {
    %c0_i32 = arith.constant 0 : i32
    %c0_i32_0 = arith.constant 0 : i32
    %c0_i32_1 = arith.constant 0 : i32
    return %c0_i32, %c0_i32_0 : i32, i32
  }
  func.func @transform_4(%arg0: i32) -> (i32, i32) {
    %c0_i32 = arith.constant 0 : i32
    %c0_i32_0 = arith.constant 0 : i32
    %c0_i32_1 = arith.constant 0 : i32
    return %c0_i32, %c0_i32_0 : i32, i32
  }
  func.func @transform_5(%arg0: i32) -> (i32, i32, i32) {
    %c0_i32 = arith.constant 0 : i32
    %c0_i32_0 = arith.constant 0 : i32
    %c0_i32_1 = arith.constant 0 : i32
    return %arg0, %c0_i32, %c0_i32_0 : i32, i32, i32
  }
}

</mosaic_0001>

<bundles_post_ra>
// kernel: tpu_custom_call.1
= control target key start
LH: loop header
LB: loop body
LE: loop exit
PB: predicated region body
PF: predicated region fallthrough
CT: control target
= control target key end

     0   :  { %10 = vsyncpa [#allocation3], 0  ;;  %s6738_s0 = inlined_call_operand.vmem [shape: s32[128,1], index: 0, kind: input, shape index: {}]   ;;  %s6739_s1 = inlined_call_operand.vmem [shape: s32[1,128], index: 1, kind: input, shape index: {}]   ;;  %s6740_s2 = inlined_call_operand.vmem [shape: f32[128,1], index: 2, kind: input, shape index: {}]   ;;  %s6741_s3 = inlined_call_operand.vmem [shape: f32[1,128], index: 3, kind: input, shape index: {}]   ;;  %s6742_s4 = inlined_call_operand.vmem [shape: f32[128,128], index: 4, kind: input, shape index: {}]   ;;  %s6743_s5 = inlined_call_operand.hbm [shape: f32[2,8,128], index: 5, kind: output, shape index: {}]  }
   0x1   :  { %12 = vsyncpa [#allocation3 + $0x1], 0  ;;  %s4091_s18 = smov 0   ;;  %s4093_s19 = smov 0  }
   0x2   :  { %s4095_s20 = smov 0   ;;  %s4097_s21 = smov 0  }
   0x3 LB: > { %s4112_s22 = sadd.s32 4294967295, %s4054_s21   ;;  %s3008_s23 = sadd.s32 4294967294, %s4054_s21   ;;  %s4054_s21 = sphi %s4097_s21, %s7129_s21   ;;  %s4050_s20 = sphi %s4095_s20, %s7128_s20   ;;  %s4046_s19 = sphi %s4093_s19, %s7127_s19   ;;  %s4042_s18 = sphi %s4091_s18, %s7126_s18  }
   0x4   : > { %s4116_s24 = sadd.s32 1, %s4054_s21   ;;  %s130_s25 = sadd.s32 1, %s4050_s20 }
   0x5   : > { %s127_s26 = ssub.s32 %s4054_s21, %s4116_s24  ;;  %p140_p0 = scmp.ne.s32.totalorder %s4050_s20, %s4046_s19 }
   0x6   : > { %p128_p1 = scmp.eq.s32.totalorder %s127_s26, 0  ;;  %p141_p2 = scmp.eq.s32.totalorder %s4112_s22, 1 }
   0x7   : > { %p146_p3 = scmp.ne.s32.totalorder %s4046_s19, %s4042_s18  ;;  %p147_p4 = scmp.eq.s32.totalorder %s3008_s23, 1 }
   0x8   : > { %s4127_s27 = scalar_select %p128_p1, %s4050_s20, %s130_s25  }
   0x9   : > { %p4129_p5 = por %p141_p2, %p140_p0  ;;  %p4133_p6 = por %p147_p4, %p146_p3 }
   0xa   : > { %p3010_p7 = scmp.ge.s32.totalorder %s4054_s21, 1  ;;  %p180_p8 = scmp.lt.s32.totalorder %s4054_s21, 3 }
   0xc   : > { %p181_p9 = pnand %p3010_p7, %p180_p8 }
   0xe   : > { %184 = sbr.rel (%p181_p9) target bundleno = 1482 (0x5ca), region = 40 }
  0x15   : > { %s4140_s30 = sshll.u32 %s4112_s22, 6  ;;  %v4056_v0 = vmov 0   ;;  %v3021_v19 = vld [vmem:[%s6741_s3] ss:$0 sm:$0xff]  ;;  %v233_v43 = vlaneseq  ;;  %s3088_s16 = sshll.u32 %s4112_s22, 7 }
  0x16   : > { %3939 = vset.pattern.permute.xlu1 %v4056_v0  ;;  %3938 = vset.pattern.permute.xlu0 %v4056_v0  ;;  %s213_s8 = scalar_lea.vmem %s6740_s2, %s4140_s30  ;;  %s222_s11 = scalar_lea.vmem %s6738_s0, %s4140_s30 }
  0x17   : > { %v216_v1 = vld [vmem:[%s213_s8 + $0x10] sm:$0xff]  ;;  %v214_v2 = vld [vmem:[%s213_s8] sm:$0xff]  ;;  %v217_v3 = vld [vmem:[%s213_s8 + $0x18] sm:$0xff]  ;;  %s204_s14 = scalar_lea.vmem %s6742_s4, %s4140_s30  ;;  %v4178_v57 = vshrl.u32 %v233_v43, 7  ;;  %s6696_s7 = scalar_lea.hbm %s6743_s5, %s3088_s16 }
  0x18   : > { %298 = vperm.xlu1 %3939, %v216_v1   ;;  %288 = vperm.xlu0 %3938, %v214_v2   ;;  %v215_v4 = vld [vmem:[%s213_s8 + $0x8] sm:$0xff]  ;;  %v218_v6 = vld [vmem:[%s213_s8 + $0x20] sm:$0xff]  ;;  %v221_v7 = vld [vmem:[%s213_s8 + $0x38] sm:$0xff]  ;;  %s4060_s22 = smov [#allocation2]  }
  0x19   : > { %v219_v5 = vld [vmem:[%s213_s8 + $0x28] sm:$0xff]  ;;  %v220_v8 = vld [vmem:[%s213_s8 + $0x30] sm:$0xff]  ;;  %v223_v10 = vld [vmem:[%s222_s11] sm:$0xff]  ;;  %s3996_s10 = sshll.u32 %s4060_s22, 4  ;;  %s3997_s10 = int_to_ptr.vmem [resolvable:$false] %s3996_s10 }
  0x1a   : > { %v224_v9 = vld [vmem:[%s222_s11 + $0x8] sm:$0xff]  ;;  %v226_v11 = vld [vmem:[%s222_s11 + $0x18] sm:$0xff]  ;;  %v225_v12 = vld [vmem:[%s222_s11 + $0x10] sm:$0xff] }
  0x1b   : > { %v228_v13 = vld [vmem:[%s222_s11 + $0x28] sm:$0xff]  ;;  %v227_v14 = vld [vmem:[%s222_s11 + $0x20] sm:$0xff]  ;;  %v230_v15 = vld [vmem:[%s222_s11 + $0x38] sm:$0xff] }
  0x1c   : > { %303 = vperm.xlu1 %3939, %v217_v3   ;;  %293 = vperm.xlu0 %3938, %v215_v4   ;;  %v229_v16 = vld [vmem:[%s222_s11 + $0x30] sm:$0xff]  ;;  %v205_v18 = vld [vmem:[%s204_s14] sm:$0xff]  ;;  %v208_v24 = vld [vmem:[%s204_s14 + $0x18] sm:$0xff]  ;;  %v4193_v3 = vstv %s4140_s30  ;;  %v235_v4 = vadd.s32 8, %v4178_v57  ;;  %s200_s11 = sand.u32 1, %s4046_s19  }
  0x1d   : > { %v207_v17 = vld [vmem:[%s204_s14 + $0x10] sm:$0xff]  ;;  %v340_v21 = vmul.f32 2.0, %v205_v18  ;;  %v206_v25 = vld [vmem:[%s204_s14 + $0x8] sm:$0xff]  ;;  %v343_v30 = vmul.f32 2.0, %v208_v24  ;;  %v209_v33 = vld [vmem:[%s204_s14 + $0x20] sm:$0xff]  ;;  %v239_v24 = vadd.s32 40, %v4178_v57 }
  0x1e   : > { %v342_v20 = vmul.f32 2.0, %v207_v17  ;;  %v341_v31 = vmul.f32 2.0, %v206_v25  ;;  %v210_v32 = vld [vmem:[%s204_s14 + $0x28] sm:$0xff]  ;;  %v344_v41 = vmul.f32 2.0, %v209_v33  ;;  %v212_v42 = vld [vmem:[%s204_s14 + $0x38] sm:$0xff]  ;;  %v211_v46 = vld [vmem:[%s204_s14 + $0x30] sm:$0xff] }
  0x1f   : > { %v345_v40 = vmul.f32 2.0, %v210_v32  ;;  %v347_v54 = vmul.f32 2.0, %v212_v42  ;;  %v346_v56 = vmul.f32 2.0, %v211_v46  ;;  %v4302_v46 = vadd.s32 %v4193_v3, %v239_v24  ;;  %s3011_s12 = sshll.u32 %s200_s11, 3  ;;  %s2942_s8 = scalar_lea.sflag [#allocation3], %s200_s11 }
  0x20   : > { %313 = vperm.xlu1 %3939, %v219_v5   ;;  %308 = vperm.xlu0 %3938, %v218_v6   ;;  %v236_v5 = vadd.s32 16, %v4178_v57  ;;  %v240_v24 = vadd.s32 48, %v4178_v57  ;;  %s202_s23 = scalar_lea.vmem [#allocation2], %s3011_s12  ;;  %s3998_s12 = scalar_lea.vmem %s3997_s10, 256 }
  0x21   : > { %6859 = vst [vmem:[#allocation10_spill] sm:$0xff] %v4302_v46  ;;  %s2955_s25 = sshll.u32 %s202_s23, 4  ;;  %s6698_s25 = int_to_ptr.vmem [resolvable:$true] %s2955_s25 }
  0x22   : > { %s3992_s9 = scalar_lea.vmem %s6698_s25, 128  ;;  %p3999_p13 = scmp.lt.s32.totalorder %s6698_s25, %s3997_s10 }
  0x23   : > { %p3993_p10 = scmp.ne.s32.totalorder %s6698_s25, %s3992_s9  ;;  %p4000_p0 = scmp.lt.s32.totalorder %s3998_s12, %s3992_s9 }
  0x24   : > { %323 = vperm.xlu1 %3939, %v221_v7   ;;  %318 = vperm.xlu0 %3938, %v220_v8   ;;  %v4199_v8 = vand.u32 127, %v233_v43 }
  0x25   : > { %p3994_p11 = pnand %p3993_p10, %p4129_p5  ;;  %p4001_p1 = por %p4000_p0, %p3999_p13 }
  0x26   : > { %vm6812_vm6 = vcmp.lt.s32.totalorder %v4199_v8, 8 }
  0x27   : > { %p3995_p12 = pneg %p3994_p11 }
  0x28   : > { %448 = vperm.xlu1 %3939, %v224_v9   ;;  %445 = vperm.xlu0 %3938, %v223_v10  }
  0x29   : > { %p4002_p2 = pnand %p4001_p1, %p3995_p12 }
  0x2c   : > { %454 = vperm.xlu1 %3939, %v226_v11   ;;  %451 = vperm.xlu0 %3938, %v225_v12   ;;  %v237_v11 = vadd.s32 24, %v4178_v57 }
  0x30   : > { %460 = vperm.xlu1 %3939, %v228_v13   ;;  %457 = vperm.xlu0 %3938, %v227_v14   ;;  %v4219_v13 = vadd.s32 %v4193_v3, %v4178_v57 }
  0x32   : > { %6854 = vst [vmem:[#allocation5_spill] sm:$0xff] %v4219_v13  ;;  %vm253_vm10 = vcmp.eq.s32.totalorder %v4219_v13, %v4199_v8 }
  0x34   : > { %466 = vperm.xlu1 %3939, %v230_v15   ;;  %463 = vperm.xlu0 %3938, %v229_v16   ;;  %v4225_v15 = vadd.s32 %v4193_v3, %v235_v4  ;;  %v4228_v16 = vadd.s32 %v4193_v3, %v236_v5 }
  0x36   : > { %6855 = vst [vmem:[#allocation6_spill] sm:$0xff] %v4225_v15  ;;  %6856 = vst [vmem:[#allocation7_spill] sm:$0xff] %v4228_v16  ;;  %vm254_vm13 = vcmp.eq.s32.totalorder %v4225_v15, %v4199_v8  ;;  %vm255_vm14 = vcmp.eq.s32.totalorder %v4228_v16, %v4199_v8 }
  0x97   : > { %v299_v22 = vpop.permute.xlu1 %298  ;;  %v289_v23 = vpop.permute.xlu0 %288 }
  0x98   : > { %v334_v26 = vadd.f32 %v3021_v19, %v299_v22  ;;  %v332_v27 = vadd.f32 %v3021_v19, %v289_v23 }
  0x9a   : > { %v350_v28 = vsub.f32 %v334_v26, %v342_v20  ;;  %v348_v29 = vsub.f32 %v332_v27, %v340_v21  ;;  %v238_v20 = vadd.s32 32, %v4178_v57 }
  0x9b   : > { %v304_v34 = vpop.permute.xlu1 %303  ;;  %v294_v35 = vpop.permute.xlu0 %293 }
  0x9c   : > { %v4157_v36 = vmax.f32 %v350_v28, 0.0  ;;  %v4159_v37 = vmax.f32 %v348_v29, 0.0  ;;  %v335_v38 = vadd.f32 %v3021_v19, %v304_v34  ;;  %v333_v39 = vadd.f32 %v3021_v19, %v294_v35  ;;  %v4277_v35 = vld [vmem:[%s6739_s1] ss:$0 sm:$0xff] }
  0x9d   : > { %v4265_v32 = vadd.s32 %v4193_v3, %v238_v20 }
  0x9e   : > { %v351_v44 = vsub.f32 %v335_v38, %v343_v30  ;;  %v349_v45 = vsub.f32 %v333_v39, %v341_v31  ;;  %vm364_vm0 = vcmp.eq.f32.partialorder %v4159_v37, 0.0  ;;  %vm366_vm1 = vcmp.eq.f32.partialorder %v4157_v36, 0.0 }
  0x9f   : > { %v314_v47 = vpop.permute.xlu1 %313  ;;  %v309_v48 = vpop.permute.xlu0 %308  ;;  %v4166_v49 = vsel %vm364_vm0, 1.0, %v4159_v37  ;;  %v4171_v50 = vsel %vm366_vm1, 1.0, %v4157_v36  ;;  %6858 = vst [vmem:[#allocation9_spill] sm:$0xff] %v4265_v32 }
  0xa0   : > { %v4173_v51 = vmax.f32 %v349_v45, 0.0  ;;  %v337_v52 = vadd.f32 %v3021_v19, %v314_v47  ;;  %v336_v53 = vadd.f32 %v3021_v19, %v309_v48  ;;  %v4175_v55 = vmax.f32 %v351_v44, 0.0 }
  0xa1   : > { %3940 = vrsqrt.f32 %v4166_v49  ;;  %vm382_vm8 = vcmp.eq.f32.partialorder %v4166_v49, inf  ;;  %vm384_vm9 = vcmp.eq.f32.partialorder %v4166_v49, 0.0  ;;  %v385_v25 = vand.u32 2147483648, %v4166_v49 }
  0xa2   : > { %v353_v58 = vsub.f32 %v337_v52, %v345_v40  ;;  %v352_v59 = vsub.f32 %v336_v53, %v344_v41  ;;  %vm365_vm2 = vcmp.eq.f32.partialorder %v4173_v51, 0.0  ;;  %3942 = vrsqrt.f32 %v4171_v50 }
  0xa3   : > { %v324_v60 = vpop.permute.xlu1 %323  ;;  %v319_v61 = vpop.permute.xlu0 %318  ;;  %v4185_v62 = vsel %vm365_vm2, 1.0, %v4173_v51  ;;  %vm367_vm3 = vcmp.eq.f32.partialorder %v4175_v55, 0.0  ;;  %vm396_vm11 = vcmp.eq.f32.partialorder %v4171_v50, inf  ;;  %v399_v31 = vand.u32 2147483648, %v4171_v50 }
  0xa4   : > { %v4187_v63 = vmax.f32 %v353_v58, 0.0  ;;  %v4189_v0 = vmax.f32 %v352_v59, 0.0  ;;  %v339_v1 = vadd.f32 %v3021_v19, %v324_v60  ;;  %v338_v2 = vadd.f32 %v3021_v19, %v319_v61 }
  0xa5   : > { %3944 = vrsqrt.f32 %v4185_v62  ;;  %v4204_v9 = vsel %vm367_vm3, 1.0, %v4175_v55  ;;  %v4237_v19 = vadd.s32 %v4193_v3, %v237_v11  ;;  %vm389_vm15 = vcmp.eq.f32.partialorder %v4185_v62, inf }
  0xa6   : > { %v355_v6 = vsub.f32 %v339_v1, %v347_v54  ;;  %v354_v7 = vsub.f32 %v338_v2, %v346_v56  ;;  %vm368_vm4 = vcmp.eq.f32.partialorder %v4189_v0, 0.0  ;;  %vm369_vm5 = vcmp.eq.f32.partialorder %v4187_v63, 0.0 }
  0xa7   : > { %v4209_v10 = vsel %vm368_vm4, 1.0, %v4189_v0  ;;  %3946 = vrsqrt.f32 %v4204_v9  ;;  %v4234_v18 = vsel %vm369_vm5, 1.0, %v4187_v63  ;;  %6857 = vst [vmem:[#allocation8_spill] sm:$0xff] %v4237_v19  ;;  %v4279_v38 = vpop.permute.xlu0 %445  ;;  %v392_v37 = vand.u32 2147483648, %v4185_v62  ;;  %v4320_v54 = vpop.permute.xlu1 %448 }
  0xa8   : > { %v4212_v12 = vmax.f32 %v354_v7, 0.0  ;;  %v4221_v14 = vmax.f32 %v355_v6, 0.0  ;;  %3948 = vrsqrt.f32 %v4209_v10  ;;  %v406_v52 = vand.u32 2147483648, %v4204_v9 }
  0xa9   : > { %v413_v56 = vand.u32 2147483648, %v4209_v10 }
  0xaa   : > { %vm370_vm7 = vcmp.eq.f32.partialorder %v4212_v12, 0.0  ;;  %vm6744_vm12 = vcmp.eq.f32.partialorder %v4221_v14, 0.0 }
  0xab   : > { %v3941_v17 = vpop.eup %3940  ;;  %v4245_v23 = vsel %vm370_vm7, 1.0, %v4212_v12  ;;  %v4288_v41 = vsel %vm6744_vm12, 1.0, %v4221_v14  ;;  %v4326_v59 = vpop.permute.xlu0 %451 }
  0xac   : > { %v3943_v21 = vpop.eup %3942  ;;  %v381_v22 = vmul.f32 %v3941_v17, %v4166_v49  ;;  %3950 = vrsqrt.f32 %v4245_v23  ;;  %vm424_vm12 = vcmp.eq.f32.partialorder %v4245_v23, inf  ;;  %v427_v7 = vand.u32 2147483648, %v4245_v23 }
  0xad   : > { %v395_v26 = vmul.f32 %v3943_v21, %v4171_v50  ;;  %3952 = vrsqrt.f32 %v4234_v18  ;;  %v420_v17 = vand.u32 2147483648, %v4234_v18  ;;  %v434_v63 = vand.u32 2147483648, %v4288_v41 }
  0xae   : > { %v383_v27 = vsel %vm382_vm8, %v4166_v49, %v381_v22  ;;  %vm398_vm8 = vcmp.eq.f32.partialorder %v4171_v50, 0.0  ;;  %3954 = vrsqrt.f32 %v4288_v41 }
  0xaf   : > { %v3945_v28 = vpop.eup %3944  ;;  %v386_v29 = vsel %vm384_vm9, %v385_v25, %v383_v27  ;;  %v397_v30 = vsel %vm396_vm11, %v4171_v50, %v395_v26  ;;  %vm256_vm9 = vcmp.eq.s32.totalorder %v4237_v19, %v4199_v8  ;;  %vm6813_vm11 = vmmov 1   ;;  %v4388_v26 = vpop.permute.xlu1 %454 }
  0xb0   : > { %v4269_v33 = vsel %vm364_vm0, 0.0, %v386_v29  ;;  %v388_v34 = vmul.f32 %v3945_v28, %v4185_v62  ;;  %v400_v40 = vsel %vm398_vm8, %v399_v31, %v397_v30  ;;  %vm391_vm0 = vcmp.eq.f32.partialorder %v4185_v62, 0.0  ;;  %v4406_v29 = vpop.permute.xlu0 %457 }
  0xb1   : > { %v664_v39 = vsel %vm6812_vm6, %v4269_v33, 0.0  ;;  %v4294_v43 = vsel %vm366_vm1, 0.0, %v400_v40  ;;  %v3947_v44 = vpop.eup %3946  ;;  %vm403_vm1 = vcmp.eq.f32.partialorder %v4204_v9, inf  ;;  %vm410_vm8 = vcmp.eq.f32.partialorder %v4209_v10, inf }
  0xb2   : > { %672 = vmax.xlane.f32.xlu0 %v664_v39  ;;  %v390_v42 = vsel %vm389_vm15, %v4185_v62, %v388_v34  ;;  %v3949_v47 = vpop.eup %3948  ;;  %vm472_vm15 = vcmp.eq.s32.totalorder %v4279_v38, %v4277_v35  ;;  %v402_v48 = vmul.f32 %v3947_v44, %v4204_v9  ;;  %v666_v50 = vsel %vm6812_vm6, %v4294_v43, 0.0 }
  0xb3   : > { %v393_v45 = vsel %vm391_vm0, %v392_v37, %v390_v42  ;;  %v409_v53 = vmul.f32 %v3949_v47, %v4209_v10  ;;  %vm412_vm0 = vcmp.eq.f32.partialorder %v4209_v10, 0.0  ;;  %v4443_v40 = vadd.s32 %v4193_v3, %v240_v24 }
  0xb4   : > { %v4308_v36 = vsel %vm365_vm2, 0.0, %v393_v45  ;;  %v404_v51 = vsel %vm403_vm1, %v4204_v9, %v402_v48  ;;  %vm405_vm2 = vcmp.eq.f32.partialorder %v4204_v9, 0.0  ;;  %vm426_vm1 = vcmp.eq.f32.partialorder %v4245_v23, 0.0  ;;  %v4465_v48 = vpop.permute.xlu1 %460 }
  0xb5   : > { %v665_v49 = vsel %vm6812_vm6, %v4308_v36, 0.0  ;;  %v407_v60 = vsel %vm405_vm2, %v406_v52, %v404_v51  ;;  %v411_v61 = vsel %vm410_vm8, %v4209_v10, %v409_v53  ;;  %vm4341_vm2 = vmxor %vm253_vm10, %vm6813_vm11  ;;  %6873 = vst [vmem:[#allocation11_spill] sm:$0xff] %v4443_v40  ;;  %v241_v44 = vadd.s32 56, %v4178_v57 }
  0xb6   : > { %674 = vmax.xlane.f32.xlu1 %v665_v49  ;;  %676 = vmax.xlane.f32.xlu0 %v666_v50  ;;  %v3951_v58 = vpop.eup %3950  ;;  %v4333_v1 = vsel %vm367_vm3, 0.0, %v407_v60  ;;  %v414_v2 = vsel %vm412_vm0, %v413_v56, %v411_v61  ;;  %vm4358_vm3 = vmxor %vm254_vm13, %vm6813_vm11  ;;  %vm419_vm13 = vcmp.eq.f32.partialorder %v4234_v18, 0.0  ;;  %vm473_vm0 = vcmp.eq.s32.totalorder %v4320_v54, %v4277_v35 }
  0xb7   : > { %v3953_v62 = vpop.eup %3952  ;;  %v423_v4 = vmul.f32 %v3951_v58, %v4245_v23  ;;  %v667_v55 = vsel %vm6812_vm6, %v4333_v1, 0.0  ;;  %v4350_v6 = vsel %vm368_vm4, 0.0, %v414_v2  ;;  %vm417_vm4 = vcmp.eq.f32.partialorder %v4234_v18, inf  ;;  %vm4372_vm10 = vmxor %vm255_vm14, %vm6813_vm11 }
  0xb8   : > { %v416_v9 = vmul.f32 %v3953_v62, %v4234_v18  ;;  %v668_v11 = vsel %vm6812_vm6, %v4350_v6, 0.0  ;;  %v3955_v25 = vpop.eup %3954  ;;  %vm474_vm14 = vcmp.eq.s32.totalorder %v4326_v59, %v4277_v35  ;;  %vm4400_vm8 = vmxor %vm256_vm9, %vm6813_vm11  ;;  %v4485_v49 = vadd.s32 %v4193_v3, %v241_v44  ;;  %v467_v3 = vpop.permute.xlu1 %466 }
  0xb9   : > { %v425_v0 = vsel %vm424_vm12, %v4245_v23, %v423_v4  ;;  %vm4383_vm12 = vmand %vm472_vm15, %vm4341_vm2  ;;  %v430_v31 = vmul.f32 %v3955_v25, %v4288_v41  ;;  %vm258_vm2 = vcmp.eq.s32.totalorder %v4302_v46, %v4199_v8 }
  0xba   : > { %678 = vmax.xlane.f32.xlu1 %v667_v55  ;;  %680 = vmax.xlane.f32.xlu0 %v668_v11  ;;  %v428_v21 = vsel %vm426_vm1, %v427_v7, %v425_v0  ;;  %v418_v22 = vsel %vm417_vm4, %v4234_v18, %v416_v9  ;;  %vm431_vm1 = vcmp.eq.f32.partialorder %v4288_v41, inf  ;;  %vm433_vm4 = vcmp.eq.f32.partialorder %v4288_v41, 0.0  ;;  %6877 = vst [vmem:[#allocation12_spill] sm:$0xff] %v4485_v49 }
  0xbb   : > { %v4394_v18 = vsel %vm370_vm7, 0.0, %v428_v21  ;;  %v421_v27 = vsel %vm419_vm13, %v420_v17, %v418_v22  ;;  %vm6870_vm7 = vcmp.eq.s32.totalorder %v4265_v32, %v4199_v8  ;;  %v432_v37 = vsel %vm431_vm1, %v4288_v41, %v430_v31  ;;  %vm490_vm13 = vmand %vm474_vm14, %vm4372_vm10 }
  0xbc   : > { %v670_v12 = vsel %vm6812_vm6, %v4394_v18, 0.0  ;;  %v4413_v30 = vsel %vm369_vm5, 0.0, %v421_v27  ;;  %vm4420_vm9 = vmxor %vm6870_vm7, %vm6813_vm11  ;;  %v435_v42 = vsel %vm433_vm4, %v434_v63, %v432_v37  ;;  %vm6745_vm7 = vcmp.eq.s32.totalorder %v4388_v26, %v4277_v35 }
  0xbd   : > { %v669_v39 = vsel %vm6812_vm6, %v4413_v30, 0.0  ;;  %vm496_vm5 = vmand %vm4383_vm12, %vm6812_vm6  ;;  %vm6874_vm1 = vcmp.eq.f32.partialorder %v4221_v14, 0.0  ;;  %v464_v14 = vpop.permute.xlu0 %463  ;;  %vm259_vm4 = vcmp.eq.s32.totalorder %v4443_v40, %v4199_v8 }
  0xbe   : > { %684 = vmax.xlane.f32.xlu1 %v670_v12  ;;  %682 = vmax.xlane.f32.xlu0 %v669_v39  ;;  %vm489_vm12 = vmand %vm473_vm0, %vm4358_vm3  ;;  %v4455_v41 = vsel %vm6874_vm1, 0.0, %v435_v42  ;;  %v4458_v45 = vsel %vm496_vm5, %v4269_v33, 0.0  ;;  %vm476_vm3 = vcmp.eq.s32.totalorder %v4406_v29, %v4277_v35 }
  0xbf   : > { %vm4461_vm10 = vmxor %vm258_vm2, %vm6813_vm11  ;;  %v671_v57 = vsel %vm6812_vm6, %v4455_v41, 0.0 }
  0xc0   : > { %vm498_vm5 = vmand %vm490_vm13, %vm6812_vm6 }
  0xc1   : > { %vm497_vm2 = vmand %vm489_vm12, %vm6812_vm6  ;;  %v4488_v50 = vsel %vm498_vm5, %v4294_v43, 0.0  ;;  %vm478_vm12 = vcmp.eq.s32.totalorder %v464_v14, %v4277_v35 }
  0xc2   : > { %512 = vmax.xlane.f32.xlu1 %v4458_v45  ;;  %686 = vmax.xlane.f32.xlu0 %v671_v57  ;;  %vm491_vm1 = vmand %vm6745_vm7, %vm4400_vm8  ;;  %v4497_v52 = vsel %vm497_vm2, %v4308_v36, 0.0  ;;  %vm477_vm7 = vcmp.eq.s32.totalorder %v4465_v48, %v4277_v35  ;;  %vm260_vm2 = vcmp.eq.s32.totalorder %v4485_v49, %v4199_v8 }
  0xc3   : > { %vm492_vm13 = vmand %vm476_vm3, %vm4420_vm9 }
  0xc4   : > { %vm486_vm8 = vmxor %vm259_vm4, %vm6813_vm11 }
  0xc5   : > { %vm499_vm5 = vmand %vm491_vm1, %vm6812_vm6 }
  0xc6   : > { %516 = vmax.xlane.f32.xlu1 %v4488_v50  ;;  %514 = vmax.xlane.f32.xlu0 %v4497_v52  ;;  %vm500_vm9 = vmand %vm492_vm13, %vm6812_vm6  ;;  %v4516_v51 = vsel %vm499_vm5, %v4333_v1, 0.0  ;;  %vm479_vm13 = vcmp.eq.s32.totalorder %v467_v3, %v4277_v35 }
  0xc7   : > { %v4511_v53 = vsel %vm500_vm9, %v4350_v6, 0.0  ;;  %vm494_vm4 = vmand %vm478_vm12, %vm486_vm8 }
  0xc8   : > { %vm493_vm1 = vmand %vm477_vm7, %vm4461_vm10 }
  0xc9   : > { %vm487_vm9 = vmxor %vm260_vm2, %vm6813_vm11 }
  0xca   : > { %520 = vmax.xlane.f32.xlu1 %v4511_v53  ;;  %518 = vmax.xlane.f32.xlu0 %v4516_v51  ;;  %vm502_vm8 = vmand %vm494_vm4, %vm6812_vm6 }
  0xcb   : > { %vm501_vm5 = vmand %vm493_vm1, %vm6812_vm6  ;;  %v4532_v56 = vsel %vm502_vm8, %v4394_v18, 0.0 }
  0xcc   : > { %v4535_v58 = vsel %vm501_vm5, %v4413_v30, 0.0  ;;  %vm495_vm10 = vmand %vm479_vm13, %vm487_vm9 }
  0xcd   : > { %vm503_vm2 = vmand %vm495_vm10, %vm6812_vm6 }
  0xce   : > { %524 = vmax.xlane.f32.xlu1 %v4532_v56  ;;  %522 = vmax.xlane.f32.xlu0 %v4535_v58  ;;  %v4544_v60 = vsel %vm503_vm2, %v4455_v41, 0.0 }
  0xd2   : > { %526 = vmax.xlane.f32.xlu0 %v4544_v60 }
 0x13f   : > { %v673_v61 = vpop.xlane.xlu0 %672 }
 0x140   : > { %v688_v62 = vsel %vm472_vm15, %v673_v61, 0.0  ;;  %vm6878_vm15 = vcmp.eq.s32.totalorder %v4388_v26, %v4277_v35 }
 0x141   : > { %v696_v2 = vadd.f32 %v688_v62, %v4269_v33 }
 0x143   : > { %v675_v4 = vpop.xlane.xlu1 %674  ;;  %v677_v5 = vpop.xlane.xlu0 %676  ;;  %v4553_v55 = vsel %vm6812_vm6, %v696_v2, 1e+30 }
 0x144   : > { %v689_v7 = vsel %vm473_vm0, %v675_v4, 0.0  ;;  %v690_v9 = vsel %vm474_vm14, %v677_v5, 0.0  ;;  %712 = vmin.xlane.f32.xlu1 %v4553_v55 }
 0x145   : > { %v697_v38 = vadd.f32 %v689_v7, %v4308_v36  ;;  %v698_v33 = vadd.f32 %v690_v9, %v4294_v43 }
 0x147   : > { %v679_v10 = vpop.xlane.xlu1 %678  ;;  %v4566_v11 = vsel %vm6812_vm6, %v697_v38, 1e+30  ;;  %v4570_v0 = vsel %vm6812_vm6, %v698_v33, 1e+30  ;;  %v681_v59 = vpop.xlane.xlu0 %680 }
 0x148   : > { %v691_v54 = vsel %vm6878_vm15, %v679_v10, 0.0  ;;  %714 = vmin.xlane.f32.xlu0 %v4566_v11  ;;  %716 = vmin.xlane.f32.xlu1 %v4570_v0  ;;  %v692_v43 = vsel %vm476_vm3, %v681_v59, 0.0  ;;  %v4708_v59 = vld [vmem:[%s6742_s4] sm:$0xff] }
 0x149   : > { %v699_v36 = vadd.f32 %v691_v54, %v4333_v1  ;;  %v700_v17 = vadd.f32 %v692_v43, %v4350_v6  ;;  %v6747_v43 = vand.u32 4294901760, %v4708_v59 }
 0x14b   : > { %v685_v20 = vpop.xlane.xlu1 %684  ;;  %v4584_v21 = vsel %vm6812_vm6, %v699_v36, 1e+30  ;;  %v683_v23 = vpop.xlane.xlu0 %682  ;;  %v4591_v24 = vsel %vm6812_vm6, %v700_v17, 1e+30 }
 0x14c   : > { %v694_v22 = vsel %vm478_vm12, %v685_v20, 0.0  ;;  %718 = vmin.xlane.f32.xlu0 %v4584_v21  ;;  %v693_v1 = vsel %vm477_vm7, %v683_v23, 0.0  ;;  %720 = vmin.xlane.f32.xlu1 %v4591_v24 }
 0x14d   : > { %v702_v6 = vadd.f32 %v694_v22, %v4394_v18  ;;  %v701_v25 = vadd.f32 %v693_v1, %v4413_v30 }
 0x14f   : > { %v4599_v26 = vpop.xlane.xlu1 %512  ;;  %v4603_v27 = vsel %vm6812_vm6, %v702_v6, 1e+30  ;;  %v687_v28 = vpop.xlane.xlu0 %686  ;;  %v4609_v29 = vsel %vm6812_vm6, %v701_v25, 1e+30 }
 0x150   : > { %6879 = vst [vmem:[#allocation13_spill] sm:$0xff] %v4599_v26  ;;  %vm528_vm14 = vcmp.eq.f32.partialorder %v4458_v45, %v4599_v26  ;;  %v695_v12 = vsel %vm479_vm13, %v687_v28, 0.0  ;;  %722 = vmin.xlane.f32.xlu0 %v4609_v29  ;;  %724 = vmin.xlane.f32.xlu1 %v4603_v27 }
 0x151   : > { %v4616_v18 = vsel %vm528_vm14, %v4199_v8, 128  ;;  %v703_v30 = vadd.f32 %v695_v12, %v4455_v41 }
 0x152   : > { %v545_v31 = vshra.s32 %v4616_v18, 16 }
 0x153   : > { %v4620_v34 = vpop.xlane.xlu1 %516  ;;  %v4622_v39 = vpop.xlane.xlu0 %514  ;;  %v4628_v63 = vsel %vm6812_vm6, %v703_v30, 1e+30 }
 0x154   : > { %6880 = vst [vmem:[#allocation14_spill] sm:$0xff] %v4620_v34  ;;  %6881 = vst [vmem:[#allocation15_spill] sm:$0xff] %v4622_v39  ;;  %vm530_vm0 = vcmp.eq.f32.partialorder %v4488_v50, %v4620_v34  ;;  %v4630_v37 = vcvt.s32.f32 %v545_v31  ;;  %vm529_vm7 = vcmp.eq.f32.partialorder %v4497_v52, %v4622_v39  ;;  %726 = vmin.xlane.f32.xlu0 %v4628_v63 }
 0x155   : > { %v4636_v42 = vsel %vm530_vm0, %v4199_v8, 128  ;;  %v4640_v44 = vsel %vm529_vm7, %v4199_v8, 128 }
 0x156   : > { %548 = vmin.xlane.f32.xlu1 %v4630_v37  ;;  %v573_v41 = vshra.s32 %v4636_v42, 16  ;;  %v559_v47 = vshra.s32 %v4640_v44, 16 }
 0x157   : > { %v4643_v45 = vpop.xlane.xlu1 %520  ;;  %v4646_v48 = vpop.xlane.xlu0 %518 }
 0x158   : > { %6882 = vst [vmem:[#allocation16_spill] sm:$0xff] %v4643_v45  ;;  %6883 = vst [vmem:[#allocation17_spill] sm:$0xff] %v4646_v48  ;;  %vm532_vm3 = vcmp.eq.f32.partialorder %v4511_v53, %v4643_v45  ;;  %v4650_v57 = vcvt.s32.f32 %v573_v41  ;;  %vm531_vm12 = vcmp.eq.f32.partialorder %v4516_v51, %v4646_v48  ;;  %v4654_v14 = vcvt.s32.f32 %v559_v47 }
 0x159   : > { %v4657_v50 = vsel %vm532_vm3, %v4199_v8, 128  ;;  %v4661_v52 = vsel %vm531_vm12, %v4199_v8, 128 }
 0x15a   : > { %576 = vmin.xlane.f32.xlu1 %v4650_v57  ;;  %v601_v3 = vshra.s32 %v4657_v50, 16  ;;  %562 = vmin.xlane.f32.xlu0 %v4654_v14  ;;  %v587_v61 = vshra.s32 %v4661_v52, 16  ;;  %v586_v46 = vand.u32 65535, %v4661_v52 }
 0x15b   : > { %v4665_v53 = vpop.xlane.xlu1 %524  ;;  %v4668_v62 = vpop.xlane.xlu0 %522 }
 0x15c   : > { %6884 = vst [vmem:[#allocation18_spill] sm:$0xff] %v4665_v53  ;;  %6885 = vst [vmem:[#allocation19_spill] sm:$0xff] %v4668_v62  ;;  %vm534_vm4 = vcmp.eq.f32.partialorder %v4532_v56, %v4665_v53  ;;  %v4672_v51 = vcvt.s32.f32 %v601_v3  ;;  %vm533_vm1 = vcmp.eq.f32.partialorder %v4535_v58, %v4668_v62  ;;  %v4676_v2 = vcvt.s32.f32 %v587_v61 }
 0x15d   : > { %v4679_v4 = vsel %vm534_vm4, %v4199_v8, 128  ;;  %v4683_v5 = vsel %vm533_vm1, %v4199_v8, 128  ;;  %v558_v53 = vand.u32 65535, %v4640_v44 }
 0x15e   : > { %604 = vmin.xlane.f32.xlu1 %v4672_v51  ;;  %v629_v7 = vshra.s32 %v4679_v4, 16  ;;  %590 = vmin.xlane.f32.xlu0 %v4676_v2  ;;  %v615_v56 = vshra.s32 %v4683_v5, 16 }
 0x15f   : > { %v4688_v9 = vpop.xlane.xlu0 %526  ;;  %v560_v62 = vcvt.s32.f32 %v558_v53 }
 0x160   : > { %6886 = vst [vmem:[#allocation20_spill] sm:$0xff] %v4688_v9  ;;  %v4690_v38 = vcvt.s32.f32 %v629_v7  ;;  %vm535_vm13 = vcmp.eq.f32.partialorder %v4544_v60, %v4688_v9  ;;  %v4694_v58 = vcvt.s32.f32 %v615_v56  ;;  %v4713_v60 = vld [vmem:[%s6742_s4 + $0x8] sm:$0xff] }
 0x161   : > { %v4698_v33 = vsel %vm535_vm13, %v4199_v8, 128  ;;  %v6746_v36 = vand.u32 4294901760, %v4713_v60  ;;  %v6903_v48 = vand.u32 4294901760, %v4713_v60 }
 0x162   : > { %632 = vmin.xlane.f32.xlu1 %v4690_v38  ;;  %618 = vmin.xlane.f32.xlu0 %v4694_v58  ;;  %v643_v10 = vshra.s32 %v4698_v33, 16 }
 0x163   : > { %v4721_v17 = vpack.c.bf16 %v6746_v36, %v6747_v43 }
 0x164   : > { %v4702_v54 = vcvt.s32.f32 %v643_v10 }
 0x165   : > { %3716 = vmatprep.subr.bf16.mxu0 %v4721_v17  ;;  %3620 = vmatprep.subr.bf16.mxu1 %v4721_v17 }
 0x166   : > { %646 = vmin.xlane.f32.xlu0 %v4702_v54  ;;  %3718 = vmatpush3.bf16.msra.mxu0 %v4721_v17 }
 0x167   : > { %3622 = vmatpush3.bf16.msra.mxu1 %v4721_v17 }
 0x1d1   : > { %v4727_v20 = vpop.xlane.xlu1 %712 }
 0x1d2   : > { %6887 = vst [vmem:[#allocation21_spill] sm:$0xff] %v4727_v20  ;;  %vm728_vm9 = vcmp.eq.f32.partialorder %v4553_v55, %v4727_v20 }
 0x1d3   : > { %v4732_v22 = vsel %vm728_vm9, %v4199_v8, 128 }
 0x1d4   : > { %v745_v23 = vshra.s32 %v4732_v22, 16  ;;  %v744_v34 = vand.u32 65535, %v4732_v22 }
 0x1d5   : > { %v4735_v1 = vpop.xlane.xlu0 %714  ;;  %v4737_v6 = vpop.xlane.xlu1 %716 }
 0x1d6   : > { %6888 = vst [vmem:[#allocation22_spill] sm:$0xff] %v4735_v1  ;;  %6889 = vst [vmem:[#allocation23_spill] sm:$0xff] %v4737_v6  ;;  %vm729_vm8 = vcmp.eq.f32.partialorder %v4566_v11, %v4735_v1  ;;  %vm730_vm5 = vcmp.eq.f32.partialorder %v4570_v0, %v4737_v6  ;;  %v4743_v25 = vcvt.s32.f32 %v745_v23  ;;  %v746_v15 = vcvt.s32.f32 %v744_v34 }
 0x1d7   : > { %v4746_v28 = vsel %vm729_vm8, %v4199_v8, 128  ;;  %v4749_v55 = vsel %vm730_vm5, %v4199_v8, 128 }
 0x1d8   : > { %v759_v12 = vshra.s32 %v4746_v28, 16  ;;  %v773_v30 = vshra.s32 %v4749_v55, 16  ;;  %748 = vmin.xlane.f32.xlu1 %v4743_v25 }
 0x1d9   : > { %v4754_v31 = vpop.xlane.xlu0 %718  ;;  %v4758_v11 = vpop.xlane.xlu1 %720 }
 0x1da   : > { %6890 = vst [vmem:[#allocation24_spill] sm:$0xff] %v4754_v31  ;;  %vm731_vm10 = vcmp.eq.f32.partialorder %v4584_v21, %v4754_v31  ;;  %6891 = vst [vmem:[#allocation25_spill] sm:$0xff] %v4758_v11  ;;  %vm732_vm2 = vcmp.eq.f32.partialorder %v4591_v24, %v4758_v11  ;;  %v4762_v0 = vcvt.s32.f32 %v759_v12  ;;  %v4764_v41 = vcvt.s32.f32 %v773_v30 }
 0x1db   : > { %v4767_v47 = vsel %vm731_vm10, %v4199_v8, 128  ;;  %v4772_v61 = vsel %vm732_vm2, %v4199_v8, 128  ;;  %v5017_v31 = vsub.f32 %v4713_v60, %v6903_v48  ;;  %v772_v48 = vand.u32 65535, %v4749_v55 }
 0x1dc   : > { %762 = vmin.xlane.f32.xlu0 %v4762_v0  ;;  %v787_v3 = vshra.s32 %v4767_v47, 16  ;;  %776 = vmin.xlane.f32.xlu1 %v4764_v41  ;;  %v801_v24 = vshra.s32 %v4772_v61, 16  ;;  %v786_v34 = vand.u32 65535, %v4767_v47 }
 0x1dd   : > { %v4775_v21 = vpop.xlane.xlu0 %722  ;;  %v4780_v7 = vpop.xlane.xlu1 %724  ;;  %v774_v22 = vcvt.s32.f32 %v772_v48 }
 0x1de   : > { %6892 = vst [vmem:[#allocation26_spill] sm:$0xff] %v4775_v21  ;;  %vm733_vm15 = vcmp.eq.f32.partialorder %v4609_v29, %v4775_v21  ;;  %6893 = vst [vmem:[#allocation27_spill] sm:$0xff] %v4780_v7  ;;  %v4782_v56 = vcvt.s32.f32 %v787_v3  ;;  %v4784_v10 = vcvt.s32.f32 %v801_v24  ;;  %vm734_vm14 = vcmp.eq.f32.partialorder %v4603_v27, %v4780_v7  ;;  %v4829_v7 = vld [vmem:[%s6742_s4 + $0x18] sm:$0xff] }
 0x1df   : > { %v4791_v12 = vsel %vm733_vm15, %v4199_v8, 128  ;;  %v4801_v3 = vsel %vm734_vm14, %v4199_v8, 128 }
 0x1e0   : > { %790 = vmin.xlane.f32.xlu0 %v4782_v56  ;;  %804 = vmin.xlane.f32.xlu1 %v4784_v10  ;;  %v815_v30 = vshra.s32 %v4791_v12, 16  ;;  %v829_v36 = vshra.s32 %v4801_v3, 16 }
 0x1e1   : > { %v4788_v23 = vpop.xlane.xlu0 %726 }
 0x1e2   : > { %6894 = vst [vmem:[#allocation28_spill] sm:$0xff] %v4788_v23  ;;  %vm735_vm0 = vcmp.eq.f32.partialorder %v4628_v63, %v4788_v23  ;;  %v4806_v24 = vcvt.s32.f32 %v815_v30  ;;  %v544_v23 = vand.u32 65535, %v4616_v18  ;;  %v4816_v49 = vcvt.s32.f32 %v829_v36  ;;  %v4824_v30 = vld [vmem:[%s6742_s4 + $0x10] sm:$0xff] }
 0x1e3   : > { %v4797_v29 = vpop.xlane.xlu1 %548  ;;  %v4804_v27 = vsel %vm735_vm0, %v4199_v8, 128  ;;  %v6760_v18 = vand.u32 4294901760, %v4829_v7  ;;  %v572_v36 = vand.u32 65535, %v4636_v42  ;;  %v6895_v21 = vand.u32 4294901760, %v4824_v30  ;;  %v4860_v42 = vld [vmem:[%s6742_s4 + $0x28] sm:$0xff] }
 0x1e4   : > { %v843_v43 = vshra.s32 %v4804_v27, 16  ;;  %818 = vmin.xlane.f32.xlu0 %v4806_v24  ;;  %832 = vmin.xlane.f32.xlu1 %v4816_v49  ;;  %vm550_vm7 = vcmp.eq.f32.partialorder %v4630_v37, %v4797_v29  ;;  %v546_v44 = vcvt.s32.f32 %v544_v23  ;;  %v600_v23 = vand.u32 65535, %v4657_v50 }
 0x1e5   : > { %v4847_v37 = vpack.c.bf16 %v6760_v18, %v6895_v21  ;;  %v6761_v50 = vand.u32 4294901760, %v4860_v42  ;;  %v574_v21 = vcvt.s32.f32 %v572_v36  ;;  %v555_v47 = vcvt.f32.s32 %v4797_v29 }
 0x1e6   : > { %v4818_v40 = vcvt.s32.f32 %v843_v43  ;;  %v551_v32 = vsel %vm550_vm7, %v546_v44, inf  ;;  %v602_v18 = vcvt.s32.f32 %v600_v23 }
 0x1e7   : > { %v4811_v9 = vpop.xlane.xlu0 %562  ;;  %v4813_v63 = vpop.xlane.xlu1 %576  ;;  %3720 = vmatprep.subr.bf16.mxu0 %v4847_v37  ;;  %3624 = vmatprep.subr.bf16.mxu1 %v4847_v37 }
 0x1e8   : > { %846 = vmin.xlane.f32.xlu0 %v4818_v40  ;;  %vm564_vm3 = vcmp.eq.f32.partialorder %v4654_v14, %v4811_v9  ;;  %v4855_v14 = vld [vmem:[%s6742_s4 + $0x20] sm:$0xff]  ;;  %552 = vmin.xlane.f32.xlu1 %v551_v32  ;;  %vm578_vm12 = vcmp.eq.f32.partialorder %v4650_v57, %v4813_v63  ;;  %v588_v32 = vcvt.s32.f32 %v586_v46  ;;  %v4887_v46 = vld [vmem:[%s6742_s4 + $0x30] sm:$0xff] }
 0x1e9   : > { %v565_v52 = vsel %vm564_vm3, %v560_v62, inf  ;;  %v6762_v53 = vand.u32 4294901760, %v4855_v14  ;;  %3722 = vmatpush3.bf16.msra.mxu0 %v4847_v37  ;;  %v614_v62 = vand.u32 65535, %v4683_v5  ;;  %3626 = vmatpush3.bf16.msra.mxu1 %v4847_v37  ;;  %v6768_v23 = vand.u32 4294901760, %v4887_v46 }
 0x1eb   : > { %v4837_v43 = vpop.xlane.xlu0 %590  ;;  %v4849_v19 = vpop.xlane.xlu1 %604  ;;  %v4878_v57 = vpack.c.bf16 %v6761_v50, %v6762_v53  ;;  %v642_v50 = vand.u32 65535, %v4698_v33 }
 0x1ec   : > { %566 = vmin.xlane.f32.xlu0 %v565_v52  ;;  %vm592_vm4 = vcmp.eq.f32.partialorder %v4676_v2, %v4837_v43  ;;  %v579_v52 = vsel %vm578_vm12, %v574_v21, inf  ;;  %vm606_vm1 = vcmp.eq.f32.partialorder %v4672_v51, %v4849_v19  ;;  %v4892_v2 = vld [vmem:[%s6742_s4 + $0x38] sm:$0xff]  ;;  %v628_v51 = vand.u32 65535, %v4679_v4 }
 0x1ed   : > { %6896 = vst [vmem:[#allocation29_spill] sm:$0xff] %v4878_v57  ;;  %580 = vmin.xlane.f32.xlu1 %v579_v52  ;;  %v593_v36 = vsel %vm592_vm4, %v588_v32, inf  ;;  %3724 = vmatprep.subr.bf16.mxu0 %v4878_v57  ;;  %v6765_v21 = vand.u32 4294901760, %v4892_v2  ;;  %v616_v52 = vcvt.s32.f32 %v614_v62  ;;  %v607_v53 = vsel %vm606_vm1, %v602_v18, inf }
 0x1ee   : > { %3726 = vmatpush3.bf16.msra.mxu0 %v4878_v57  ;;  %3628 = vmatprep.subr.bf16.mxu1 %v4878_v57  ;;  %v630_v62 = vcvt.s32.f32 %v628_v51  ;;  %v644_v33 = vcvt.s32.f32 %v642_v50 }
 0x1ef   : > { %v4867_v44 = vpop.xlane.xlu0 %618  ;;  %v4894_v5 = vpop.xlane.xlu1 %632  ;;  %3630 = vmatpush3.bf16.msra.mxu1 %v4878_v57 }
 0x1f0   : > { %594 = vmin.xlane.f32.xlu0 %v593_v36  ;;  %vm620_vm13 = vcmp.eq.f32.partialorder %v4694_v58, %v4867_v44  ;;  %v4910_v58 = vpack.c.bf16 %v6765_v21, %v6768_v23  ;;  %vm634_vm9 = vcmp.eq.f32.partialorder %v4690_v38, %v4894_v5  ;;  %v4924_v38 = vld [vmem:[%s6742_s4 + $0x40] sm:$0xff]  ;;  %v4991_v23 = vld [vmem:[%s6742_s4 + $0x78] sm:$0xff] }
 0x1f1   : > { %608 = vmin.xlane.f32.xlu1 %v607_v53  ;;  %v621_v4 = vsel %vm620_vm13, %v616_v52, inf  ;;  %v635_v18 = vsel %vm634_vm9, %v630_v62, inf  ;;  %v6764_v50 = vand.u32 4294901760, %v4924_v38  ;;  %v4945_v52 = vld [vmem:[%s6742_s4 + $0x50] sm:$0xff]  ;;  %v6776_v11 = vand.u32 4294901760, %v4991_v23 }
 0x1f2   : > { %6897 = vst [vmem:[#allocation30_spill] sm:$0xff] %v4910_v58  ;;  %3728 = vmatprep.subr.bf16.mxu0 %v4910_v58  ;;  %3632 = vmatprep.subr.bf16.mxu1 %v4910_v58  ;;  %v6767_v62 = vand.u32 4294901760, %v4945_v52 }
 0x1f3   : > { %v4902_v32 = vpop.xlane.xlu0 %646  ;;  %3730 = vmatpush3.bf16.msra.mxu0 %v4910_v58  ;;  %3634 = vmatpush3.bf16.msra.mxu1 %v4910_v58 }
 0x1f4   : > { %622 = vmin.xlane.f32.xlu0 %v621_v4  ;;  %vm648_vm8 = vcmp.eq.f32.partialorder %v4702_v54, %v4902_v32  ;;  %v4929_v54 = vld [vmem:[%s6742_s4 + $0x48] sm:$0xff]  ;;  %v4950_v4 = vld [vmem:[%s6742_s4 + $0x58] sm:$0xff] }
 0x1f5   : > { %636 = vmin.xlane.f32.xlu1 %v635_v18  ;;  %v649_v53 = vsel %vm648_vm8, %v644_v33, inf  ;;  %v6763_v36 = vand.u32 4294901760, %v4929_v54  ;;  %v6766_v33 = vand.u32 4294901760, %v4950_v4 }
 0x1f7   : > { %v4937_v51 = vpack.c.bf16 %v6763_v36, %v6764_v50  ;;  %v4959_v18 = vpack.c.bf16 %v6766_v33, %v6767_v62  ;;  %v4969_v36 = vld [vmem:[%s6742_s4 + $0x68] sm:$0xff]  ;;  %v4986_v62 = vld [vmem:[%s6742_s4 + $0x70] sm:$0xff] }
 0x1f8   : > { %650 = vmin.xlane.f32.xlu0 %v649_v53  ;;  %v4964_v53 = vld [vmem:[%s6742_s4 + $0x60] sm:$0xff]  ;;  %v6771_v21 = vand.u32 4294901760, %v4969_v36  ;;  %v6777_v45 = vand.u32 4294901760, %v4986_v62 }
 0x1f9   : > { %6898 = vst [vmem:[#allocation31_spill] sm:$0xff] %v4937_v51  ;;  %3732 = vmatprep.subr.bf16.mxu0 %v4937_v51  ;;  %3636 = vmatprep.subr.bf16.mxu1 %v4937_v51  ;;  %6899 = vst [vmem:[#allocation32_spill] sm:$0xff] %v4959_v18  ;;  %v6772_v50 = vand.u32 4294901760, %v4964_v53 }
 0x1fa   : > { %3734 = vmatpush3.bf16.msra.mxu0 %v4937_v51  ;;  %3638 = vmatpush3.bf16.msra.mxu1 %v4937_v51 }
 0x1fb   : > { %3736 = vmatprep.subr.bf16.mxu0 %v4959_v18  ;;  %3640 = vmatprep.subr.bf16.mxu1 %v4959_v18  ;;  %v4981_v33 = vpack.c.bf16 %v6771_v21, %v6772_v50  ;;  %v5003_v21 = vpack.c.bf16 %v6776_v11, %v6777_v45  ;;  %v6902_v50 = vand.u32 4294901760, %v4708_v59  ;;  %v1187_v45 = vand.u32 4294901760, %v5017_v31 }
 0x1fd   : > { %6900 = vst [vmem:[#allocation33_spill] sm:$0xff] %v4981_v33  ;;  %6901 = vst [vmem:[#allocation34_spill] sm:$0xff] %v5003_v21  ;;  %v5012_v16 = vsub.f32 %v4708_v59, %v6902_v50  ;;  %v758_v59 = vand.u32 65535, %v4746_v28 }
 0x1fe   : > { %3738 = vmatpush3.bf16.msra.mxu0 %v4959_v18  ;;  %3642 = vmatpush3.bf16.msra.mxu1 %v4959_v18 }
 0x1ff   : > { %3740 = vmatprep.subr.bf16.mxu0 %v4981_v33  ;;  %3644 = vmatprep.subr.bf16.mxu1 %v4981_v33  ;;  %v1180_v11 = vand.u32 4294901760, %v5012_v16  ;;  %v760_v26 = vcvt.s32.f32 %v758_v59  ;;  %v788_v59 = vcvt.s32.f32 %v786_v34  ;;  %v556_v34 = vshll.u32 %v555_v47, 16 }
 0x201   : > { %v5021_v13 = vpack.c.bf16 %v1187_v45, %v1180_v11 }
 0x202   : > { %3742 = vmatpush3.bf16.msra.mxu0 %v4981_v33  ;;  %3646 = vmatpush3.bf16.msra.mxu1 %v4981_v33 }
 0x203   : > { %3744 = vmatprep.subr.bf16.mxu0 %v5003_v21  ;;  %3648 = vmatprep.subr.bf16.mxu1 %v5003_v21 }
 0x206   : > { %3746 = vmatpush3.bf16.msra.mxu0 %v5003_v21  ;;  %3650 = vmatpush3.bf16.msra.mxu1 %v5003_v21 }
 0x207   : > { %3748 = vmatprep.subr.bf16.mxu0 %v5021_v13 }
 0x265   : > { %v5025_v6 = vpop.xlane.xlu1 %748 }
 0x266   : > { %vm750_vm5 = vcmp.eq.f32.partialorder %v4743_v25, %v5025_v6  ;;  %v800_v25 = vand.u32 65535, %v4772_v61 }
 0x267   : > { %v751_v60 = vsel %vm750_vm5, %v746_v15, inf }
 0x268   : > { %752 = vmin.xlane.f32.xlu1 %v751_v60  ;;  %v802_v60 = vcvt.s32.f32 %v800_v25  ;;  %v583_v25 = vcvt.f32.s32 %v4813_v63  ;;  %v1181_v63 = vsub.f32 %v5012_v16, %v1180_v11  ;;  %v653_v11 = vcvt.f32.s32 %v4902_v32 }
 0x269   : > { %v5031_v50 = vpop.xlane.xlu0 %762  ;;  %v5033_v20 = vpop.xlane.xlu1 %776 }
 0x26a   : > { %vm764_vm10 = vcmp.eq.f32.partialorder %v4762_v0, %v5031_v50  ;;  %vm778_vm2 = vcmp.eq.f32.partialorder %v4764_v41, %v5033_v20  ;;  %v1182_v47 = vand.u32 4294901760, %v1181_v63  ;;  %v6906_v63 = vmov 0 }
 0x26b   : > { %v765_v39 = vsel %vm764_vm10, %v760_v26, inf  ;;  %v779_v15 = vsel %vm778_vm2, %v774_v22, inf  ;;  %v814_v26 = vand.u32 65535, %v4791_v12  ;;  %v842_v22 = vand.u32 65535, %v4804_v27 }
 0x26c   : > { %766 = vmin.xlane.f32.xlu0 %v765_v39  ;;  %780 = vmin.xlane.f32.xlu1 %v779_v15  ;;  %v828_v39 = vand.u32 65535, %v4801_v3  ;;  %v569_v15 = vcvt.f32.s32 %v4811_v9  ;;  %v611_v27 = vcvt.f32.s32 %v4849_v19  ;;  %v6904_v19 = vand.u32 4294901760, %v4824_v30 }
 0x26d   : > { %v5041_v28 = vpop.xlane.xlu0 %790  ;;  %v5043_v55 = vpop.xlane.xlu1 %804  ;;  %v816_v48 = vcvt.s32.f32 %v814_v26  ;;  %v844_v3 = vcvt.s32.f32 %v842_v22  ;;  %v1188_v26 = vsub.f32 %v5017_v31, %v1187_v45 }
 0x26e   : > { %vm792_vm15 = vcmp.eq.f32.partialorder %v4782_v56, %v5041_v28  ;;  %vm806_vm14 = vcmp.eq.f32.partialorder %v4784_v10, %v5043_v55  ;;  %v830_v12 = vcvt.s32.f32 %v828_v39  ;;  %v5076_v9 = vsub.f32 %v4824_v30, %v6904_v19 }
 0x26f   : > { %v793_v0 = vsel %vm792_vm15, %v788_v59, inf  ;;  %v807_v41 = vsel %vm806_vm14, %v802_v60, inf }
 0x270   : > { %794 = vmin.xlane.f32.xlu0 %v793_v0  ;;  %808 = vmin.xlane.f32.xlu1 %v807_v41  ;;  %v639_v0 = vcvt.f32.s32 %v4894_v5  ;;  %v584_v5 = vshll.u32 %v583_v25, 16 }
 0x271   : > { %v5052_v61 = vpop.xlane.xlu0 %818  ;;  %v5057_v10 = vpop.xlane.xlu1 %832 }
 0x272   : > { %vm820_vm0 = vcmp.eq.f32.partialorder %v4806_v24, %v5052_v61  ;;  %vm834_vm7 = vcmp.eq.f32.partialorder %v4816_v49, %v5057_v10  ;;  %v597_v24 = vcvt.f32.s32 %v4837_v43  ;;  %v625_v49 = vcvt.f32.s32 %v4867_v44 }
 0x273   : > { %v821_v56 = vsel %vm820_vm0, %v816_v48, inf  ;;  %v835_v59 = vsel %vm834_vm7, %v830_v12, inf  ;;  %v1189_v44 = vand.u32 4294901760, %v1188_v26  ;;  %v570_v48 = vshll.u32 %v569_v15, 16 }
 0x274   : > { %822 = vmin.xlane.f32.xlu0 %v821_v56  ;;  %836 = vmin.xlane.f32.xlu1 %v835_v59  ;;  %v598_v56 = vshll.u32 %v597_v24, 16  ;;  %v612_v12 = vshll.u32 %v611_v27, 16  ;;  %v640_v30 = vshll.u32 %v639_v0, 16  ;;  %v626_v32 = vshll.u32 %v625_v49, 16  ;;  %v5102_v27 = vld [vmem:[%s6741_s3] ss:$0 sm:$0xff] }
 0x275   : > { %v5062_v29 = vpop.xlane.xlu0 %846  ;;  %v553_v41 = vpop.xlane.xlu1 %552  ;;  %v5084_v59 = vpack.c.bf16 %v1189_v44, %v1182_v47  ;;  %v6789_v49 = vmov 0.0  }
 0x276   : > { %vm848_vm3 = vcmp.eq.f32.partialorder %v4818_v40, %v5062_v29  ;;  %v6905_v40 = vand.u32 4294901760, %v4829_v7  ;;  %v554_v39 = vcvt.f32.s32 %v553_v41  ;;  %v654_v41 = vshll.u32 %v653_v11, 16 }
 0x277   : > { %v849_v60 = vsel %vm848_vm3, %v844_v3, inf  ;;  %3652 = vmatprep.subr.bf16.mxu1 %v5084_v59 }
 0x278   : > { %850 = vmin.xlane.f32.xlu0 %v849_v60  ;;  %v5081_v43 = vsub.f32 %v4829_v7, %v6905_v40  ;;  %v557_v3 = vadd.s32 %v556_v34, %v554_v39  ;;  %v6786_v7 = vand.u32 4294901760, %v5076_v9  ;;  %v6908_v34 = vmov 0 }
 0x279   : > { %v567_v45 = vpop.xlane.xlu0 %566 }
 0x27a   : > { %v568_v22 = vcvt.f32.s32 %v567_v45  ;;  %v581_v19 = vpop.xlane.xlu1 %580  ;;  %v6785_v40 = vand.u32 4294901760, %v5081_v43  ;;  %vm5089_vm12 = vcmp.eq.s32.totalorder %v4199_v8, %v557_v3 }
 0x27b   : > { %v6907_v63 = vsel %vm5089_vm12, 4294967295, %v6906_v63  ;;  %v582_v25 = vcvt.f32.s32 %v581_v19  ;;  %v2222_v24 = vsel %vm5089_vm12, %v5102_v27, 0.0  ;;  %v3023_v0 = vsel %vm5089_vm12, 1.0, %v6789_v49 }
 0x27c   : > { %v571_v60 = vadd.s32 %v570_v48, %v568_v22  ;;  %2230 = vadd.xlane.f32.xlu1 %v2222_v24  ;;  %v5113_v45 = vsub.f32 %v3023_v0, %v3023_v0  ;;  %v3751_v3 = vpack.c.bf16 %v6785_v40, %v6786_v7 }
 0x27d   : > { %v595_v15 = vpop.xlane.xlu0 %594  ;;  %v585_v11 = vadd.s32 %v584_v5, %v582_v25  ;;  %v5123_v5 = vsel %vm5089_vm12, %v4277_v35, 0 }
 0x27e   : > { %vm5095_vm4 = vcmp.eq.s32.totalorder %v4199_v8, %v571_v60  ;;  %v596_v26 = vcvt.f32.s32 %v595_v15  ;;  %6910 = vst [vmem:[#allocation35_spill] sm:$0xff] %v5113_v45  ;;  %v609_v48 = vpop.xlane.xlu1 %608  ;;  %v1019_v19 = vand.u32 4294901760, %v5113_v45 }
 0x27f   : > { %v6909_v34 = vsel %vm5095_vm4, 4294967295, %v6908_v34  ;;  %v2223_v39 = vsel %vm5095_vm4, %v5102_v27, 0.0  ;;  %v3024_v47 = vsel %vm5095_vm4, 1.0, %v6789_v49  ;;  %vm5130_vm1 = vcmp.eq.s32.totalorder %v4199_v8, %v585_v11 }
 0x280   : > { %v599_v44 = vadd.s32 %v598_v56, %v596_v26  ;;  %2232 = vadd.xlane.f32.xlu0 %v2223_v39  ;;  %v5118_v22 = vsub.f32 %v3024_v47, %v3024_v47  ;;  %v610_v56 = vcvt.f32.s32 %v609_v48  ;;  %v5138_v15 = vsel %vm5095_vm4, %v4277_v35, 0  ;;  %3483 = vmatprep.mubr.f32.mxu0 %v1019_v19 }
 0x281   : > { %v623_v25 = vpop.xlane.xlu0 %622  ;;  %v2224_v26 = vsel %vm5130_vm1, %v5102_v27, 0.0  ;;  %v1020_v47 = vsub.f32 %v5113_v45, %v1019_v19 }
 0x282   : > { %6911 = vst [vmem:[#allocation36_spill] sm:$0xff] %v5118_v22  ;;  %vm5141_vm13 = vcmp.eq.s32.totalorder %v4199_v8, %v599_v44  ;;  %v624_v0 = vcvt.f32.s32 %v623_v25  ;;  %v1029_v11 = vand.u32 4294901760, %v5118_v22  ;;  %v613_v39 = vadd.s32 %v612_v12, %v610_v56  ;;  %2234 = vadd.xlane.f32.xlu1 %v2224_v26  ;;  %v637_v40 = vpop.xlane.xlu1 %636 }
 0x283   : > { %v2225_v35 = vsel %vm5141_vm13, %v5102_v27, 0.0  ;;  %v3025_v44 = vsel %vm5130_vm1, 1.0, %v6789_v49  ;;  %v3026_v56 = vsel %vm5141_vm13, 1.0, %v6789_v49  ;;  %v6917_v26 = vmov 0 }
 0x284   : > { %v627_v48 = vadd.s32 %v626_v32, %v624_v0  ;;  %2236 = vadd.xlane.f32.xlu0 %v2225_v35  ;;  %3484 = vmatmul.mubr.f32.vlgmr.msra.gmra.mrb[0].mxu0 %v1029_v11  ;;  %v5156_v25 = vsub.f32 %v3025_v44, %v3025_v44  ;;  %v1030_v12 = vsub.f32 %v5118_v22, %v1029_v11  ;;  %v638_v19 = vcvt.f32.s32 %v637_v40 }
 0x285   : > { %vm5163_vm9 = vcmp.eq.s32.totalorder %v4199_v8, %v613_v39  ;;  %v1021_v7 = vand.u32 4294901760, %v1020_v47  ;;  %v651_v1 = vpop.xlane.xlu0 %650  ;;  %v5167_v32 = vsub.f32 %v3026_v56, %v3026_v56  ;;  %3750 = vmatpush3.bf16.msra.mxu0 %v5021_v13  ;;  %v6920_v0 = vmov 0 }
 0x286   : > { %6916 = vst [vmem:[#allocation37_spill] sm:$0xff] %v5156_v25  ;;  %v6918_v26 = vsel %vm5163_vm9, 4294967295, %v6917_v26  ;;  %vm5171_vm8 = vcmp.eq.s32.totalorder %v4199_v8, %v627_v48  ;;  %v2226_v11 = vsel %vm5163_vm9, %v5102_v27, 0.0  ;;  %v652_v39 = vcvt.f32.s32 %v651_v1  ;;  %3752 = vmatprep.subr.bf16.mxu0 %v3751_v3 }
 0x287   : > { %6919 = vst [vmem:[#allocation38_spill] sm:$0xff] %v5167_v32  ;;  %v6921_v0 = vsel %vm5171_vm8, 4294967295, %v6920_v0  ;;  %v1039_v35 = vand.u32 4294901760, %v5156_v25  ;;  %v641_v40 = vadd.s32 %v640_v30, %v638_v19  ;;  %3315 = vmatprep.mubr.f32.mxu1 %v1021_v7  ;;  %2238 = vadd.xlane.f32.xlu1 %v2226_v11  ;;  %v2227_v13 = vsel %vm5171_vm8, %v5102_v27, 0.0 }
 0x288   : > { %v1031_v47 = vand.u32 4294901760, %v1030_v12  ;;  %v1049_v44 = vand.u32 4294901760, %v5167_v32  ;;  %v655_v48 = vadd.s32 %v654_v41, %v652_v39  ;;  %2240 = vadd.xlane.f32.xlu0 %v2227_v13  ;;  %v3027_v1 = vsel %vm5163_vm9, 1.0, %v6789_v49 }
 0x289   : > { %3486 = vmatprep.mubr.f32.mxu0 %v1039_v35  ;;  %v1040_v56 = vsub.f32 %v5156_v25, %v1039_v35  ;;  %v3028_v30 = vsel %vm5171_vm8, 1.0, %v6789_v49  ;;  %vm5191_vm5 = vcmp.eq.s32.totalorder %v4199_v8, %v641_v40  ;;  %v6922_v7 = vmov 0  ;;  %3754 = vmatpush3.bf16.msra.mxu0 %v3751_v3 }
 0x28a   : > { %v6923_v7 = vsel %vm5191_vm5, 4294967295, %v6922_v7  ;;  %3316 = vmatmul.mubr.f32.vlgmr.msra.gmra.mrb[0].mxu1 %v1031_v47  ;;  %3487 = vmatmul.mubr.f32.gmra.mrb[2].mxu0 %v1049_v44  ;;  %v5195_v41 = vsub.f32 %v3027_v1, %v3027_v1  ;;  %v1050_v12 = vsub.f32 %v5167_v32, %v1049_v44  ;;  %v2279_v19 = vshrl.u32 %v5123_v5, 16 }
 0x28b   : > { %6924 = vst [vmem:[#allocation39_spill] sm:$0xff] %v6923_v7  ;;  %vm5200_vm10 = vcmp.eq.s32.totalorder %v4199_v8, %v655_v48  ;;  %v6926_v11 = vmov 0  ;;  %v2228_v39 = vsel %vm5191_vm5, %v5102_v27, 0.0  ;;  %v1041_v35 = vand.u32 4294901760, %v1040_v56  ;;  %3654 = vmatpush3.bf16.msra.mxu1 %v5084_v59 }
 0x28c   : > { %6925 = vst [vmem:[#allocation40_spill] sm:$0xff] %v5195_v41  ;;  %v6927_v11 = vsel %vm5200_vm10, 4294967295, %v6926_v11  ;;  %v5207_v40 = vsub.f32 %v3028_v30, %v3028_v30  ;;  %2242 = vadd.xlane.f32.xlu1 %v2228_v39  ;;  %v1059_v13 = vand.u32 4294901760, %v5195_v41  ;;  %v2229_v47 = vsel %vm5200_vm10, %v5102_v27, 0.0 }
 0x28d   : > { %v1051_v44 = vand.u32 4294901760, %v1050_v12  ;;  %v3029_v48 = vsel %vm5191_vm5, 1.0, %v6789_v49  ;;  %3318 = vmatprep.mubr.f32.mxu1 %v1041_v35  ;;  %2244 = vadd.xlane.f32.xlu0 %v2229_v47  ;;  %v2291_v59 = vshrl.u32 %v5138_v15, 16  ;;  %v2278_v3 = vand.u32 65535, %v5123_v5  ;;  %v5232_v5 = vld [vmem:[%s6739_s1] ss:$0 sm:$0xff] }
 0x28e   : > { %6928 = vst [vmem:[#allocation41_spill] sm:$0xff] %v5207_v40  ;;  %v1069_v56 = vand.u32 4294901760, %v5207_v40  ;;  %v5218_v1 = vsub.f32 %v3029_v48, %v3029_v48  ;;  %3489 = vmatprep.mubr.f32.mxu0 %v1059_v13  ;;  %v2281_v30 = vcvt.s32.f32 %v2279_v19  ;;  %v1060_v39 = vsub.f32 %v5195_v41, %v1059_v13 }
 0x28f   : > { %3319 = vmatmul.mubr.f32.gmra.mrb[2].mxu1 %v1051_v44  ;;  %v3030_v12 = vsel %vm5200_vm10, 1.0, %v6789_v49  ;;  %v2290_v35 = vand.u32 65535, %v5138_v15  ;;  %v2293_v48 = vcvt.s32.f32 %v2291_v59  ;;  %v2272_v19 = vsel %vm5130_vm1, %v5232_v5, 0 }
 0x290   : > { %6929 = vst [vmem:[#allocation42_spill] sm:$0xff] %v5218_v1  ;;  %3490 = vmatmul.mubr.f32.gmra.mrb[4].mxu0 %v1069_v56  ;;  %v1079_v47 = vand.u32 4294901760, %v5218_v1  ;;  %v1070_v32 = vsub.f32 %v5207_v40, %v1069_v56  ;;  %2284 = vadd.xlane.f32.xlu1 %v2281_v30  ;;  %v1061_v13 = vand.u32 4294901760, %v1060_v39  ;;  %v2280_v44 = vcvt.s32.f32 %v2278_v3 }
 0x291   : > { %v5237_v49 = vsub.f32 %v3030_v12, %v3030_v12  ;;  %v6931_v15 = vand.u32 4294901760, %v5076_v9  ;;  %2296 = vadd.xlane.f32.xlu0 %v2293_v48  ;;  %v2292_v41 = vcvt.s32.f32 %v2290_v35  ;;  %v2273_v25 = vsel %vm5141_vm13, %v5232_v5, 0 }
 0x292   : > { %3492 = vmatprep.mubr.f32.mxu0 %v1079_v47  ;;  %v1071_v56 = vand.u32 4294901760, %v1070_v32  ;;  %v1080_v40 = vsub.f32 %v5218_v1, %v1079_v47  ;;  %3321 = vmatprep.mubr.f32.mxu1 %v1061_v13  ;;  %v2303_v3 = vshrl.u32 %v2272_v19, 16  ;;  %v2302_v39 = vand.u32 65535, %v2272_v19 }
 0x293   : > { %6930 = vst [vmem:[#allocation43_spill] sm:$0xff] %v5237_v49  ;;  %v1195_v59 = vsub.f32 %v5076_v9, %v6931_v15  ;;  %v1089_v30 = vand.u32 4294901760, %v5237_v49  ;;  %v2315_v12 = vshrl.u32 %v2273_v25, 16  ;;  %v2314_v45 = vand.u32 65535, %v2273_v25 }
 0x294   : > { %3322 = vmatmul.mubr.f32.gmra.mrb[4].mxu1 %v1071_v56  ;;  %v1081_v22 = vand.u32 4294901760, %v1080_v40  ;;  %v2274_v32 = vsel %vm5163_vm9, %v5232_v5, 0  ;;  %v2275_v35 = vsel %vm5171_vm8, %v5232_v5, 0  ;;  %2282 = vadd.xlane.f32.xlu1 %v2280_v44  ;;  %v6932_v13 = vand.u32 4294901760, %v5081_v43 }
 0x295   : > { %3493 = vmatmul.mubr.f32.gmra.mrb[6].mxu0 %v1089_v30  ;;  %v1090_v47 = vsub.f32 %v5237_v49, %v1089_v30  ;;  %v2327_v48 = vshrl.u32 %v2274_v32, 16  ;;  %v6933_v40 = vand.u32 4294901760, %v4855_v14  ;;  %2294 = vadd.xlane.f32.xlu0 %v2292_v41  ;;  %v2326_v15 = vand.u32 65535, %v2274_v32  ;;  %v6997_v60 = vld [vmem:[#allocation41_spill] sm:$0xff] }
 0x296   : > { %v1202_v19 = vsub.f32 %v5081_v43, %v6932_v13  ;;  %3324 = vmatprep.mubr.f32.mxu1 %v1081_v22  ;;  %v2339_v56 = vshrl.u32 %v2275_v35, 16  ;;  %v2276_v44 = vsel %vm5191_vm5, %v5232_v5, 0  ;;  %v6934_v30 = vand.u32 4294901760, %v4860_v42 }
 0x297   : > { %v5260_v25 = vsub.f32 %v4855_v14, %v6933_v40  ;;  %v2305_v1 = vcvt.s32.f32 %v2303_v3  ;;  %v1091_v13 = vand.u32 4294901760, %v1090_v47  ;;  %v2338_v21 = vand.u32 65535, %v2275_v35  ;;  %v6998_v24 = vld [vmem:[#allocation42_spill] sm:$0xff] }
 0x298   : > { %v5268_v49 = vsub.f32 %v4860_v42, %v6934_v30  ;;  %v2304_v33 = vcvt.s32.f32 %v2302_v39  ;;  %v2317_v18 = vcvt.s32.f32 %v2315_v12  ;;  %v2316_v14 = vcvt.s32.f32 %v2314_v45 }
 0x299   : > { %v2329_v40 = vcvt.s32.f32 %v2327_v48  ;;  %2308 = vadd.xlane.f32.xlu1 %v2305_v1  ;;  %3325 = vmatmul.mubr.f32.gmra.mrb[6].mxu1 %v1091_v13  ;;  %v2328_v22 = vcvt.s32.f32 %v2326_v15  ;;  %v2341_v41 = vcvt.s32.f32 %v2339_v56  ;;  %v2351_v32 = vshrl.u32 %v2276_v44, 16 }
 0x29a   : > { %v2350_v51 = vand.u32 65535, %v2276_v44  ;;  %2306 = vadd.xlane.f32.xlu0 %v2304_v33  ;;  %v1196_v58 = vand.u32 4294901760, %v1195_v59  ;;  %v1203_v7 = vand.u32 4294901760, %v1202_v19  ;;  %v1208_v57 = vand.u32 4294901760, %v5260_v25 }
 0x29b   : > { %v1215_v42 = vand.u32 4294901760, %v5268_v49  ;;  %v2340_v3 = vcvt.s32.f32 %v2338_v21  ;;  %v5275_v39 = vsel %vm5200_vm10, %v5232_v5, 0  ;;  %v6935_v45 = vand.u32 4294901760, %v4887_v46 }
 0x29c   : > { %v6936_v12 = vand.u32 4294901760, %v4892_v2  ;;  %v3655_v59 = vpack.c.bf16 %v1203_v7, %v1196_v58  ;;  %v1209_v47 = vsub.f32 %v5260_v25, %v1208_v57  ;;  %v6937_v15 = vand.u32 4294901760, %v4924_v38 }
 0x29d   : > { %v5280_v1 = vsub.f32 %v4887_v46, %v6935_v45  ;;  %v3755_v35 = vpack.c.bf16 %v1215_v42, %v1208_v57  ;;  %v1216_v21 = vsub.f32 %v5268_v49, %v1215_v42  ;;  %2320 = vadd.xlane.f32.xlu1 %v2317_v18  ;;  %v6938_v56 = vand.u32 4294901760, %v4929_v54 }
 0x29e   : > { %v5285_v33 = vsub.f32 %v4892_v2, %v6936_v12  ;;  %v5294_v46 = vsub.f32 %v4924_v38, %v6937_v15  ;;  %2318 = vadd.xlane.f32.xlu0 %v2316_v14  ;;  %3656 = vmatprep.subr.bf16.mxu1 %v3655_v59  ;;  %v1210_v57 = vand.u32 4294901760, %v1209_v47  ;;  %v6939_v18 = vand.u32 4294901760, %v4945_v52 }
 0x29f   : > { %v1222_v48 = vand.u32 4294901760, %v5280_v1  ;;  %v5299_v2 = vsub.f32 %v4929_v54, %v6938_v56  ;;  %v1217_v58 = vand.u32 4294901760, %v1216_v21  ;;  %v6940_v44 = vand.u32 4294901760, %v4950_v4  ;;  %3658 = vmatpush3.bf16.msra.mxu1 %v3655_v59  ;;  %3756 = vmatprep.subr.bf16.mxu0 %v3755_v35 }
 0x2a0   : > { %v1229_v19 = vand.u32 4294901760, %v5285_v33  ;;  %v5304_v7 = vsub.f32 %v4945_v52, %v6939_v18  ;;  %v1236_v14 = vand.u32 4294901760, %v5294_v46  ;;  %3758 = vmatpush3.bf16.msra.mxu0 %v3755_v35  ;;  %v6941_v21 = vand.u32 4294901760, %v4964_v53 }
 0x2a1   : > { %v5309_v30 = vsub.f32 %v4950_v4, %v6940_v44  ;;  %v1223_v54 = vsub.f32 %v5280_v1, %v1222_v48  ;;  %v3659_v42 = vpack.c.bf16 %v1217_v58, %v1210_v57  ;;  %v1243_v45 = vand.u32 4294901760, %v5299_v2  ;;  %2332 = vadd.xlane.f32.xlu1 %v2329_v40 }
 0x2a2   : > { %v3759_v38 = vpack.c.bf16 %v1229_v19, %v1222_v48  ;;  %v1230_v13 = vsub.f32 %v5285_v33, %v1229_v19  ;;  %v1250_v52 = vand.u32 4294901760, %v5304_v7  ;;  %v1237_v47 = vsub.f32 %v5294_v46, %v1236_v14  ;;  %2330 = vadd.xlane.f32.xlu0 %v2328_v22 }
 0x2a3   : > { %v1257_v12 = vand.u32 4294901760, %v5309_v30  ;;  %v1224_v4 = vand.u32 4294901760, %v1223_v54  ;;  %v5321_v48 = vsub.f32 %v4964_v53, %v6941_v21  ;;  %v2353_v35 = vcvt.s32.f32 %v2351_v32  ;;  %3660 = vmatprep.subr.bf16.mxu1 %v3659_v42 }
 0x2a4   : > { %3760 = vmatprep.subr.bf16.mxu0 %v3759_v38  ;;  %v1231_v59 = vand.u32 4294901760, %v1230_v13  ;;  %v2352_v19 = vcvt.s32.f32 %v2350_v51  ;;  %v3763_v15 = vpack.c.bf16 %v1243_v45, %v1236_v14  ;;  %v1244_v56 = vsub.f32 %v5299_v2, %v1243_v45  ;;  %3662 = vmatpush3.bf16.msra.mxu1 %v3659_v42 }
 0x2a5   : > { %v1238_v40 = vand.u32 4294901760, %v1237_v47  ;;  %v1251_v58 = vsub.f32 %v5304_v7, %v1250_v52  ;;  %v1258_v18 = vsub.f32 %v5309_v30, %v1257_v12  ;;  %3762 = vmatpush3.bf16.msra.mxu0 %v3759_v38  ;;  %v1264_v54 = vand.u32 4294901760, %v5321_v48  ;;  %2344 = vadd.xlane.f32.xlu1 %v2341_v41 }
 0x2a6   : > { %v3663_v57 = vpack.c.bf16 %v1231_v59, %v1224_v4  ;;  %v1245_v44 = vand.u32 4294901760, %v1244_v56  ;;  %v6942_v53 = vand.u32 4294901760, %v4969_v36  ;;  %v6943_v51 = vand.u32 4294901760, %v4986_v62  ;;  %2342 = vadd.xlane.f32.xlu0 %v2340_v3  ;;  %3764 = vmatprep.subr.bf16.mxu0 %v3763_v15 }
 0x2a7   : > { %v3767_v13 = vpack.c.bf16 %v1257_v12, %v1250_v52  ;;  %v1252_v14 = vand.u32 4294901760, %v1251_v58  ;;  %v1259_v42 = vand.u32 4294901760, %v1258_v18  ;;  %v6944_v45 = vand.u32 4294901760, %v4991_v23 }
 0x2a8   : > { %v1270_v22 = vsub.f32 %v4969_v36, %v6942_v53  ;;  %v1277_v32 = vsub.f32 %v4986_v62, %v6943_v51  ;;  %3664 = vmatprep.subr.bf16.mxu1 %v3663_v57  ;;  %v3667_v4 = vpack.c.bf16 %v1245_v44, %v1238_v40  ;;  %v1265_v47 = vsub.f32 %v5321_v48, %v1264_v54 }
 0x2a9   : > { %v1284_v38 = vsub.f32 %v4991_v23, %v6944_v45  ;;  %v2363_v21 = vshrl.u32 %v5275_v39, 16  ;;  %v2362_v62 = vand.u32 65535, %v5275_v39  ;;  %3666 = vmatpush3.bf16.msra.mxu1 %v3663_v57  ;;  %v5341_v52 = vpack.c.bf16 %v5081_v43, %v5076_v9  ;;  %3766 = vmatpush3.bf16.msra.mxu0 %v3763_v15 }
 0x2aa   : > { %v1271_v59 = vand.u32 4294901760, %v1270_v22  ;;  %v1278_v36 = vand.u32 4294901760, %v1277_v32  ;;  %3668 = vmatprep.subr.bf16.mxu1 %v3667_v4  ;;  %v3671_v23 = vpack.c.bf16 %v1259_v42, %v1252_v14  ;;  %v1266_v3 = vand.u32 4294901760, %v1265_v47  ;;  %2356 = vadd.xlane.f32.xlu1 %v2353_v35 }
 0x2ab   : > { %v1285_v41 = vand.u32 4294901760, %v1284_v38  ;;  %3768 = vmatprep.subr.bf16.mxu0 %v3767_v13  ;;  %v5345_v18 = vpack.c.bf16 %v5268_v49, %v5260_v25  ;;  %2354 = vadd.xlane.f32.xlu0 %v2352_v19  ;;  %v5349_v9 = vpack.c.bf16 %v5285_v33, %v5280_v1  ;;  %v2365_v43 = vcvt.s32.f32 %v2363_v21 }
 0x2ac   : > { %v1272_v12 = vsub.f32 %v1270_v22, %v1271_v59  ;;  %v1279_v56 = vsub.f32 %v1277_v32, %v1278_v36  ;;  %v3771_v40 = vpack.c.bf16 %v1271_v59, %v1264_v54  ;;  %v2364_v15 = vcvt.s32.f32 %v2362_v62 }
 0x2ad   : > { %v1286_v58 = vsub.f32 %v1284_v38, %v1285_v41  ;;  %3670 = vmatpush3.bf16.msra.mxu1 %v3667_v4  ;;  %3770 = vmatpush3.bf16.msra.mxu0 %v3767_v13  ;;  %v3775_v54 = vpack.c.bf16 %v1285_v41, %v1278_v36  ;;  %v5353_v49 = vpack.c.bf16 %v5299_v2, %v5294_v46  ;;  %v769_v53 = vcvt.f32.s32 %v5031_v50 }
 0x2ae   : > { %v1273_v39 = vand.u32 4294901760, %v1272_v12  ;;  %3672 = vmatprep.subr.bf16.mxu1 %v3671_v23  ;;  %v1280_v35 = vand.u32 4294901760, %v1279_v56  ;;  %2368 = vadd.xlane.f32.xlu1 %v2365_v43  ;;  %v5357_v1 = vpack.c.bf16 %v5309_v30, %v5304_v7  ;;  %v5361_v33 = vpack.c.bf16 %v5017_v31, %v5012_v16 }
 0x2af   : > { %v1287_v44 = vand.u32 4294901760, %v1286_v58  ;;  %3772 = vmatprep.subr.bf16.mxu0 %v3771_v40  ;;  %2366 = vadd.xlane.f32.xlu0 %v2364_v15  ;;  %v5365_v46 = vpack.c.bf16 %v1270_v22, %v5321_v48  ;;  %v5368_v2 = vpack.c.bf16 %v1284_v38, %v1277_v32  ;;  %v755_v7 = vcvt.f32.s32 %v5025_v6 }
 0x2b0   : > { %v3675_v57 = vpack.c.bf16 %v1273_v39, %v1266_v3  ;;  %v783_v16 = vcvt.f32.s32 %v5033_v20  ;;  %v797_v13 = vcvt.f32.s32 %v5041_v28  ;;  %v770_v42 = vshll.u32 %v769_v53, 16  ;;  %v7004_v3 = vld [vmem:[#allocation21_spill] sm:$0xff] }
 0x2b1   : > { %3674 = vmatpush3.bf16.msra.mxu1 %v3671_v23  ;;  %3774 = vmatpush3.bf16.msra.mxu0 %v3771_v40  ;;  %v3679_v25 = vpack.c.bf16 %v1287_v44, %v1280_v35  ;;  %v756_v19 = vshll.u32 %v755_v7, 16  ;;  %v811_v48 = vcvt.f32.s32 %v5043_v55  ;;  %v6945_v22 = vmov 0 }
 0x2b2   : > { %3676 = vmatprep.subr.bf16.mxu1 %v3675_v57  ;;  %3776 = vmatprep.subr.bf16.mxu0 %v3775_v54  ;;  %v784_v45 = vshll.u32 %v783_v16, 16  ;;  %v6947_v50 = vmov 0.0   ;;  %v798_v59 = vshll.u32 %v797_v13, 16  ;;  %v825_v21 = vcvt.f32.s32 %v5052_v61 }
 0x2b3   : > { %v812_v36 = vshll.u32 %v811_v48, 16  ;;  %v839_v23 = vcvt.f32.s32 %v5057_v10  ;;  %v853_v15 = vcvt.f32.s32 %v5062_v29 }
 0x2b5   : > { %3678 = vmatpush3.bf16.msra.mxu1 %v3675_v57  ;;  %3778 = vmatpush3.bf16.msra.mxu0 %v3775_v54  ;;  %v840_v53 = vshll.u32 %v839_v23, 16 }
 0x2b6   : > { %3680 = vmatprep.subr.bf16.mxu1 %v3679_v25  ;;  %3780 = vmatprep.subr.bf16.mxu0 %v4721_v17 }
 0x2b9   : > { %3682 = vmatpush3.bf16.msra.mxu1 %v3679_v25 }
 0x2ba   : > { %3684 = vmatprep.subr.bf16.mxu1 %v5361_v33 }
 0x2f5   : > { %v753_v30 = vpop.xlane.xlu1 %752 }
 0x2f6   : > { %v754_v51 = vcvt.f32.s32 %v753_v30  ;;  %v826_v30 = vshll.u32 %v825_v21, 16 }
 0x2f8   : > { %v757_v31 = vadd.s32 %v756_v19, %v754_v51 }
 0x2f9   : > { %v767_v14 = vpop.xlane.xlu0 %766  ;;  %v781_v32 = vpop.xlane.xlu1 %780 }
 0x2fa   : > { %vm5376_vm2 = vcmp.eq.s32.totalorder %v4199_v8, %v757_v31  ;;  %v768_v6 = vcvt.f32.s32 %v767_v14  ;;  %v782_v38 = vcvt.f32.s32 %v781_v32 }
 0x2fb   : > { %v6946_v22 = vsel %vm5376_vm2, 4294967295, %v6945_v22  ;;  %v2246_v20 = vsel %vm5376_vm2, %v5102_v27, 0.0  ;;  %v3031_v28 = vsel %vm5376_vm2, 1.0, %v6947_v50  ;;  %v2374_v23 = vsel %vm5376_vm2, %v5232_v5, 0 }
 0x2fc   : > { %v771_v4 = vadd.s32 %v770_v42, %v768_v6  ;;  %2254 = vadd.xlane.f32.xlu1 %v2246_v20  ;;  %v5386_v55 = vsub.f32 %v3031_v28, %v3031_v28  ;;  %v785_v47 = vadd.s32 %v784_v45, %v782_v38  ;;  %v854_v6 = vshll.u32 %v853_v15, 16 }
 0x2fd   : > { %v795_v12 = vpop.xlane.xlu0 %794  ;;  %v809_v56 = vpop.xlane.xlu1 %808 }
 0x2fe   : > { %vm5390_vm15 = vcmp.eq.s32.totalorder %v4199_v8, %v771_v4  ;;  %v1099_v41 = vand.u32 4294901760, %v5386_v55  ;;  %vm5397_vm14 = vcmp.eq.s32.totalorder %v4199_v8, %v785_v47  ;;  %v796_v58 = vcvt.f32.s32 %v795_v12 }
 0x2ff   : > { %v2247_v61 = vsel %vm5390_vm15, %v5102_v27, 0.0  ;;  %v3032_v40 = vsel %vm5390_vm15, 1.0, %v6947_v50  ;;  %v810_v39 = vcvt.f32.s32 %v809_v56  ;;  %v2248_v10 = vsel %vm5397_vm14, %v5102_v27, 0.0  ;;  %v7008_v56 = vld [vmem:[#allocation14_spill] sm:$0xff] }
 0x300   : > { %2256 = vadd.xlane.f32.xlu0 %v2247_v61  ;;  %3495 = vmatprep.mubr.f32.mxu0 %v1099_v41  ;;  %v1100_v43 = vsub.f32 %v5386_v55, %v1099_v41  ;;  %v5412_v57 = vsub.f32 %v3032_v40, %v3032_v40  ;;  %v3033_v35 = vsel %vm5397_vm14, 1.0, %v6947_v50  ;;  %v799_v44 = vadd.s32 %v798_v59, %v796_v58 }
 0x301   : > { %2258 = vadd.xlane.f32.xlu1 %v2248_v10  ;;  %v813_v54 = vadd.s32 %v812_v36, %v810_v39  ;;  %v5417_v7 = vsub.f32 %v3033_v35, %v3033_v35  ;;  %v823_v16 = vpop.xlane.xlu0 %822  ;;  %v837_v28 = vpop.xlane.xlu1 %836  ;;  %v2375_v12 = vsel %vm5390_vm15, %v5232_v5, 0 }
 0x302   : > { %v1101_v25 = vand.u32 4294901760, %v1100_v43  ;;  %v1109_v19 = vand.u32 4294901760, %v5412_v57  ;;  %vm5421_vm0 = vcmp.eq.s32.totalorder %v4199_v8, %v799_v44  ;;  %v824_v13 = vcvt.f32.s32 %v823_v16 }
 0x303   : > { %vm5426_vm7 = vcmp.eq.s32.totalorder %v4199_v8, %v813_v54  ;;  %v1119_v31 = vand.u32 4294901760, %v5417_v7  ;;  %v2249_v14 = vsel %vm5421_vm0, %v5102_v27, 0.0  ;;  %v3034_v32 = vsel %vm5421_vm0, 1.0, %v6947_v50  ;;  %v7009_v54 = vld [vmem:[#allocation5_spill] sm:$0xff] }
 0x304   : > { %3327 = vmatprep.mubr.f32.mxu1 %v1101_v25  ;;  %3496 = vmatmul.mubr.f32.gmra.mrb[8].mxu0 %v1109_v19  ;;  %v2250_v42 = vsel %vm5426_vm7, %v5102_v27, 0.0  ;;  %v1110_v48 = vsub.f32 %v5412_v57, %v1109_v19  ;;  %v3035_v38 = vsel %vm5426_vm7, 1.0, %v6947_v50  ;;  %v827_v20 = vadd.s32 %v826_v30, %v824_v13 }
 0x305   : > { %2260 = vadd.xlane.f32.xlu0 %v2249_v14  ;;  %2262 = vadd.xlane.f32.xlu1 %v2250_v42  ;;  %v1120_v45 = vsub.f32 %v5417_v7, %v1119_v31  ;;  %v5445_v59 = vsub.f32 %v3034_v32, %v3034_v32  ;;  %v5447_v47 = vsub.f32 %v3035_v38, %v3035_v38  ;;  %v838_v36 = vcvt.f32.s32 %v837_v28  ;;  %v851_v21 = vpop.xlane.xlu0 %850 }
 0x306   : > { %3498 = vmatprep.mubr.f32.mxu0 %v1119_v31  ;;  %v1111_v4 = vand.u32 4294901760, %v1110_v48  ;;  %vm5456_vm3 = vcmp.eq.s32.totalorder %v4199_v8, %v827_v20  ;;  %v852_v61 = vcvt.f32.s32 %v851_v21  ;;  %v2383_v25 = vshrl.u32 %v2374_v23, 16 }
 0x307   : > { %v1121_v41 = vand.u32 4294901760, %v1120_v45  ;;  %v1129_v40 = vand.u32 4294901760, %v5445_v59  ;;  %v1139_v58 = vand.u32 4294901760, %v5447_v47  ;;  %v841_v39 = vadd.s32 %v840_v53, %v838_v36 }
 0x308   : > { %3328 = vmatmul.mubr.f32.gmra.mrb[8].mxu1 %v1111_v4  ;;  %v2251_v10 = vsel %vm5456_vm3, %v5102_v27, 0.0  ;;  %v3036_v43 = vsel %vm5456_vm3, 1.0, %v6947_v50  ;;  %v855_v15 = vadd.s32 %v854_v6, %v852_v61  ;;  %v2395_v19 = vshrl.u32 %v2375_v12, 16 }
 0x309   : > { %3330 = vmatprep.mubr.f32.mxu1 %v1121_v41  ;;  %2264 = vadd.xlane.f32.xlu0 %v2251_v10  ;;  %v1130_v35 = vsub.f32 %v5445_v59, %v1129_v40  ;;  %v5469_v44 = vsub.f32 %v3036_v43, %v3036_v43  ;;  %vm5472_vm6 = vcmp.eq.s32.totalorder %v4199_v8, %v841_v39  ;;  %v6960_v53 = vmov 0  ;;  %v5495_v32 = vpop.xlane.xlu1 %2230 }
 0x30a   : > { %3499 = vmatmul.mubr.f32.gmra.mrb[10].mxu0 %v1129_v40  ;;  %v1140_v30 = vsub.f32 %v5447_v47, %v1139_v58  ;;  %vm5478_vm11 = vcmp.eq.s32.totalorder %v4199_v8, %v855_v15  ;;  %v2252_v16 = vsel %vm5472_vm6, %v5102_v27, 0.0  ;;  %v3037_v48 = vsel %vm5472_vm6, 1.0, %v6947_v50 }
 0x30b   : > { %3501 = vmatprep.mubr.f32.mxu0 %v1139_v58  ;;  %v6961_v53 = vsel %vm5478_vm11, 4294967295, %v6960_v53  ;;  %v1131_v31 = vand.u32 4294901760, %v1130_v35  ;;  %v1149_v13 = vand.u32 4294901760, %v5469_v44  ;;  %2266 = vadd.xlane.f32.xlu1 %v2252_v16  ;;  %v2253_v14 = vsel %vm5478_vm11, %v5102_v27, 0.0 }
 0x30c   : > { %v1141_v42 = vand.u32 4294901760, %v1140_v30  ;;  %v3038_v6 = vsel %vm5478_vm11, 1.0, %v6947_v50  ;;  %v5497_v45 = vsub.f32 %v3037_v48, %v3037_v48  ;;  %v2385_v27 = vcvt.s32.f32 %v2383_v25 }
 0x30d   : > { %2268 = vadd.xlane.f32.xlu0 %v2253_v14  ;;  %3331 = vmatmul.mubr.f32.gmra.mrb[10].mxu1 %v1131_v31  ;;  %v1150_v38 = vsub.f32 %v5469_v44, %v1149_v13  ;;  %v5500_v20 = vsub.f32 %v3038_v6, %v3038_v6  ;;  %v5502_v28 = vpop.xlane.xlu0 %2232  ;;  %v2397_v4 = vcvt.s32.f32 %v2395_v19  ;;  %v2382_v36 = vand.u32 65535, %v2374_v23 }
 0x30e   : > { %3502 = vmatmul.mubr.f32.gmra.mrb[12].mxu0 %v1149_v13  ;;  %3333 = vmatprep.mubr.f32.mxu1 %v1141_v42  ;;  %v2394_v21 = vand.u32 65535, %v2375_v12  ;;  %v1159_v41 = vand.u32 4294901760, %v5497_v45  ;;  %v2376_v58 = vsel %vm5397_vm14, %v5232_v5, 0  ;;  %v4059_v30 = vmov 1.0  }
 0x30f   : > { %v1151_v61 = vand.u32 4294901760, %v1150_v38  ;;  %v1169_v40 = vand.u32 4294901760, %v5500_v20  ;;  %2388 = vadd.xlane.f32.xlu1 %v2385_v27  ;;  %v5509_v39 = vpop.xlane.xlu1 %2234  ;;  %v2384_v23 = vcvt.s32.f32 %v2382_v36  ;;  %v2407_v35 = vshrl.u32 %v2376_v58, 16 }
 0x310   : > { %3504 = vmatprep.mubr.f32.mxu0 %v1159_v41  ;;  %v1160_v10 = vsub.f32 %v5497_v45, %v1159_v41  ;;  %v2396_v15 = vcvt.s32.f32 %v2394_v21  ;;  %v2406_v16 = vand.u32 65535, %v2376_v58  ;;  %v2377_v31 = vsel %vm5421_vm0, %v5232_v5, 0 }
 0x311   : > { %2400 = vadd.xlane.f32.xlu0 %v2397_v4  ;;  %v1170_v43 = vsub.f32 %v5500_v20, %v1169_v40  ;;  %3334 = vmatmul.mubr.f32.gmra.mrb[12].mxu1 %v1151_v61  ;;  %v5513_v12 = vpop.xlane.xlu0 %2236  ;;  %v2378_v14 = vsel %vm5426_vm7, %v5232_v5, 0  ;;  %v2409_v42 = vcvt.s32.f32 %v2407_v35  ;;  %v2419_v6 = vshrl.u32 %v2377_v31, 16  ;;  %v6962_v35 = vld [vmem:[#allocation29_spill] sm:$0xff] }
 0x312   : > { %3505 = vmatmul.mubr.f32.gmra.mrb[14].mxu0 %v1169_v40  ;;  %v1161_v25 = vand.u32 4294901760, %v1160_v10  ;;  %v2408_v38 = vcvt.s32.f32 %v2406_v16  ;;  %v2431_v27 = vshrl.u32 %v2378_v14, 16  ;;  %v2418_v41 = vand.u32 65535, %v2377_v31 }
 0x313   : > { %3539 = vmatprep.mubr.msk.f32.mxu0 %vm5089_vm12, %v4059_v30  ;;  %v1171_v19 = vand.u32 4294901760, %v1170_v43  ;;  %2386 = vadd.xlane.f32.xlu1 %v2384_v23  ;;  %v2421_v36 = vcvt.s32.f32 %v2419_v6 }
 0x314   : > { %3336 = vmatprep.mubr.f32.mxu1 %v1161_v25  ;;  %v5521_v13 = vpop.xlane.xlu1 %2238  ;;  %v2433_v61 = vcvt.s32.f32 %v2431_v27  ;;  %v2420_v58 = vcvt.s32.f32 %v2418_v41  ;;  %v6963_v25 = vld [vmem:[#allocation39_spill] sm:$0xff]  ;;  %v5587_v41 = vsel %vm5478_vm11, %v5232_v5, 0 }
 0x315   : > { %2398 = vadd.xlane.f32.xlu0 %v2396_v15  ;;  %3337 = vmatmul.mubr.f32.gmra.mrb[14].mxu1 %v1171_v19  ;;  %v5529_v48 = vpop.xlane.xlu0 %2240 }
 0x316   : > { %3540 = vmatmul.mubr.msk.f32.vlgmr.msra.gmra.mrb[0].mxu0 %vm5095_vm4, %v4059_v30  ;;  %3371 = vmatprep.mubr.msk.f32.mxu1 %vm5089_vm12, %v4059_v30 }
 0x317   : > { %3542 = vmatprep.mubr.msk.f32.mxu0 %vm5130_vm1, %v4059_v30  ;;  %2412 = vadd.xlane.f32.xlu1 %v2409_v42 }
 0x318   : > { %3782 = vmatpush3.bf16.msra.mxu0 %v4721_v17  ;;  %v2379_v17 = vsel %vm5456_vm3, %v5232_v5, 0 }
 0x319   : > { %v5538_v4 = vpop.xlane.xlu1 %2242  ;;  %2410 = vadd.xlane.f32.xlu0 %v2408_v38  ;;  %3784 = vmatprep.subr.bf16.mxu0 %v4847_v37  ;;  %v2443_v43 = vshrl.u32 %v2379_v17, 16  ;;  %v2442_v42 = vand.u32 65535, %v2379_v17  ;;  %v6964_v17 = vld [vmem:[#allocation30_spill] sm:$0xff] }
 0x31a   : > { %3372 = vmatmul.mubr.msk.f32.vlgmr.msra.gmra.mrb[0].mxu1 %vm5095_vm4, %v4059_v30  ;;  %3543 = vmatmul.mubr.msk.f32.gmra.mrb[2].mxu0 %vm5141_vm13, %v4059_v30  ;;  %v5547_v21 = vpop.xlane.xlu0 %2244 }
 0x31b   : > { %3686 = vmatpush3.bf16.msra.mxu1 %v5361_v33  ;;  %3374 = vmatprep.mubr.msk.f32.mxu1 %vm5130_vm1, %v4059_v30  ;;  %v2430_v33 = vand.u32 65535, %v2378_v14  ;;  %v2445_v31 = vcvt.s32.f32 %v2443_v43 }
 0x31c   : > { %2424 = vadd.xlane.f32.xlu1 %v2421_v36  ;;  %3545 = vmatprep.mubr.msk.f32.mxu0 %vm5163_vm9, %v4059_v30 }
 0x31d   : > { %3786 = vmatpush3.bf16.msra.mxu0 %v4847_v37  ;;  %v2285_v40 = vpop.xlane.xlu1 %2284  ;;  %3688 = vmatprep.subr.bf16.mxu1 %v5341_v52  ;;  %v2380_v37 = vsel %vm5472_vm6, %v5232_v5, 0  ;;  %v2432_v19 = vcvt.s32.f32 %v2430_v33 }
 0x31e   : > { %2436 = vadd.xlane.f32.xlu0 %v2433_v61  ;;  %3375 = vmatmul.mubr.msk.f32.gmra.mrb[2].mxu1 %vm5141_vm13, %v4059_v30  ;;  %v2297_v10 = vpop.xlane.xlu0 %2296  ;;  %v2287_v15 = vcvt.f32.s32 %v2285_v40  ;;  %v2455_v6 = vshrl.u32 %v2380_v37, 16 }
 0x31f   : > { %3690 = vmatpush3.bf16.msra.mxu1 %v5341_v52  ;;  %3546 = vmatmul.mubr.msk.f32.gmra.mrb[4].mxu0 %vm5171_vm8, %v4059_v30  ;;  %v2299_v23 = vcvt.f32.s32 %v2297_v10 }
 0x320   : > { %2422 = vadd.xlane.f32.xlu1 %v2420_v58  ;;  %3788 = vmatprep.subr.bf16.mxu0 %v6962_v35  ;;  %v2288_v36 = vshll.u32 %v2287_v15, 16  ;;  %v2444_v58 = vcvt.s32.f32 %v2442_v42  ;;  %v2457_v10 = vcvt.s32.f32 %v2455_v6  ;;  %v2454_v15 = vand.u32 65535, %v2380_v37  ;;  %v6965_v37 = vld [vmem:[#allocation31_spill] sm:$0xff] }
 0x321   : > { %3377 = vmatprep.mubr.msk.f32.mxu1 %vm5163_vm9, %v4059_v30  ;;  %3548 = vmatprep.mubr.msk.f32.mxu0 %vm5191_vm5, %v4059_v30  ;;  %v2283_v52 = vpop.xlane.xlu1 %2282  ;;  %v2300_v38 = vshll.u32 %v2299_v23, 16 }
 0x322   : > { %3790 = vmatpush3.bf16.msra.mxu0 %v6962_v35  ;;  %v2286_v16 = vcvt.f32.s32 %v2283_v52  ;;  %3692 = vmatprep.subr.bf16.mxu1 %v5345_v18  ;;  %v2295_v14 = vpop.xlane.xlu0 %2294  ;;  %v2467_v35 = vshrl.u32 %v5587_v41, 16  ;;  %v2456_v42 = vcvt.s32.f32 %v2454_v15  ;;  %v6988_v15 = vld [vmem:[#allocation35_spill] sm:$0xff] }
 0x323   : > { %2434 = vadd.xlane.f32.xlu0 %v2432_v19  ;;  %3378 = vmatmul.mubr.msk.f32.gmra.mrb[4].mxu1 %vm5171_vm8, %v4059_v30  ;;  %v2298_v27 = vcvt.f32.s32 %v2295_v14  ;;  %vm6966_vm8 = vmmov 1  }
 0x324   : > { %2448 = vadd.xlane.f32.xlu1 %v2445_v31  ;;  %3694 = vmatpush3.bf16.msra.mxu1 %v5345_v18  ;;  %v5595_v33 = vadd.s32 %v2288_v36, %v2286_v16  ;;  %vm2727_vm9 = vmxor %vm5095_vm4, %vm6966_vm8  ;;  %v6973_v36 = vld [vmem:[#allocation32_spill] sm:$0xff] }
 0x325   : > { %3549 = vmatmul.mubr.msk.f32.gmra.mrb[6].mxu0 %vm5200_vm10, %v4059_v30  ;;  %3792 = vmatprep.subr.bf16.mxu0 %v6964_v17  ;;  %v5593_v61 = vadd.s32 %v2300_v38, %v2298_v27  ;;  %vm2726_vm4 = vmxor %vm5089_vm12, %vm6966_vm8 }
 0x326   : > { %v2309_v40 = vpop.xlane.xlu1 %2308  ;;  %3380 = vmatprep.mubr.msk.f32.mxu1 %vm5191_vm5, %v4059_v30  ;;  %3551 = vmatprep.mubr.msk.f32.mxu0 %vm5376_vm2, %v4059_v30 }
 0x327   : > { %v2311_v18 = vcvt.f32.s32 %v2309_v40  ;;  %v2307_v43 = vpop.xlane.xlu0 %2306  ;;  %3794 = vmatpush3.bf16.msra.mxu0 %v6964_v17  ;;  %3696 = vmatprep.subr.bf16.mxu1 %v5349_v9  ;;  %vm6968_vm5 = vcmp.eq.s32.totalorder %v5593_v61, %v5232_v5  ;;  %v6976_v40 = vmov 0 }
 0x328   : > { %v2310_v23 = vcvt.f32.s32 %v2307_v43  ;;  %2446 = vadd.xlane.f32.xlu0 %v2444_v58  ;;  %2460 = vadd.xlane.f32.xlu1 %v2457_v10  ;;  %v6978_v58 = vld [vmem:[#allocation33_spill] sm:$0xff]  ;;  %v6983_v10 = vld [vmem:[#allocation34_spill] sm:$0xff] }
 0x329   : > { %v2312_v52 = vshll.u32 %v2311_v18, 16  ;;  %3381 = vmatmul.mubr.msk.f32.gmra.mrb[6].mxu1 %vm5200_vm10, %v4059_v30  ;;  %3552 = vmatmul.mubr.msk.f32.gmra.mrb[8].mxu0 %vm5390_vm15, %v4059_v30  ;;  %vm2735_vm10 = vmand %vm2727_vm9, %vm6968_vm5  ;;  %vm6970_vm9 = vcmp.lt.s32.totalorder %v4199_v8, 8 }
 0x32a   : > { %v2321_v19 = vpop.xlane.xlu1 %2320  ;;  %3698 = vmatpush3.bf16.msra.mxu1 %v5349_v9  ;;  %3796 = vmatprep.subr.bf16.mxu0 %v6965_v37  ;;  %v2469_v9 = vcvt.s32.f32 %v2467_v35  ;;  %vm5648_vm5 = vmand %vm2735_vm10, %vm6970_vm9  ;;  %v6991_v35 = vld [vmem:[#allocation37_spill] sm:$0xff] }
 0x32b   : > { %v2323_v16 = vcvt.f32.s32 %v2321_v19  ;;  %v2319_v31 = vpop.xlane.xlu0 %2318  ;;  %v5621_v14 = vadd.s32 %v2312_v52, %v2310_v23  ;;  %3383 = vmatprep.mubr.msk.f32.mxu1 %vm5376_vm2, %v4059_v30  ;;  %3554 = vmatprep.mubr.msk.f32.mxu0 %vm5397_vm14, %v4059_v30  ;;  %vm6969_vm2 = vcmp.eq.s32.totalorder %v5595_v33, %v5232_v5  ;;  %v7001_v52 = vld [vmem:[#allocation43_spill] sm:$0xff] }
 0x32c   : > { %v2322_v6 = vcvt.f32.s32 %v2319_v31  ;;  %3798 = vmatpush3.bf16.msra.mxu0 %v6965_v37  ;;  %3700 = vmatprep.subr.bf16.mxu1 %v5353_v49  ;;  %vm2734_vm11 = vmand %vm2726_vm4, %vm6969_vm2 }
 0x32d   : > { %6967 = vst [vmem:[#allocation29_spill] sm:$0xff] %v5621_v14  ;;  %v2324_v38 = vshll.u32 %v2323_v16, 16  ;;  %2458 = vadd.xlane.f32.xlu0 %v2456_v42  ;;  %2472 = vadd.xlane.f32.xlu1 %v2469_v9  ;;  %vm6828_vm12 = vcmp.eq.s32.totalorder %v5621_v14, %v5232_v5  ;;  %vm6975_vm4 = vmmov %vm6970_vm9  ;;  %v7014_v9 = vld [vmem:[#allocation7_spill] sm:$0xff] }
 0x32e   : > { %3384 = vmatmul.mubr.msk.f32.gmra.mrb[8].mxu1 %vm5390_vm15, %v4059_v30  ;;  %3555 = vmatmul.mubr.msk.f32.gmra.mrb[10].mxu0 %vm5421_vm0, %v4059_v30  ;;  %vm5666_vm10 = vmand %vm2734_vm11, %vm6975_vm4 }
 0x32f   : > { %3702 = vmatpush3.bf16.msra.mxu1 %v5353_v49  ;;  %3800 = vmatprep.subr.bf16.mxu0 %v6973_v36  ;;  %v5656_v17 = vadd.s32 %v2324_v38, %v2322_v6  ;;  %v6977_v40 = vsel %vm5666_vm10, 4294967295, %v6976_v40  ;;  %v2775_v49 = vsel %vm5648_vm5, 1.0, %v6947_v50  ;;  %vm2728_vm2 = vmxor %vm5130_vm1, %vm6966_vm8  ;;  %v2774_v18 = vsel %vm5666_vm10, 1.0, %v6947_v50  ;;  %v7015_v38 = vld [vmem:[#allocation25_spill] sm:$0xff] }
 0x330   : > { %3386 = vmatprep.mubr.msk.f32.mxu1 %vm5397_vm14, %v4059_v30  ;;  %3557 = vmatprep.mubr.msk.f32.mxu0 %vm5426_vm7, %v4059_v30  ;;  %vm2736_vm11 = vmand %vm2728_vm2, %vm6828_vm12  ;;  %vm6979_vm2 = vcmp.lt.s32.totalorder %v4199_v8, 8 }
 0x331   : > { %6974 = vst [vmem:[#allocation39_spill] sm:$0xff] %v5656_v17  ;;  %3802 = vmatpush3.bf16.msra.mxu0 %v6973_v36  ;;  %3704 = vmatprep.subr.bf16.mxu1 %v5357_v1  ;;  %vm6835_vm9 = vcmp.eq.s32.totalorder %v5656_v17, %v5232_v5  ;;  %vm2729_vm4 = vmxor %vm5141_vm13, %vm6966_vm8  ;;  %vm6982_vm8 = vnez %v6961_v53  ;;  %v7010_v53 = vld [vmem:[#allocation24_spill] sm:$0xff] }
 0x332   : > { %2784 = vmax.xlane.f32.xlu1 %v2775_v49  ;;  %3387 = vmatmul.mubr.msk.f32.gmra.mrb[10].mxu1 %vm5421_vm0, %v4059_v30  ;;  %vm5705_vm12 = vmand %vm2736_vm11, %vm6979_vm2  ;;  %v7016_v36 = vld [vmem:[#allocation16_spill] sm:$0xff] }
 0x333   : > { %3706 = vmatpush3.bf16.msra.mxu1 %v5357_v1  ;;  %3558 = vmatmul.mubr.msk.f32.gmra.mrb[12].mxu0 %vm5456_vm3, %v4059_v30  ;;  %vm2737_vm10 = vmand %vm2729_vm4, %vm6835_vm9  ;;  %v2776_v43 = vsel %vm5705_vm12, 1.0, %v6947_v50  ;;  %v868_v49 = vsub.f32 %v7016_v36, %v7015_v38 }
 0x334   : > { %3804 = vmatprep.subr.bf16.mxu0 %v6978_v58  ;;  %2782 = vmax.xlane.f32.xlu0 %v2774_v18  ;;  %vm6984_vm11 = vmmov %vm6979_vm2  ;;  %vm6987_vm2 = vnez %v6907_v63  ;;  %v6990_v63 = vld [vmem:[#allocation36_spill] sm:$0xff] }
 0x335   : > { %3389 = vmatprep.mubr.msk.f32.mxu1 %vm5426_vm7, %v4059_v30  ;;  %3560 = vmatprep.mubr.msk.f32.mxu0 %vm5472_vm6, %v4059_v30  ;;  %vm5730_vm4 = vmand %vm2737_vm10, %vm6984_vm11  ;;  %vm6989_vm10 = vnez %v6909_v34  ;;  %vm6992_vm11 = vnez %v6918_v26  ;;  %v6994_v34 = vld [vmem:[#allocation40_spill] sm:$0xff] }
 0x336   : > { %3806 = vmatpush3.bf16.msra.mxu0 %v6978_v58  ;;  %3708 = vmatprep.subr.bf16.mxu1 %v5365_v46 }
 0x337   : > { %3390 = vmatmul.mubr.msk.f32.gmra.mrb[12].mxu1 %vm5456_vm3, %v4059_v30  ;;  %3561 = vmatmul.mubr.msk.f32.gmra.mrb[14].mxu0 %vm6982_vm8, %v4059_v30 }
 0x338   : > { %3710 = vmatpush3.bf16.msra.mxu1 %v5365_v46  ;;  %3808 = vmatprep.subr.bf16.mxu0 %v6983_v10  ;;  %v2777_v46 = vsel %vm5730_vm4, 1.0, %v6947_v50 }
 0x339   : > { %2786 = vmax.xlane.f32.xlu1 %v2776_v43  ;;  %3392 = vmatprep.mubr.msk.f32.mxu1 %vm5472_vm6, %v4059_v30 }
 0x33a   : > { %3810 = vmatpush3.bf16.msra.mxu0 %v6983_v10  ;;  %3595 = vmatprep.mubr.msk.f32.mxu0 %vm6987_vm2, %v4059_v30  ;;  %vm6995_vm2 = vnez %v6921_v0  ;;  %v7017_v10 = vld [vmem:[#allocation8_spill] sm:$0xff] }
 0x33b   : > { %3712 = vmatprep.subr.bf16.mxu1 %v5368_v2  ;;  %3393 = vmatmul.mubr.msk.f32.gmra.mrb[14].mxu1 %vm6982_vm8, %v4059_v30 }
 0x33c   : > { %3714 = vmatpush3.bf16.msra.mxu1 %v5368_v2  ;;  %3427 = vmatprep.mubr.f32.mxu1 %v6988_v15  ;;  %v6993_v2 = vld [vmem:[#allocation38_spill] sm:$0xff] }
 0x33d   : > { %3596 = vmatmul.mubr.msk.f32.vlgmr.msra.gmra.mrb[0].mxu0 %vm6989_vm10, %v4059_v30  ;;  %2788 = vmax.xlane.f32.xlu1 %v2777_v46  ;;  %vm7000_vm10 = vnez %v6946_v22  ;;  %v7002_v22 = vld [vmem:[#allocation22_spill] sm:$0xff] }
 0x33e   : > { %3598 = vmatprep.mubr.msk.f32.mxu0 %vm5130_vm1, %v4059_v30  ;;  %vm6996_vm1 = vnez %v6963_v25 }
 0x33f   : > { %3428 = vmatmul.mubr.f32.vlgmr.msra.gmra.mrb[0].mxu1 %v6990_v63  ;;  %v876_v63 = vadd.f32 0.2, %v868_v49 }
 0x340   : > { %3430 = vmatprep.mubr.f32.mxu1 %v6991_v35 }
 0x341   : > { %3599 = vmatmul.mubr.msk.f32.gmra.mrb[2].mxu0 %vm5141_vm13, %v4059_v30  ;;  %vm6999_vm13 = vnez %v6927_v11 }
 0x342   : > { %3601 = vmatprep.mubr.msk.f32.mxu0 %vm6992_vm11, %v4059_v30 }
 0x343   : > { %3431 = vmatmul.mubr.f32.gmra.mrb[2].mxu1 %v6993_v2 }
 0x344   : > { %3433 = vmatprep.mubr.f32.mxu1 %v6994_v34 }
 0x345   : > { %3602 = vmatmul.mubr.msk.f32.gmra.mrb[4].mxu0 %vm6995_vm2, %v4059_v30 }
 0x346   : > { %3604 = vmatprep.mubr.msk.f32.mxu0 %vm6996_vm1, %v4059_v30 }
 0x347   : > { %3434 = vmatmul.mubr.f32.gmra.mrb[4].mxu1 %v6997_v60  ;;  %v7020_v60 = vld [vmem:[#allocation9_spill] sm:$0xff] }
 0x348   : > { %3436 = vmatprep.mubr.f32.mxu1 %v6998_v24 }
 0x349   : > { %3605 = vmatmul.mubr.msk.f32.gmra.mrb[6].mxu0 %vm6999_vm13, %v4059_v30 }
 0x34a   : > { %3607 = vmatprep.mubr.msk.f32.mxu0 %vm7000_vm10, %v4059_v30 }
 0x34b   : > { %3437 = vmatmul.mubr.f32.gmra.mrb[6].mxu1 %v7001_v52  ;;  %v5839_v52 = vpop.xlane.xlu1 %2332 }
 0x34c   : > { %3439 = vmatprep.mubr.f32.mxu1 %v5386_v55  ;;  %v7003_v55 = vld [vmem:[#allocation15_spill] sm:$0xff] }
 0x34d   : > { %3608 = vmatmul.mubr.msk.f32.gmra.mrb[8].mxu0 %vm5390_vm15, %v4059_v30  ;;  %v865_v62 = vsub.f32 %v7003_v55, %v7002_v22  ;;  %vm262_vm15 = vcmp.lt.s32.totalorder %v7009_v54, 8  ;;  %v884_v55 = vmax.f32 %v876_v63, 0.0 }
 0x34e   : > { %3610 = vmatprep.mubr.msk.f32.mxu0 %vm5397_vm14, %v4059_v30  ;;  %v5821_v31 = vsel %vm262_vm15, 1.0, %v6947_v50  ;;  %vm265_vm14 = vcmp.lt.s32.totalorder %v7017_v10, 8 }
 0x34f   : > { %3440 = vmatmul.mubr.f32.gmra.mrb[8].mxu1 %v5412_v57  ;;  %v7005_v57 = vld [vmem:[#allocation13_spill] sm:$0xff]  ;;  %v873_v51 = vadd.f32 0.2, %v865_v62  ;;  %7013 = vst [vmem:[#allocation31_spill] sm:$0xff] %v5821_v31  ;;  %v5834_v35 = vsel %vm265_vm14, 1.0, %v6947_v50 }
 0x350   : > { %3442 = vmatprep.mubr.f32.mxu1 %v5417_v7  ;;  %v864_v7 = vsub.f32 %v7005_v57, %v7004_v3  ;;  %7019 = vst [vmem:[#allocation33_spill] sm:$0xff] %v5834_v35  ;;  %v7022_v57 = vld [vmem:[#allocation26_spill] sm:$0xff] }
 0x351   : > { %3611 = vmatmul.mubr.msk.f32.gmra.mrb[10].mxu0 %vm5421_vm0, %v4059_v30  ;;  %vm6844_vm0 = vcmask 7168  }
 0x352   : > { %3613 = vmatprep.mubr.msk.f32.mxu0 %vm5426_vm7, %v4059_v30  ;;  %v872_v29 = vadd.f32 0.2, %v864_v7  ;;  %vm266_vm7 = vcmp.lt.s32.totalorder %v7020_v60, 8  ;;  %v7023_v7 = vld [vmem:[#allocation19_spill] sm:$0xff] }
 0x353   : > { %3443 = vmatmul.mubr.f32.gmra.mrb[10].mxu1 %v5445_v59  ;;  %v7006_v59 = vld [vmem:[#allocation6_spill] sm:$0xff]  ;;  %v5843_v3 = vsel %vm266_vm7, 1.0, %v6947_v50 }
 0x354   : > { %3445 = vmatprep.mubr.f32.mxu1 %v5447_v47  ;;  %v7007_v47 = vld [vmem:[#allocation23_spill] sm:$0xff]  ;;  %v880_v37 = vmax.f32 %v872_v29, 0.0  ;;  %7021 = vst [vmem:[#allocation34_spill] sm:$0xff] %v5843_v3 }
 0x355   : > { %3614 = vmatmul.mubr.msk.f32.gmra.mrb[12].mxu0 %vm5456_vm3, %v4059_v30 }
 0x356   : > { %3616 = vmatprep.mubr.msk.f32.mxu0 %vm5472_vm6, %v4059_v30  ;;  %vm263_vm6 = vcmp.lt.s32.totalorder %v7006_v59, 8  ;;  %v2878_v18 = vmul.f32 %v5821_v31, %v880_v37 }
 0x357   : > { %3446 = vmatmul.mubr.f32.gmra.mrb[12].mxu1 %v5469_v44  ;;  %v866_v44 = vsub.f32 %v7008_v56, %v7007_v47  ;;  %v7024_v47 = vld [vmem:[#allocation10_spill] sm:$0xff]  ;;  %v7025_v56 = vld [vmem:[#allocation27_spill] sm:$0xff] }
 0x358   : > { %3448 = vmatprep.mubr.f32.mxu1 %v5497_v45  ;;  %v881_v45 = vmax.f32 %v873_v51, 0.0  ;;  %v2887_v2 = vsel %vm6844_vm0, %v2878_v18, 0.0  ;;  %v869_v51 = vsub.f32 %v7023_v7, %v7022_v57  ;;  %vm267_vm3 = vcmp.lt.s32.totalorder %v7024_v47, 8 }
 0x359   : > { %3617 = vmatmul.mubr.msk.f32.gmra.mrb[14].mxu0 %vm6982_vm8, %v4059_v30  ;;  %v7011_v30 = vld [vmem:[#allocation17_spill] sm:$0xff]  ;;  %v874_v16 = vadd.f32 0.2, %v866_v44  ;;  %vm264_vm8 = vcmp.lt.s32.totalorder %v7014_v9, 8  ;;  %v7026_v44 = vld [vmem:[#allocation18_spill] sm:$0xff]  ;;  %v2882_v9 = vmul.f32 %v5843_v3, %v884_v55  ;;  %v5858_v49 = vsel %vm267_vm3, 1.0, %v6947_v50 }
 0x35a   : > { %v867_v19 = vsub.f32 %v7011_v30, %v7010_v53  ;;  %v5830_v43 = vsel %vm264_vm8, 1.0, %v6947_v50  ;;  %v870_v54 = vsub.f32 %v7026_v44, %v7025_v56  ;;  %7029 = vst [vmem:[#allocation35_spill] sm:$0xff] %v5858_v49  ;;  %v5860_v18 = vadd.f32 0.2, %v869_v51 }
 0x35b   : > { %3449 = vmatmul.mubr.f32.gmra.mrb[14].mxu1 %v5500_v20  ;;  %v5818_v20 = vsel %vm263_vm6, 1.0, %v6947_v50  ;;  %v882_v58 = vmax.f32 %v874_v16, 0.0  ;;  %7018 = vst [vmem:[#allocation32_spill] sm:$0xff] %v5830_v43  ;;  %v5886_v51 = vsel %vm6844_vm0, %v2882_v9, 0.0 }
 0x35c   : > { %7012 = vst [vmem:[#allocation30_spill] sm:$0xff] %v5818_v20  ;;  %v2879_v42 = vmul.f32 %v5818_v20, %v881_v45  ;;  %v875_v6 = vadd.f32 0.2, %v867_v19  ;;  %v5851_v45 = vpop.xlane.xlu0 %2330  ;;  %v7027_v19 = vld [vmem:[#allocation11_spill] sm:$0xff] }
 0x35d   : > { %v2880_v34 = vmul.f32 %v5830_v43, %v882_v58  ;;  %vm268_vm10 = vcmp.lt.s32.totalorder %v7027_v19, 8  ;;  %v5865_v58 = vld [vmem:[%s6741_s3] ss:$0 sm:$0xff] }
 0x35e   : > { %v2888_v46 = vsel %vm6844_vm0, %v2879_v42, 0.0  ;;  %v883_v15 = vmax.f32 %v875_v6, 0.0  ;;  %v7028_v6 = vld [vmem:[#allocation12_spill] sm:$0xff]  ;;  %v2479_v10 = vadd.f32 %v5865_v58, %v5502_v28  ;;  %v2478_v60 = vadd.f32 %v5865_v58, %v5495_v32 }
 0x35f   : > { %v2889_v24 = vadd.f32 %v2888_v46, %v2887_v2  ;;  %v2890_v59 = vsel %vm6844_vm0, %v2880_v34, 0.0  ;;  %vm269_vm6 = vcmp.lt.s32.totalorder %v7028_v6, 8  ;;  %v5869_v46 = vpop.xlane.xlu1 %2344  ;;  %v5872_v2 = vsel %vm268_vm10, 1.0, %v6947_v50 }
 0x360   : > { %v2881_v22 = vmul.f32 %v5834_v35, %v883_v15  ;;  %v5874_v34 = vadd.f32 0.2, %v870_v54  ;;  %v5883_v28 = vsel %vm269_vm6, 1.0, %v6947_v50  ;;  %v5890_v56 = vpop.xlane.xlu0 %2342  ;;  %v2480_v9 = vadd.f32 %v5865_v58, %v5509_v39 }
 0x361   : > { %v2891_v30 = vadd.f32 %v2890_v59, %v2889_v24  ;;  %v7031_v59 = vld [vmem:[#allocation20_spill] sm:$0xff] }
 0x362   : > { %v2892_v42 = vsel %vm6844_vm0, %v2881_v22, 0.0  ;;  %v7045_v25 = vmax.f32 %v5874_v34, 0.0 }
 0x363   : > { %v5878_v55 = vadd.f32 %v2892_v42, %v2891_v30  ;;  %v2481_v30 = vadd.f32 %v5865_v58, %v5513_v12 }
 0x410   : > { %v3597_v62 = vpop.f32.mrb[0].mxu0 }
 0x411   : > { %v2128_v29 = vpop.f32.mrb[1].mxu0 }
 0x412   : > { %v3429_v53 = vpop.f32.mrb[0].mxu1 }
 0x413   : > { %v3811_v37 = vadd.f32 %v3597_v62, %v3429_v53  ;;  %v1518_v16 = vpop.f32.mrb[1].mxu1 }
 0x414   : > { %v3600_v38 = vpop.f32.mrb[2].mxu0  ;;  %v3812_v36 = vadd.f32 %v2128_v29, %v1518_v16  ;;  %v7030_v29 = vld [vmem:[#allocation28_spill] sm:$0xff] }
 0x415   : > { %v2487_v15 = vmul.f32 2.0, %v3811_v37  ;;  %v2140_v63 = vpop.f32.mrb[3].mxu0  ;;  %v871_v47 = vsub.f32 %v7031_v59, %v7030_v29  ;;  %v5923_v59 = vadd.f32 %v5865_v58, %v5521_v13 }
 0x416   : > { %v2486_v24 = vmul.f32 2.0, %v3812_v36  ;;  %v3432_v22 = vpop.f32.mrb[2].mxu1 }
 0x417   : > { %v2495_v62 = vsub.f32 %v2479_v10, %v2487_v15  ;;  %v3813_v57 = vadd.f32 %v3600_v38, %v3432_v22  ;;  %v1532_v7 = vpop.f32.mrb[3].mxu1  ;;  %v5904_v10 = vadd.f32 %v5865_v58, %v5529_v48  ;;  %v5906_v15 = vpop.xlane.xlu1 %2356  ;;  %v2335_v48 = vcvt.f32.s32 %v5839_v52 }
 0x418   : > { %v2494_v32 = vsub.f32 %v2478_v60, %v2486_v24  ;;  %v3603_v44 = vpop.f32.mrb[4].mxu0  ;;  %v3814_v54 = vadd.f32 %v2140_v63, %v1532_v7  ;;  %v5940_v13 = vadd.f32 0.2, %v871_v47  ;;  %v5950_v47 = vadd.f32 %v5865_v58, %v5538_v4 }
 0x419   : > { %v5895_v19 = vmax.f32 %v2495_v62, 0.0  ;;  %v2489_v37 = vmul.f32 2.0, %v3813_v57  ;;  %v2152_v16 = vpop.f32.mrb[5].mxu0  ;;  %v5967_v4 = vadd.f32 %v5886_v51, %v5878_v55 }
 0x41a   : > { %v5900_v6 = vmax.f32 %v2494_v32, 0.0  ;;  %v2488_v38 = vmul.f32 2.0, %v3814_v54  ;;  %v3435_v36 = vpop.f32.mrb[4].mxu1  ;;  %v2334_v32 = vcvt.f32.s32 %v5851_v45 }
 0x41b   : > { %v2497_v12 = vsub.f32 %v2481_v30, %v2489_v37  ;;  %v3815_v63 = vadd.f32 %v3603_v44, %v3435_v36  ;;  %v1546_v60 = vpop.f32.mrb[5].mxu1  ;;  %vm2511_vm15 = vcmp.eq.f32.partialorder %v5895_v19, 0.0  ;;  %v5926_v44 = vpop.xlane.xlu0 %2354 }
 0x41c   : > { %v2496_v24 = vsub.f32 %v2480_v9, %v2488_v38  ;;  %v3606_v22 = vpop.f32.mrb[6].mxu0  ;;  %v3816_v62 = vadd.f32 %v2152_v16, %v1546_v60  ;;  %v5912_v39 = vsel %vm2511_vm15, 1.0, %v5895_v19  ;;  %vm2510_vm8 = vcmp.eq.f32.partialorder %v5900_v6, 0.0  ;;  %v2369_v60 = vpop.xlane.xlu1 %2368 }
 0x41d   : > { %v5916_v57 = vmax.f32 %v2497_v12, 0.0  ;;  %v5918_v7 = vmul.f32 2.0, %v3815_v63  ;;  %v2164_v29 = vpop.f32.mrb[7].mxu0  ;;  %3956 = vrsqrt.f32 %v5912_v39  ;;  %v5937_v38 = vsel %vm2510_vm8, 1.0, %v5900_v6 }
 0x41e   : > { %v5928_v54 = vmax.f32 %v2496_v24, 0.0  ;;  %v5930_v30 = vmul.f32 2.0, %v3816_v62  ;;  %v3438_v52 = vpop.f32.mrb[6].mxu1  ;;  %3958 = vrsqrt.f32 %v5937_v38  ;;  %v2336_v63 = vshll.u32 %v2335_v48, 16 }
 0x41f   : > { %v2499_v37 = vsub.f32 %v5904_v10, %v5918_v7  ;;  %v3817_v16 = vadd.f32 %v3606_v22, %v3438_v52  ;;  %v1560_v9 = vpop.f32.mrb[7].mxu1  ;;  %vm2513_vm14 = vcmp.eq.f32.partialorder %v5916_v57, 0.0  ;;  %v2485_v10 = vadd.f32 %v5865_v58, %v5547_v21 }
 0x420   : > { %v3609_v36 = vpop.f32.mrb[8].mxu0  ;;  %v3818_v12 = vadd.f32 %v2164_v29, %v1560_v9  ;;  %v2466_v62 = vand.u32 65535, %v5587_v41  ;;  %v5957_v29 = vsel %vm2513_vm14, 1.0, %v5916_v57  ;;  %vm6843_vm7 = vcmp.eq.f32.partialorder %v5928_v54, 0.0 }
 0x421   : > { %v2493_v24 = vmul.f32 2.0, %v3817_v16  ;;  %v2176_v22 = vpop.f32.mrb[9].mxu0  ;;  %v5960_v21 = vadd.s32 %v2336_v63, %v2334_v32  ;;  %3960 = vrsqrt.f32 %v5957_v29  ;;  %v2371_v9 = vcvt.f32.s32 %v2369_v60 }
 0x422   : > { %v5952_v7 = vmul.f32 2.0, %v3818_v12  ;;  %v3441_v52 = vpop.f32.mrb[8].mxu1  ;;  %v2367_v12 = vpop.xlane.xlu0 %2366  ;;  %v7032_v32 = vmax.f32 %v5860_v18, 0.0  ;;  %v5984_v55 = vsel %vm6843_vm7, 1.0, %v5928_v54  ;;  %v2359_v60 = vcvt.f32.s32 %v5906_v15 }
 0x423   : > { %v2501_v48 = vsub.f32 %v2485_v10, %v2493_v24  ;;  %v5962_v16 = vadd.f32 %v3609_v36, %v3441_v52  ;;  %v1574_v41 = vpop.f32.mrb[9].mxu1  ;;  %v5988_v52 = vcvt.s32.f32 %v2466_v62  ;;  %3962 = vrsqrt.f32 %v5984_v55 }
 0x424   : > { %v3612_v45 = vpop.f32.mrb[10].mxu0  ;;  %v5971_v53 = vadd.f32 %v2176_v22, %v1574_v41  ;;  %v5976_v36 = vmul.f32 %v5858_v49, %v7032_v32  ;;  %v2358_v41 = vcvt.f32.s32 %v5926_v44  ;;  %v2370_v32 = vcvt.f32.s32 %v2367_v12 }
 0x425   : > { %v5979_v63 = vmax.f32 %v2501_v48, 0.0  ;;  %v2188_v24 = vpop.f32.mrb[11].mxu0  ;;  %v5994_v48 = vld [vmem:[%s6739_s1] ss:$0 sm:$0xff]  ;;  %v2372_v51 = vshll.u32 %v2371_v9, 16  ;;  %v6005_v3 = vmax.f32 %v2499_v37, 0.0 }
 0x426   : > { %v3444_v22 = vpop.f32.mrb[10].mxu1  ;;  %vm6848_vm3 = vcmp.eq.s32.totalorder %v5960_v21, %v5994_v48  ;;  %vm2535_vm6 = vcmp.eq.f32.partialorder %v5912_v39, inf  ;;  %v2538_v43 = vand.u32 2147483648, %v5912_v39  ;;  %v2360_v9 = vshll.u32 %v2359_v60, 16 }
 0x427   : > { %v3957_v18 = vpop.eup %3956  ;;  %v5999_v10 = vadd.f32 %v3612_v45, %v3444_v22  ;;  %v1588_v15 = vpop.f32.mrb[11].mxu1  ;;  %vm6842_vm10 = vcmp.eq.f32.partialorder %v5979_v63, 0.0  ;;  %vm2537_vm9 = vcmp.eq.f32.partialorder %v5912_v39, 0.0  ;;  %v6017_v37 = vadd.s32 %v2372_v51, %v2370_v32 }
 0x428   : > { %v3615_v62 = vpop.f32.mrb[12].mxu0  ;;  %v6001_v42 = vadd.f32 %v2188_v24, %v1588_v15  ;;  %v2534_v49 = vmul.f32 %v3957_v18, %v5912_v39  ;;  %v6012_v44 = vsel %vm6842_vm10, 1.0, %v5979_v63  ;;  %v3959_v45 = vpop.eup %3958  ;;  %vm2515_vm10 = vcmp.eq.f32.partialorder %v6005_v3, 0.0 }
 0x429   : > { %v2200_v35 = vpop.f32.mrb[13].mxu0  ;;  %3964 = vrsqrt.f32 %v6012_v44  ;;  %v2527_v14 = vmul.f32 %v3959_v45, %v5937_v38  ;;  %vm7033_vm7 = vmmov 1   ;;  %v6057_v6 = vsel %vm2515_vm10, 1.0, %v6005_v3 }
 0x42a   : > { %v3447_v12 = vpop.f32.mrb[12].mxu1  ;;  %v2536_v24 = vsel %vm2535_vm6, %v5912_v39, %v2534_v49  ;;  %vm2528_vm6 = vcmp.eq.f32.partialorder %v5937_v38, inf  ;;  %v2531_v49 = vand.u32 2147483648, %v5937_v38  ;;  %vm2730_vm0 = vmxor %vm6992_vm11, %vm7033_vm7  ;;  %vm6845_vm11 = vcmp.eq.s32.totalorder %v6017_v37, %v5994_v48 }
 0x42b   : > { %v6019_v22 = vadd.f32 %v3615_v62, %v3447_v12  ;;  %v1602_v18 = vpop.f32.mrb[13].mxu1  ;;  %v2539_v15 = vsel %vm2537_vm9, %v2538_v43, %v2536_v24  ;;  %v3961_v39 = vpop.eup %3960  ;;  %v2529_v32 = vsel %vm2528_vm6, %v5937_v38, %v2527_v14  ;;  %vm2530_vm9 = vcmp.eq.f32.partialorder %v5937_v38, 0.0  ;;  %vm2738_vm6 = vmand %vm2730_vm0, %vm6848_vm3 }
 0x42c   : > { %v3618_v31 = vpop.f32.mrb[14].mxu0  ;;  %v6022_v20 = vadd.f32 %v2200_v35, %v1602_v18  ;;  %v2583_v60 = vsel %vm2511_vm15, 0.0, %v2539_v15  ;;  %v6033_v43 = vadd.s32 %v2360_v9, %v2358_v41  ;;  %v2532_v19 = vsel %vm2530_vm9, %v2531_v49, %v2529_v32 }
 0x42d   : > { %v2212_v17 = vpop.f32.mrb[15].mxu0  ;;  %v2751_v51 = vsel %vm5648_vm5, %v2583_v60, 0.0  ;;  %v2548_v62 = vmul.f32 %v3961_v39, %v5957_v29  ;;  %vm2549_vm15 = vcmp.eq.f32.partialorder %v5957_v29, inf  ;;  %v2582_v38 = vsel %vm2510_vm8, 0.0, %v2532_v19  ;;  %v3963_v45 = vpop.eup %3962 }
 0x42e   : > { %v3450_v35 = vpop.f32.mrb[14].mxu1  ;;  %2760 = vmax.xlane.f32.xlu1 %v2751_v51  ;;  %vm2551_vm5 = vcmp.eq.f32.partialorder %v5957_v29, 0.0  ;;  %v2552_v41 = vand.u32 2147483648, %v5957_v29  ;;  %vm7034_vm9 = vnez %v6977_v40  ;;  %v7035_v12 = vsub.f32 %v5923_v59, %v5930_v30  ;;  %v2255_v60 = vpop.xlane.xlu1 %2254 }
 0x42f   : > { %v6040_v27 = vadd.f32 %v3618_v31, %v3450_v35  ;;  %v1616_v14 = vpop.f32.mrb[15].mxu1  ;;  %v2750_v26 = vsel %vm7034_vm9, %v2582_v38, 0.0  ;;  %v2550_v31 = vsel %vm2549_vm15, %v5957_v29, %v2548_v62  ;;  %v2541_v40 = vmul.f32 %v3963_v45, %v5984_v55  ;;  %vm2733_vm9 = vmxor %vm6999_vm13, %vm7033_vm7 }
 0x430   : > { %v6049_v9 = vadd.f32 %v2212_v17, %v1616_v14  ;;  %v6064_v24 = vmax.f32 %v7035_v12, 0.0  ;;  %2758 = vmax.xlane.f32.xlu0 %v2750_v26  ;;  %v2553_v17 = vsel %vm2551_vm5, %v2552_v41, %v2550_v31  ;;  %v7036_v29 = vsub.f32 %v5950_v47, %v5952_v7  ;;  %vm2732_vm13 = vmxor %vm6996_vm1, %vm7033_vm7 }
 0x431   : > { %v2585_v15 = vsel %vm2513_vm14, 0.0, %v2553_v17  ;;  %vm7037_vm0 = vcmp.lt.s32.totalorder %v4199_v8, 8  ;;  %vm2542_vm15 = vcmp.eq.f32.partialorder %v5984_v55, inf  ;;  %v2545_v59 = vand.u32 2147483648, %v5984_v55 }
 0x432   : > { %v6070_v18 = vmax.f32 %v7036_v29, 0.0  ;;  %vm6076_vm8 = vmand %vm2738_vm6, %vm7037_vm0  ;;  %v2753_v30 = vsel %vm5730_vm4, %v2585_v15, 0.0  ;;  %v2543_v47 = vsel %vm2542_vm15, %v5984_v55, %v2541_v40  ;;  %vm2544_vm5 = vcmp.eq.f32.partialorder %v5984_v55, 0.0 }
 0x433   : > { %3966 = vrsqrt.f32 %v6057_v6  ;;  %v3965_v57 = vpop.eup %3964  ;;  %vm7040_vm14 = vcmask 7168   ;;  %v7041_v49 = vcvt.f32.s32 %v5869_v46  ;;  %v2346_v51 = vcvt.f32.s32 %v5890_v56  ;;  %2764 = vmax.xlane.f32.xlu1 %v2753_v30  ;;  %vm6109_vm15 = vmand %vm2733_vm9, %vm6845_vm11 }
 0x434   : > { %v2896_v7 = vsel %vm7040_vm14, %v5976_v36, 0.0  ;;  %v2546_v32 = vsel %vm2544_vm5, %v2545_v59, %v2543_v47  ;;  %vm6846_vm4 = vcmp.eq.s32.totalorder %v6033_v43, %v5994_v48  ;;  %2470 = vadd.xlane.f32.xlu0 %v5988_v52  ;;  %v2778_v23 = vsel %vm6076_vm8, 1.0, %v6947_v50 }
 0x435   : > { %v2348_v39 = vshll.u32 %v7041_v49, 16  ;;  %vm7042_vm6 = vcmp.eq.f32.partialorder %v5928_v54, 0.0  ;;  %v2576_v36 = vmul.f32 %v3965_v57, %v6012_v44  ;;  %vm2577_vm0 = vcmp.eq.f32.partialorder %v6012_v44, inf  ;;  %vm2740_vm9 = vmand %vm2732_vm13, %vm6846_vm4 }
 0x436   : > { %v2584_v55 = vsel %vm7042_vm6, 0.0, %v2546_v32  ;;  %v2580_v46 = vand.u32 2147483648, %v6012_v44  ;;  %vm2514_vm5 = vcmp.eq.f32.partialorder %v6064_v24, 0.0  ;;  %vm2516_vm14 = vcmp.eq.f32.partialorder %v6070_v18, 0.0 }
 0x437   : > { %v2578_v54 = vsel %vm2577_vm0, %v6012_v44, %v2576_v36  ;;  %vm2579_vm6 = vcmp.eq.f32.partialorder %v6012_v44, 0.0  ;;  %v2522_v11 = vsel %vm2514_vm5, 1.0, %v6064_v24  ;;  %v2524_v52 = vsel %vm2516_vm14, 1.0, %v6070_v18  ;;  %2790 = vmax.xlane.f32.xlu1 %v2778_v23  ;;  %v2257_v18 = vpop.xlane.xlu0 %2256 }
 0x438   : > { %v6126_v35 = vadd.s32 %v2348_v39, %v2346_v51  ;;  %v2752_v19 = vsel %vm5705_vm12, %v2584_v55, 0.0  ;;  %v2581_v62 = vsel %vm2579_vm6, %v2580_v46, %v2578_v54  ;;  %3968 = vrsqrt.f32 %v2522_v11 }
 0x439   : > { %v2884_v44 = vmul.f32 %v5872_v2, %v7045_v25  ;;  %2762 = vmax.xlane.f32.xlu0 %v2752_v19  ;;  %vm7046_vm1 = vcmp.eq.f32.partialorder %v5979_v63, 0.0  ;;  %vm7047_vm0 = vcmp.lt.s32.totalorder %v4199_v8, 8  ;;  %3970 = vrsqrt.f32 %v2524_v52 }
 0x43a   : > { %v2589_v14 = vsel %vm7046_vm1, 0.0, %v2581_v62  ;;  %vm6142_vm11 = vmand %vm6109_vm15, %vm7047_vm0  ;;  %v2897_v34 = vadd.f32 %v2896_v7, %v5967_v4  ;;  %v7050_v41 = vmax.f32 %v5940_v13, 0.0  ;;  %vm6847_vm12 = vcmp.eq.s32.totalorder %v6126_v35, %v5994_v48 }
 0x43b   : > { %v2757_v38 = vsel %vm6142_vm11, %v2589_v14, 0.0  ;;  %vm7051_vm6 = vmmov %vm7047_vm0  ;;  %vm7054_vm13 = vcmask 7168   ;;  %vm2563_vm0 = vcmp.eq.f32.partialorder %v6057_v6, inf  ;;  %v2566_v4 = vand.u32 2147483648, %v6057_v6 }
 0x43c   : > { %v2885_v45 = vmul.f32 %v5883_v28, %v7050_v41  ;;  %2772 = vmax.xlane.f32.xlu1 %v2757_v38  ;;  %vm6156_vm15 = vmand %vm2740_vm9, %vm7051_vm6  ;;  %v2898_v31 = vsel %vm7054_vm13, %v2884_v44, 0.0  ;;  %v2573_v3 = vand.u32 2147483648, %v2524_v52  ;;  %v2781_v24 = vsel %vm6142_vm11, 1.0, %v6947_v50  ;;  %v2261_v44 = vpop.xlane.xlu0 %2260 }
 0x43d   : > { %v3967_v26 = vpop.eup %3966  ;;  %vm2731_vm1 = vmxor %vm6995_vm2, %vm7033_vm7  ;;  %v2899_v13 = vadd.f32 %v2898_v31, %v2897_v34  ;;  %v2780_v17 = vsel %vm6156_vm15, 1.0, %v6947_v50  ;;  %vm7056_vm2 = vcmp.lt.s32.totalorder %v4199_v8, 8  ;;  %vm7061_vm3 = vcmp.eq.s32.totalorder %v5593_v61, %v5232_v5 }
 0x43e   : > { %v2562_v12 = vmul.f32 %v3967_v26, %v6057_v6  ;;  %vm2739_vm9 = vmand %vm2731_vm1, %vm6847_vm12  ;;  %vm2556_vm1 = vcmp.eq.f32.partialorder %v2522_v11, inf  ;;  %v2591_v26 = vadd.f32 %v5865_v58, %v2257_v18  ;;  %v2603_v18 = vmul.f32 2.0, %v6019_v22 }
 0x43f   : > { %vm7055_vm6 = vmmov %vm7054_vm13  ;;  %vm2565_vm13 = vcmp.eq.f32.partialorder %v6057_v6, 0.0 }
 0x440   : > { %v2900_v40 = vsel %vm7055_vm6, %v2885_v45, 0.0  ;;  %v2564_v29 = vsel %vm2563_vm0, %v6057_v6, %v2562_v12  ;;  %2794 = vmax.xlane.f32.xlu1 %v2780_v17  ;;  %vm6180_vm4 = vmand %vm2739_vm9, %vm7056_vm2  ;;  %v2559_v6 = vand.u32 2147483648, %v2522_v11  ;;  %vm2558_vm0 = vcmp.eq.f32.partialorder %v2522_v11, 0.0  ;;  %v2265_v38 = vpop.xlane.xlu0 %2264 }
 0x441   : > { %v2567_v0 = vsel %vm2565_vm13, %v2566_v4, %v2564_v29  ;;  %v2901_v47 = vadd.f32 %v2900_v40, %v2899_v13  ;;  %vm2572_vm9 = vcmp.eq.f32.partialorder %v2524_v52, 0.0  ;;  %v2598_v12 = vmul.f32 2.0, %v5971_v53 }
 0x442   : > { %v3969_v15 = vpop.eup %3968  ;;  %v2587_v59 = vsel %vm2515_vm10, 0.0, %v2567_v0  ;;  %vm2570_vm10 = vcmp.eq.f32.partialorder %v2524_v52, inf  ;;  %v2590_v4 = vadd.f32 %v5865_v58, %v2255_v60  ;;  %v2601_v40 = vmul.f32 2.0, %v5999_v10 }
 0x443   : > { %v3971_v57 = vpop.eup %3970  ;;  %v2755_v7 = vsel %vm6180_vm4, %v2587_v59, 0.0  ;;  %v2555_v49 = vmul.f32 %v3969_v15, %v2522_v11  ;;  %v2593_v0 = vadd.f32 %v5865_v58, %v2261_v44  ;;  %v2600_v53 = vmul.f32 2.0, %v6001_v42 }
 0x444   : > { %2768 = vmax.xlane.f32.xlu0 %v2755_v7  ;;  %2902 = vadd.xlane.f32.xlu1 %v2901_v47  ;;  %v2569_v39 = vmul.f32 %v3971_v57, %v2524_v52  ;;  %v6204_v41 = vpop.xlane.xlu0 %2268  ;;  %v2606_v29 = vsub.f32 %v2590_v4, %v2598_v12  ;;  %v2605_v4 = vmul.f32 2.0, %v6040_v27 }
 0x445   : > { %v2557_v51 = vsel %vm2556_vm1, %v2522_v11, %v2555_v49  ;;  %v2779_v11 = vsel %vm6180_vm4, 1.0, %v6947_v50  ;;  %v2599_v50 = vmul.f32 2.0, %v5962_v16  ;;  %v2609_v16 = vsub.f32 %v2593_v0, %v2601_v40 }
 0x446   : > { %v2560_v32 = vsel %vm2558_vm0, %v2559_v6, %v2557_v51  ;;  %v2571_v23 = vsel %vm2570_vm10, %v2524_v52, %v2569_v39  ;;  %v2259_v52 = vpop.xlane.xlu1 %2258  ;;  %v6224_v47 = vmax.f32 %v2606_v29, 0.0 }
 0x447   : > { %v2586_v55 = vsel %vm2514_vm5, 0.0, %v2560_v32  ;;  %v2574_v36 = vsel %vm2572_vm9, %v2573_v3, %v2571_v23  ;;  %v2607_v13 = vsub.f32 %v2591_v26, %v2599_v50  ;;  %v2592_v57 = vadd.f32 %v5865_v58, %v2259_v52 }
 0x448   : > { %v2754_v46 = vsel %vm6076_vm8, %v2586_v55, 0.0  ;;  %v2588_v56 = vsel %vm2516_vm14, 0.0, %v2574_v36  ;;  %v2401_v63 = vpop.xlane.xlu0 %2400  ;;  %v6231_v10 = vmax.f32 %v2609_v16, 0.0  ;;  %vm2622_vm8 = vcmp.eq.f32.partialorder %v6224_v47, 0.0 }
 0x449   : > { %2766 = vmax.xlane.f32.xlu0 %v2754_v46  ;;  %v2756_v54 = vsel %vm6156_vm15, %v2588_v56, 0.0  ;;  %v6220_v59 = vmax.f32 %v2607_v13, 0.0  ;;  %v2608_v49 = vsub.f32 %v2592_v57, %v2600_v53  ;;  %v6245_v42 = vsel %vm2622_vm8, 1.0, %v6224_v47 }
 0x44a   : > { %v2263_v19 = vpop.xlane.xlu1 %2262  ;;  %vm2625_vm4 = vcmp.eq.f32.partialorder %v6231_v10, 0.0  ;;  %v2403_v55 = vcvt.f32.s32 %v2401_v63  ;;  %v2595_v63 = vadd.f32 %v5865_v58, %v2265_v38  ;;  %vm2640_vm1 = vcmp.eq.f32.partialorder %v6245_v42, inf }
 0x44b   : > { %vm2623_vm11 = vcmp.eq.f32.partialorder %v6220_v59, 0.0  ;;  %v6248_v51 = vmax.f32 %v2608_v49, 0.0  ;;  %v6256_v32 = vsel %vm2625_vm4, 1.0, %v6231_v10  ;;  %v2594_v44 = vadd.f32 %v5865_v58, %v2263_v19 }
 0x44c   : > { %v2399_v31 = vpop.xlane.xlu0 %2398  ;;  %v6236_v6 = vsel %vm2623_vm11, 1.0, %v6220_v59  ;;  %v2404_v52 = vshll.u32 %v2403_v55, 16  ;;  %v2611_v22 = vsub.f32 %v2595_v63, %v2603_v18  ;;  %v2604_v19 = vmul.f32 2.0, %v6049_v9 }
 0x44d   : > { %2770 = vmax.xlane.f32.xlu0 %v2756_v54  ;;  %3972 = vrsqrt.f32 %v6236_v6  ;;  %vm6849_vm5 = vcmp.eq.f32.partialorder %v6248_v51, 0.0  ;;  %v2402_v56 = vcvt.f32.s32 %v2399_v31  ;;  %vm2647_vm6 = vcmp.eq.f32.partialorder %v6236_v6, inf }
 0x44e   : > { %v6200_v62 = vpop.xlane.xlu1 %2266  ;;  %3974 = vrsqrt.f32 %v6245_v42  ;;  %v2650_v55 = vand.u32 2147483648, %v6236_v6  ;;  %vm2649_vm2 = vcmp.eq.f32.partialorder %v6236_v6, 0.0  ;;  %vm2661_vm12 = vcmp.eq.f32.partialorder %v6256_v32, inf }
 0x44f   : > { %3976 = vrsqrt.f32 %v6256_v32  ;;  %v6275_v50 = vadd.s32 %v2404_v52, %v2402_v56  ;;  %v2596_v40 = vadd.f32 %v5865_v58, %v6200_v62  ;;  %v2664_v59 = vand.u32 2147483648, %v6256_v32 }
 0x450   : > { %v6218_v15 = vpop.xlane.xlu0 %2410 }
 0x451   : > { %2792 = vmax.xlane.f32.xlu0 %v2779_v11  ;;  %v2602_v11 = vmul.f32 2.0, %v6022_v20  ;;  %vm2711_vm15 = vcmp.eq.s32.totalorder %v6275_v50, %v5994_v48  ;;  %vm2719_vm13 = vcmp.eq.s32.totalorder %v5593_v61, %v6275_v50 }
 0x452   : > { %v2389_v25 = vpop.xlane.xlu1 %2388 }
 0x453   : > { %v2391_v23 = vcvt.f32.s32 %v2389_v25  ;;  %v2610_v12 = vsub.f32 %v2594_v44, %v2602_v11 }
 0x454   : > { %v6229_v7 = vpop.xlane.xlu0 %2436 }
 0x455   : > { %2796 = vmax.xlane.f32.xlu0 %v2781_v24  ;;  %v6268_v24 = vsel %vm6849_vm5, 1.0, %v6248_v51  ;;  %v2392_v60 = vshll.u32 %v2391_v23, 16  ;;  %v6297_v53 = vmax.f32 %v2610_v12, 0.0  ;;  %vm6344_vm5 = vmxor %vm7061_vm3, %vm7033_vm7 }
 0x456   : > { %v2387_v14 = vpop.xlane.xlu1 %2386  ;;  %3978 = vrsqrt.f32 %v6268_v24 }
 0x457   : > { %v2390_v46 = vcvt.f32.s32 %v2387_v14  ;;  %v3973_v25 = vpop.eup %3972  ;;  %vm6850_vm0 = vcmp.eq.f32.partialorder %v6297_v53, 0.0 }
 0x458   : > { %v6250_v3 = vpop.xlane.xlu0 %2434  ;;  %v3975_v13 = vpop.eup %3974  ;;  %v2646_v38 = vmul.f32 %v3973_v25, %v6236_v6 }
 0x459   : > { %v6273_v14 = vadd.s32 %v2392_v60, %v2390_v46  ;;  %v3977_v9 = vpop.eup %3976  ;;  %v2639_v62 = vmul.f32 %v3975_v13, %v6245_v42  ;;  %v2439_v46 = vcvt.f32.s32 %v6229_v7  ;;  %v2438_v11 = vcvt.f32.s32 %v6250_v3 }
 0x45a   : > { %v6202_v34 = vpop.xlane.xlu1 %2412  ;;  %v2648_v57 = vsel %vm2647_vm6, %v6236_v6, %v2646_v38  ;;  %v2660_v56 = vmul.f32 %v3977_v9, %v6256_v32  ;;  %vm6332_vm6 = vmxor %vm2711_vm15, %vm7033_vm7 }
 0x45b   : > { %v2415_v20 = vcvt.f32.s32 %v6202_v34  ;;  %v2414_v34 = vcvt.f32.s32 %v6218_v15  ;;  %vm2710_vm14 = vcmp.eq.s32.totalorder %v6273_v14, %v5994_v48  ;;  %v6303_v15 = vmax.f32 %v2611_v22, 0.0 }
 0x45c   : > { %v6262_v54 = vpop.xlane.xlu0 %2446  ;;  %v2651_v52 = vsel %vm2649_vm2, %v2650_v55, %v2648_v57  ;;  %v2641_v18 = vsel %vm2640_vm1, %v6245_v42, %v2639_v62  ;;  %vm2718_vm10 = vcmp.eq.s32.totalorder %v5595_v33, %v6273_v14  ;;  %vm2642_vm1 = vcmp.eq.f32.partialorder %v6245_v42, 0.0  ;;  %vm6362_vm3 = vmxor %vm2710_vm14, %vm7033_vm7 }
 0x45d   : > { %v2416_v27 = vshll.u32 %v2415_v20, 16  ;;  %v2643_v20 = vand.u32 2147483648, %v6245_v42  ;;  %vm6851_vm9 = vcmp.eq.f32.partialorder %v6303_v15, 0.0  ;;  %v2695_v22 = vsel %vm2623_vm11, 0.0, %v2651_v52 }
 0x45e   : > { %v6206_v45 = vpop.xlane.xlu1 %2424  ;;  %v6356_v42 = vsel %vm6850_vm0, 1.0, %v6297_v53  ;;  %vm2663_vm11 = vcmp.eq.f32.partialorder %v6256_v32, 0.0  ;;  %vm7066_vm0 = vcmp.eq.s32.totalorder %v5595_v33, %v5232_v5  ;;  %v2450_v9 = vcvt.f32.s32 %v6262_v54 }
 0x45f   : > { %v2427_v31 = vcvt.f32.s32 %v6206_v45  ;;  %v2597_v45 = vadd.f32 %v5865_v58, %v6204_v41  ;;  %v2612_v41 = vsub.f32 %v2596_v40, %v2604_v19  ;;  %v6306_v49 = vadd.s32 %v2416_v27, %v2414_v34  ;;  %vm6384_vm15 = vmxor %vm7066_vm0, %vm7033_vm7 }
 0x460   : > { %v6289_v0 = vpop.xlane.xlu0 %2458  ;;  %v3979_v25 = vpop.eup %3978  ;;  %v2662_v19 = vsel %vm2661_vm12, %v6256_v32, %v2660_v56  ;;  %vm2823_vm12 = vmand %vm6332_vm6, %vm6344_vm5  ;;  %3980 = vrsqrt.f32 %v6356_v42  ;;  %vm2654_vm0 = vcmp.eq.f32.partialorder %v6268_v24, inf }
 0x461   : > { %v2428_v16 = vshll.u32 %v2427_v31, 16  ;;  %v2613_v58 = vsub.f32 %v2597_v45, %v2605_v4  ;;  %v6324_v63 = vmax.f32 %v2612_v41, 0.0  ;;  %v2644_v4 = vsel %vm2642_vm1, %v2643_v20, %v2641_v18  ;;  %v7074_v31 = vld [vmem:[#allocation39_spill] sm:$0xff] }
 0x462   : > { %v6208_v1 = vpop.xlane.xlu1 %2422  ;;  %v6371_v45 = vsel %vm6851_vm9, 1.0, %v6303_v15  ;;  %v2694_v62 = vsel %vm2622_vm8, 0.0, %v2644_v4  ;;  %vm2822_vm9 = vmand %vm6362_vm3, %vm6384_vm15  ;;  %vm7069_vm8 = vcmp.lt.s32.totalorder %v4199_v8, 8 }
 0x463   : > { %v2426_v29 = vcvt.f32.s32 %v6208_v1  ;;  %v6322_v44 = vmax.f32 %v2613_v58, 0.0  ;;  %vm2628_vm1 = vcmp.eq.f32.partialorder %v6324_v63, 0.0  ;;  %v2665_v58 = vsel %vm2663_vm11, %v2664_v59, %v2662_v19  ;;  %vm6408_vm11 = vmand %vm2823_vm12, %vm7069_vm8 }
 0x464   : > { %v2783_v60 = vpop.xlane.xlu0 %2782  ;;  %3982 = vrsqrt.f32 %v6371_v45  ;;  %v6418_v56 = vsel %vm2628_vm1, 1.0, %v6324_v63 }
 0x465   : > { %v6308_v23 = vadd.s32 %v2428_v16, %v2426_v29  ;;  %v2653_v29 = vmul.f32 %v3979_v25, %v6268_v24  ;;  %vm2629_vm14 = vcmp.eq.f32.partialorder %v6322_v44, 0.0  ;;  %v2697_v25 = vsel %vm2625_vm4, 0.0, %v2665_v58 }
 0x466   : > { %v6214_v17 = vpop.xlane.xlu1 %2448  ;;  %v6434_v20 = vsel %vm2629_vm14, 1.0, %v6322_v44  ;;  %v2798_v10 = vsel %vm2718_vm10, 0.0, %v2783_v60  ;;  %vm2656_vm4 = vcmp.eq.f32.partialorder %v6268_v24, 0.0  ;;  %3984 = vrsqrt.f32 %v6418_v56 }
 0x467   : > { %vm2713_vm2 = vcmp.eq.s32.totalorder %v6308_v23, %v5994_v48  ;;  %v2655_v50 = vsel %vm2654_vm0, %v6268_v24, %v2653_v29  ;;  %v2451_v33 = vcvt.f32.s32 %v6214_v17  ;;  %vm2721_vm15 = vcmp.eq.s32.totalorder %v7074_v31, %v6308_v23 }
 0x468   : > { %vm6424_vm5 = vmxor %vm2713_vm2, %vm7033_vm7  ;;  %3986 = vrsqrt.f32 %v6434_v20  ;;  %vm7086_vm0 = vcmp.eq.f32.partialorder %v6248_v51, 0.0  ;;  %v7090_v51 = vld [vmem:[#allocation29_spill] sm:$0xff]  ;;  %v2671_v23 = vand.u32 2147483648, %v6356_v42  ;;  %v2692_v47 = vand.u32 2147483648, %v6434_v20 }
 0x469   : > { %vm7078_vm2 = vmmov %vm7069_vm8 }
 0x46a   : > { %v6222_v30 = vpop.xlane.xlu1 %2460  ;;  %vm6457_vm12 = vmand %vm2822_vm9, %vm7078_vm2  ;;  %vm7082_vm9 = vcmp.eq.s32.totalorder %v6306_v49, %v5994_v48 }
 0x46b   : > { %v2463_v17 = vcvt.f32.s32 %v6222_v30  ;;  %vm6481_vm3 = vmxor %vm7082_vm9, %vm7033_vm7  ;;  %vm2668_vm9 = vcmp.eq.f32.partialorder %v6356_v42, inf }
 0x46c   : > { %vm7087_vm8 = vmmov %vm7078_vm2 }
 0x46e   : > { %v6239_v39 = vpop.xlane.xlu1 %2472 }
 0x472   : > { %v6258_v36 = vpop.xlane.xlu1 %2784 }
 0x473   : > { %v2799_v32 = vsel %vm2719_vm13, 0.0, %v6258_v36  ;;  %vm7075_vm13 = vcmp.eq.s32.totalorder %v7074_v31, %v5232_v5  ;;  %v2475_v31 = vcvt.f32.s32 %v6239_v39  ;;  %v7094_v39 = vld [vmem:[#allocation32_spill] sm:$0xff] }
 0x474   : > { %vm6440_vm6 = vmxor %vm7075_vm13, %vm7033_vm7  ;;  %vm7091_vm13 = vcmp.eq.s32.totalorder %v7090_v51, %v5232_v5 }
 0x475   : > { %vm2825_vm10 = vmand %vm6424_vm5, %vm6440_vm6  ;;  %vm2720_vm6 = vcmp.eq.s32.totalorder %v7090_v51, %v6306_v49  ;;  %v2476_v4 = vshll.u32 %v2475_v31, 16 }
 0x476   : > { %v6278_v26 = vpop.xlane.xlu1 %2786 }
 0x47a   : > { %v6301_v1 = vpop.xlane.xlu1 %2788 }
 0x47b   : > { %v2801_v59 = vsel %vm2721_vm15, 0.0, %v6301_v1 }
 0x4bb   : > { %v2761_v6 = vpop.xlane.xlu1 %2760 }
 0x4bc   : > { %v2839_v12 = vadd.f32 0.1, %v2761_v6  ;;  %v2657_v6 = vand.u32 2147483648, %v6268_v24  ;;  %v7081_v24 = vld [vmem:[#allocation30_spill] sm:$0xff] }
 0x4bd   : > { %v2759_v34 = vpop.xlane.xlu0 %2758 }
 0x4be   : > { %v2847_v40 = vsub.f32 %v2839_v12, %v2695_v22  ;;  %v2838_v27 = vadd.f32 0.1, %v2759_v34  ;;  %v2658_v19 = vsel %vm2656_vm4, %v2657_v6, %v2655_v50  ;;  %vm6507_vm4 = vmxor %vm7091_vm13, %vm7033_vm7 }
 0x4bf   : > { %v2696_v30 = vsel %vm7086_vm0, 0.0, %v2658_v19  ;;  %vm2824_vm5 = vmand %vm6481_vm3, %vm6507_vm4  ;;  %vm2675_vm0 = vcmp.eq.f32.partialorder %v6371_v45, inf  ;;  %vm2689_vm4 = vcmp.eq.f32.partialorder %v6434_v20, inf }
 0x4c0   : > { %v2855_v16 = vmax.f32 %v2847_v40, 0.0  ;;  %v2846_v41 = vsub.f32 %v2838_v27, %v2694_v62  ;;  %v2765_v57 = vpop.xlane.xlu1 %2764 }
 0x4c1   : > { %v2841_v61 = vadd.f32 0.1, %v2765_v57  ;;  %v6412_v36 = vpop.xlane.xlu0 %2470  ;;  %v3981_v57 = vpop.eup %3980 }
 0x4c2   : > { %v2863_v55 = vmul.f32 %v2855_v16, %v2799_v32  ;;  %v2854_v18 = vmax.f32 %v2846_v41, 0.0  ;;  %v7085_v16 = vld [vmem:[#allocation31_spill] sm:$0xff]  ;;  %v2462_v32 = vcvt.f32.s32 %v6289_v0  ;;  %v3983_v52 = vpop.eup %3982 }
 0x4c3   : > { %v2849_v22 = vsub.f32 %v2841_v61, %v2697_v25  ;;  %v2452_v61 = vshll.u32 %v2451_v33, 16  ;;  %v2800_v25 = vsel %vm2720_vm6, 0.0, %v6278_v26  ;;  %v3985_v49 = vpop.eup %3984  ;;  %vm2682_vm6 = vcmp.eq.f32.partialorder %v6418_v56, inf }
 0x4c4   : > { %v2871_v13 = vsel %vm6408_vm11, %v2863_v55, 0.0  ;;  %v2862_v14 = vmul.f32 %v2854_v18, %v2798_v10  ;;  %v6462_v60 = vpop.xlane.xlu1 %2790  ;;  %vm6496_vm11 = vmand %vm2825_vm10, %vm7087_vm8  ;;  %v2440_v55 = vshll.u32 %v2439_v46, 16  ;;  %v2464_v18 = vshll.u32 %v2463_v17, 16 }
 0x4c5   : > { %v2913_v38 = vmul.f32 %v7081_v24, %v2871_v13  ;;  %v2857_v40 = vmax.f32 %v2849_v22, 0.0  ;;  %v6525_v46 = vadd.s32 %v2452_v61, %v2450_v9  ;;  %v2667_v13 = vmul.f32 %v3981_v57, %v6356_v42  ;;  %v3987_v22 = vpop.eup %3986  ;;  %v7095_v24 = vld [vmem:[#allocation33_spill] sm:$0xff] }
 0x4c6   : > { %v2763_v34 = vpop.xlane.xlu0 %2762  ;;  %v2870_v29 = vsel %vm6457_vm12, %v2862_v14, 0.0  ;;  %v6523_v7 = vadd.s32 %v2440_v55, %v2438_v11  ;;  %v6528_v6 = vadd.s32 %v2464_v18, %v2462_v32  ;;  %vm2832_vm12 = vmand %vm2824_vm5, %vm7078_vm2  ;;  %v2674_v11 = vmul.f32 %v3983_v52, %v6371_v45 }
 0x4c7   : > { %v2840_v27 = vadd.f32 0.1, %v2763_v34  ;;  %v2912_v62 = vmul.f32 %v7085_v16, %v2870_v29  ;;  %v2865_v58 = vmul.f32 %v2857_v40, %v2801_v59  ;;  %vm2715_vm15 = vcmp.eq.s32.totalorder %v6525_v46, %v5994_v48 }
 0x4c8   : > { %vm2714_vm10 = vcmp.eq.s32.totalorder %v6523_v7, %v5994_v48  ;;  %vm2716_vm3 = vcmp.eq.s32.totalorder %v6528_v6, %v5994_v48  ;;  %v2669_v14 = vsel %vm2668_vm9, %v6356_v42, %v2667_v13  ;;  %v2681_v17 = vmul.f32 %v3985_v49, %v6418_v56 }
 0x4c9   : > { %v2848_v54 = vsub.f32 %v2840_v27, %v2696_v30  ;;  %v6501_v41 = vpop.xlane.xlu1 %2772  ;;  %v2920_v50 = vadd.f32 %v2913_v38, %v2912_v62  ;;  %v2873_v0 = vsel %vm6496_vm11, %v2865_v58, 0.0  ;;  %v2688_v59 = vmul.f32 %v3987_v22, %v6434_v20  ;;  %vm6572_vm2 = vmxor %vm2714_vm10, %vm7033_vm7 }
 0x4ca   : > { %v2915_v38 = vmul.f32 %v7095_v24, %v2873_v0  ;;  %v2676_v29 = vsel %vm2675_vm0, %v6371_v45, %v2674_v11  ;;  %v2678_v27 = vand.u32 2147483648, %v6371_v45  ;;  %v2474_v9 = vcvt.f32.s32 %v6412_v36 }
 0x4cb   : > { %v2856_v5 = vmax.f32 %v2848_v54, 0.0  ;;  %vm2670_vm8 = vcmp.eq.f32.partialorder %v6356_v42, 0.0  ;;  %vm7096_vm11 = vcmp.eq.s32.totalorder %v5960_v21, %v5994_v48  ;;  %vm2677_vm5 = vcmp.eq.f32.partialorder %v6371_v45, 0.0 }
 0x4cc   : > { %vm6561_vm13 = vmxor %vm7096_vm11, %vm7033_vm7  ;;  %v2672_v30 = vsel %vm2670_vm8, %v2671_v23, %v2669_v14  ;;  %v2679_v36 = vsel %vm2677_vm5, %v2678_v27, %v2676_v29  ;;  %v2683_v57 = vsel %vm2682_vm6, %v6418_v56, %v2681_v17  ;;  %v2690_v51 = vsel %vm2689_vm4, %v6434_v20, %v2688_v59  ;;  %v7124_v29 = vld [vmem:[#allocation35_spill] sm:$0xff] }
 0x4cd   : > { %v2864_v12 = vmul.f32 %v2856_v5, %v2800_v25  ;;  %v6531_v10 = vpop.xlane.xlu1 %2794  ;;  %v2685_v61 = vand.u32 2147483648, %v6418_v56  ;;  %vm7104_vm10 = vcmp.eq.s32.totalorder %v6033_v43, %v5994_v48  ;;  %v2477_v0 = vadd.s32 %v2476_v4, %v2474_v9  ;;  %vm2826_vm6 = vmand %vm6572_vm2, %vm6561_vm13 }
 0x4ce   : > { %vm6592_vm0 = vmxor %vm7104_vm10, %vm7033_vm7  ;;  %vm7107_vm8 = vcmp.eq.f32.partialorder %v6297_v53, 0.0  ;;  %vm2684_vm11 = vcmp.eq.f32.partialorder %v6418_v56, 0.0  ;;  %vm7108_vm4 = vcmp.eq.s32.totalorder %v6017_v37, %v5994_v48  ;;  %vm7111_vm10 = vcmp.eq.f32.partialorder %v6303_v15, 0.0 }
 0x4cf   : > { %v2872_v3 = vsel %vm2832_vm12, %v2864_v12, 0.0  ;;  %vm7101_vm12 = vcmp.eq.s32.totalorder %v6126_v35, %v5994_v48  ;;  %v2698_v52 = vsel %vm7107_vm8, 0.0, %v2672_v30  ;;  %vm6603_vm5 = vmxor %vm7108_vm4, %vm7033_vm7  ;;  %v2699_v53 = vsel %vm7111_vm10, 0.0, %v2679_v36 }
 0x4d0   : > { %v2914_v26 = vmul.f32 %v7094_v39, %v2872_v3  ;;  %vm6581_vm9 = vmxor %vm7101_vm12, %vm7033_vm7  ;;  %vm2691_vm12 = vcmp.eq.f32.partialorder %v6434_v20, 0.0  ;;  %v2686_v25 = vsel %vm2684_vm11, %v2685_v61, %v2683_v57  ;;  %v2845_v13 = vadd.f32 0.1, %v6501_v41 }
 0x4d1   : > { %v2769_v33 = vpop.xlane.xlu0 %2768  ;;  %v2903_v19 = vpop.xlane.xlu1 %2902  ;;  %vm6618_vm8 = vmxor %vm2715_vm15, %vm7033_vm7  ;;  %v2693_v12 = vsel %vm2691_vm12, %v2692_v47, %v2690_v51  ;;  %vm2722_vm15 = vcmp.eq.s32.totalorder %v5960_v21, %v6523_v7  ;;  %vm7116_vm11 = vcmp.lt.s32.totalorder %v4199_v8, 8  ;;  %v2700_v21 = vsel %vm2628_vm1, 0.0, %v2686_v25 }
 0x4d2   : > { %v2921_v40 = vadd.f32 %v2920_v50, %v2914_v26  ;;  %v2904_v34 = vrot.slane %v2903_v19, 4  ;;  %v2843_v1 = vadd.f32 0.1, %v2769_v33  ;;  %vm6627_vm4 = vmxor %vm2716_vm3, %vm7033_vm7  ;;  %vm2717_vm3 = vcmp.eq.s32.totalorder %v2477_v0, %v5994_v48 }
 0x4d3   : > { %vm6640_vm12 = vmand %vm2826_vm6, %vm7116_vm11  ;;  %v2802_v39 = vsel %vm2722_vm15, 0.0, %v6462_v60  ;;  %v2701_v26 = vsel %vm2629_vm14, 0.0, %v2693_v12  ;;  %vm2723_vm1 = vcmp.eq.s32.totalorder %v6126_v35, %v6525_v46  ;;  %vm2725_vm15 = vcmp.eq.s32.totalorder %v6017_v37, %v2477_v0 }
 0x4d4   : > { %v2905_v16 = vadd.f32 %v2904_v34, %v2903_v19  ;;  %v6555_v62 = vadd.f32 %v2921_v40, %v2915_v38  ;;  %v2851_v49 = vsub.f32 %v2843_v1, %v2699_v53  ;;  %vm2827_vm13 = vmand %vm6618_vm8, %vm6581_vm9  ;;  %v2853_v48 = vsub.f32 %v2845_v13, %v2701_v26  ;;  %v7121_v40 = vld [vmem:[#allocation34_spill] sm:$0xff] }
 0x4d5   : > { %vm2828_vm2 = vmand %vm6627_vm4, %vm6592_vm0  ;;  %vm2724_vm9 = vcmp.eq.s32.totalorder %v6033_v43, %v6528_v6 }
 0x4d6   : > { %v2767_v32 = vpop.xlane.xlu0 %2766  ;;  %v2906_v54 = vrot.slane %v2905_v16, 2  ;;  %v2859_v60 = vmax.f32 %v2851_v49, 0.0  ;;  %vm6661_vm14 = vmxor %vm2717_vm3, %vm7033_vm7  ;;  %v2804_v38 = vsel %vm2724_vm9, 0.0, %v6531_v10  ;;  %v2861_v46 = vmax.f32 %v2853_v48, 0.0 }
 0x4d7   : > { %v2842_v55 = vadd.f32 0.1, %v2767_v32  ;;  %vm7122_vm6 = vmmov %vm7116_vm11 }
 0x4d8   : > { %v2907_v18 = vadd.f32 %v2906_v54, %v2905_v16  ;;  %vm2835_vm10 = vmand %vm2827_vm13, %vm7122_vm6 }
 0x4d9   : > { %v2850_v56 = vsub.f32 %v2842_v55, %v2698_v52  ;;  %vm7123_vm7 = vmmov %vm7122_vm6 }
 0x4da   : > { %v2771_v3 = vpop.xlane.xlu0 %2770  ;;  %v2908_v11 = vrot.slane %v2907_v18, 1  ;;  %vm2836_vm8 = vmand %vm2828_vm2, %vm7123_vm7 }
 0x4db   : > { %v2858_v20 = vmax.f32 %v2850_v56, 0.0  ;;  %v2844_v22 = vadd.f32 0.1, %v2771_v3  ;;  %vm2829_vm11 = vmand %vm6661_vm14, %vm6603_vm5 }
 0x4dc   : > { %v2909_v7 = vadd.f32 %v2908_v11, %v2907_v18  ;;  %vm7125_vm0 = vmmov %vm7122_vm6 }
 0x4dd   : > { %v2866_v4 = vmul.f32 %v2858_v20, %v2802_v39  ;;  %v2852_v33 = vsub.f32 %v2844_v22, %v2700_v21  ;;  %vm2837_vm4 = vmand %vm2829_vm11, %vm7125_vm0 }
 0x4de   : > { %v2793_v63 = vpop.xlane.xlu0 %2792  ;;  %3891 = vpush %v2909_v7 }
 0x4df   : > { %v2874_v14 = vsel %vm6640_vm12, %v2866_v4, 0.0  ;;  %v2860_v19 = vmax.f32 %v2852_v33, 0.0  ;;  %v2803_v24 = vsel %vm2723_vm1, 0.0, %v2793_v63 }
 0x4e0   : > { %v2916_v34 = vmul.f32 %v7121_v40, %v2874_v14  ;;  %v2867_v35 = vmul.f32 %v2859_v60, %v2803_v24 }
 0x4e1   : > { %v2868_v43 = vmul.f32 %v2860_v19, %v2804_v38 }
 0x4e2   : > { %v2875_v6 = vsel %vm2835_vm10, %v2867_v35, 0.0  ;;  %v2923_v17 = vadd.f32 %v6555_v62, %v2916_v34  ;;  %v2797_v10 = vpop.xlane.xlu0 %2796 }
 0x4e3   : > { %v2876_v59 = vsel %vm2836_vm8, %v2868_v43, 0.0  ;;  %v2917_v27 = vmul.f32 %v7124_v29, %v2875_v6  ;;  %v2805_v23 = vsel %vm2725_vm15, 0.0, %v2797_v10 }
 0x4e4   : > { %v2869_v9 = vmul.f32 %v2861_v46, %v2805_v23  ;;  %v2918_v16 = vmul.f32 %v5872_v2, %v2876_v59 }
 0x4e5   : > { %v2924_v58 = vadd.f32 %v2923_v17, %v2917_v27 }
 0x4e6   : > { %v2877_v62 = vsel %vm2837_vm4, %v2869_v9, 0.0 }
 0x4e7   : > { %v2919_v37 = vmul.f32 %v5883_v28, %v2877_v62  ;;  %v2925_v30 = vadd.f32 %v2924_v58, %v2918_v16 }
 0x4e9   : > { %v2926_v42 = vadd.f32 %v2925_v30, %v2919_v37 }
 0x4eb   : > { %2927 = vadd.xlane.f32.xlu0 %v2926_v42 }
 0x50f   : > { %s3892_s13 = spop %3891 }
 0x510   : > { %s2911_s14 = smul.f32 0.125, %s3892_s13 }
 0x578   : > { %v2928_v36 = vpop.xlane.xlu0 %2927 }
 0x579   : > { %v2929_v1 = vrot.slane %v2928_v36, 4 }
 0x57b   : > { %v2930_v32 = vadd.f32 %v2929_v1, %v2928_v36 }
 0x57d   : > { %v2931_v54 = vrot.slane %v2930_v32, 2 }
 0x57f   : > { %v2932_v57 = vadd.f32 %v2931_v54, %v2930_v32 }
 0x581   : > { %v2933_v45 = vrot.slane %v2932_v57, 1 }
 0x583   : > { %v2934_v51 = vadd.f32 %v2933_v45, %v2932_v57 }
 0x585   : > { %3893 = vpush %v2934_v51 }
 0x5b6   : > { %s3894_s15 = spop %3893 }
 0x5b7   : > { %s2936_s17 = smul.f32 0.015625, %s3894_s15 }
 0x5b9   : > { %s2937_s26 = sadd.f32 %s2936_s17, %s2911_s14 }
 0x5bb   : > { %v2938_v8 = vstv %s2937_s26 }
 0x5bc   : > { %2940 = vst [vmem:[%s202_s23] sm:$0xff] %v2938_v8 }
 0x5bd   : > { %4005 = shalt.err (!%p4002_p2)
}
 0x5be   : > { %s4006_s11 = scalar_lea.hbm %s6696_s7, 128  ;;  %s4010_s15 = scalar_lea.hbm %s6743_s5, 256 }
 0x5bf   : > { %p4007_p3 = scmp.ne.s32.totalorder %s6696_s7, %s4006_s11  ;;  %p4011_p8 = scmp.lt.u32.totalorder %s6696_s7, %s6743_s5 }
 0x5c0   : > { %p4012_p9 = scmp.lt.u32.totalorder %s4010_s15, %s4006_s11  ;;  %p4014_p11 = scmp.lt.u32.totalorder %s4006_s11, %s6696_s7 }
 0x5c1   : > { %p4008_p4 = pnand %p4007_p3, %p4129_p5 }
 0x5c2   : > { %p4013_p10 = por %p4012_p9, %p4011_p8 }
 0x5c3   : > { %p4009_p7 = pneg %p4008_p4 }
 0x5c4   : > { %p4015_p12 = por %p4014_p11, %p4013_p10 }
 0x5c6   : > { %p4016_p13 = pnand %p4015_p12, %p4009_p7 }
 0x5c8   : > { %4019 = shalt.err (!%p4016_p13)
}
 0x5c9   : > { %3895 = dma.vmem_to_hbm [thread:$0]  (%p4129_p5), %s6698_s25, 128, %s6696_s7, %s2942_s8  }
 0x5ca PF: > { %p3901_p0 = scmp.ge.s32.totalorder %s4054_s21, 2  ;;  %s2967_s23 = sand.u32 1, %s4042_s18  }
 0x5cb   : > { %s2968_s26 = scalar_lea.sflag [#allocation3], %s2967_s23 }
 0x5cc   : > { %p3898_p1 = pnand %p3901_p0, %p4133_p6 }
 0x5ce   : > { %4037 = dma.done.wait (!%p3898_p1), %s2968_s26, 128  }
 0x5cf   : > { %4039 = vsyncadd (!%p3898_p1), %s2968_s26, 4294967168  ;;  %p15_p2 = scmp.ge.s32.totalorder %s4116_s24, 4   ;;  %s7126_s18 = smov %s4046_s19 }
 0x5d0   : > { %s7127_s19 = smov %s4050_s20  ;;  %s7128_s20 = smov %s4127_s27 }
 0x5d1   : > { %s7129_s21 = smov %s4116_s24  ;;  %17 = sbr.rel (!%p15_p2) target bundleno = 3 (0x3), region = 75 }
 0x5d8   :  { %2973 = vsyncpa [#allocation3], 1 }
 0x5d9   :  { %2975 = vsyncpa [#allocation3 + $0x1], 1 }

</bundles_post_ra>
